<compile_context>
chip_gen: v6e
topology: v6e:2x2x1
jax: 0.10.0
libtpu: 0.0.40
codegen_flags: <defaults>
</compile_context>

<pallas_src>
import jax
import jax.numpy as jnp
from jax.experimental import pallas as pl
from jax.experimental.pallas import tpu as pltpu

# --- configuration (small, consistent with the module's forward) ------------
B        = 4                       # batch
D_IN     = 16                      # zim features
H1, H2   = 32, 24                  # pre_lin_conf = [(32, .1), (24, .1)]
N_DLQ    = 9                       # dlq width (post_linblock input = hidden + 9)
D_MACRO  = 7                       # macro features per month
H_LSTM   = 32                      # lstm_conf['lstm_size']
P1       = 16                      # post_lin_conf = [(16, .1), (9, .1)]
T        = 12                      # horizon (hard-coded 12 in the PyTorch forward)
LSTM_IN  = H2 + N_DLQ + D_MACRO    # lstm_conf['input_size'] == 40
G3       = 3 * H_LSTM              # gate width after dropping the forget gate

# --- packed-parameter slab layout (all row offsets are multiples of 8) -------
RO_W1, RO_W2       = 0, 16         # pre_linblock linear1 / linear2 (BN1 folded)
RO_WZ, RO_WD, RO_WM = 48, 72, 88   # LSTM layer-0 W_ih rows: zim-pre / dlq / macro
RO_WL1             = 96            # LSTM layer-1 W_ih
RO_WP1D, RO_WP1H   = 128, 144      # post linear1 rows: dlq / hidden
RO_WP2             = 176           # post linear2 (post-BN1 folded)
W_ROWS             = 192

(BR_B1, BR_B2, BR_S2, BR_SH2, BR_BIH0, BR_BIH1,
 BR_BP1, BR_BP2, BR_SP2, BR_SHP2) = range(10)
B_ROWS = 16


def _decoder_kernel(zim_ref, dlq0_ref, macro_ref, w_ref, b_ref, out_ref):
    f32 = jnp.float32
    H = H_LSTM

    # --- loop-invariant parameter slices (two packed slabs, loaded once) -----
    w1    = w_ref[RO_W1:RO_W1 + D_IN,       0:H1]      # (16, 32)
    w2f   = w_ref[RO_W2:RO_W2 + H1,         0:H2]      # (32, 24)  BN1 folded in
    w_z   = w_ref[RO_WZ:RO_WZ + H2,         0:G3]      # (24, 96)  LSTM l0, zim rows
    w_d   = w_ref[RO_WD:RO_WD + N_DLQ,      0:G3]      # ( 9, 96)  LSTM l0, dlq rows
    w_m   = w_ref[RO_WM:RO_WM + D_MACRO,    0:G3]      # ( 7, 96)  LSTM l0, macro rows
    w_l1  = w_ref[RO_WL1:RO_WL1 + H,        0:G3]      # (32, 96)  LSTM l1
    wp1_d = w_ref[RO_WP1D:RO_WP1D + N_DLQ,  0:P1]      # ( 9, 16)  post l1, dlq rows
    wp1_h = w_ref[RO_WP1H:RO_WP1H + H,      0:P1]      # (32, 16)  post l1, hidden rows
    wp2f  = w_ref[RO_WP2:RO_WP2 + P1,       0:N_DLQ]   # (16,  9)  post-BN1 folded in

    b1    = b_ref[BR_B1:BR_B1 + 1,       0:H1]
    b2f   = b_ref[BR_B2:BR_B2 + 1,       0:H2]
    s2    = b_ref[BR_S2:BR_S2 + 1,       0:H2]
    sh2   = b_ref[BR_SH2:BR_SH2 + 1,     0:H2]
    b_l0  = b_ref[BR_BIH0:BR_BIH0 + 1,   0:G3]
    b_l1  = b_ref[BR_BIH1:BR_BIH1 + 1,   0:G3]
    bp1   = b_ref[BR_BP1:BR_BP1 + 1,     0:P1]
    bp2f  = b_ref[BR_BP2:BR_BP2 + 1,     0:N_DLQ]
    sp2   = b_ref[BR_SP2:BR_SP2 + 1,     0:N_DLQ]
    shp2  = b_ref[BR_SHP2:BR_SHP2 + 1,   0:N_DLQ]

    # --- pre_linblock: runs once, reused for all 12 timesteps ----------------
    h = jnp.maximum(jnp.dot(zim_ref[...], w1, preferred_element_type=f32) + b1, 0.0)
    h = jnp.maximum(jnp.dot(h, w2f, preferred_element_type=f32) + b2f, 0.0)
    zimp = h * s2 + sh2                                                 # (B, H2)

    # Constant part of LSTM layer-0 gates (zimp and biases), hoisted out of the loop.
    g_base = jnp.dot(zimp, w_z, preferred_element_type=f32) + b_l0      # (B, 3H)

    def lstm_gates(g):
        # gate order [i, g, o]; forget gate dropped (c_prev == 0 -> f*c_prev == 0)
        i = jax.nn.sigmoid(g[:, 0:H])
        c = i * jnp.tanh(g[:, H:2 * H])
        o = jax.nn.sigmoid(g[:, 2 * H:3 * H])
        return o * jnp.tanh(c)

    dlq = dlq0_ref[...]                                                 # (B, 9)
    # Fully unrolled 12-step decode loop (single kernel invocation, static indices).
    for t in range(T):
        mac = macro_ref[t]                                              # (B, D_MACRO)
        # LSTM layer 0 with zero initial state.
        g = (jnp.dot(dlq, w_d, preferred_element_type=f32)
             + jnp.dot(mac, w_m, preferred_element_type=f32) + g_base)
        h_l0 = lstm_gates(g)
        # LSTM layer 1 (zero initial state).
        g2 = jnp.dot(h_l0, w_l1, preferred_element_type=f32) + b_l1
        h_l1 = lstm_gates(g2)                                           # hx[-1, :, :]
        # post_linblock on cat([dlq, h_l1]); its first BN folded into wp2f/bp2f.
        p = jnp.maximum(jnp.dot(dlq, wp1_d, preferred_element_type=f32)
                        + jnp.dot(h_l1, wp1_h, preferred_element_type=f32) + bp1, 0.0)
        d = jnp.dot(p, wp2f, preferred_element_type=f32) + bp2f
        dist = jnp.maximum(d, 0.0) * sp2 + shp2                         # (B, 9)
        out_ref[t] = dist
        # next dlq = one_hot(argmax(softmax(dist))) == one_hot(argmax(dist))
        mx  = jnp.max(dist, axis=1, keepdims=True)
        col = jax.lax.broadcasted_iota(jnp.int32, dist.shape, 1)
        idx = jnp.min(jnp.where(dist == mx, col, N_DLQ), axis=1, keepdims=True)
        dlq = (col == idx).astype(f32)


@jax.jit
def macro_mort_decoder(zim, dlq0, macro, w_slab, b_slab):
    macro_t = jnp.transpose(macro, (1, 0, 2))              # (T, B, D_MACRO)
    out = pl.pallas_call(
        _decoder_kernel,
        out_shape=jax.ShapeDtypeStruct((T, B, N_DLQ), jnp.float32),
    )(zim, dlq0, macro_t, w_slab, b_slab)
    return jnp.transpose(out, (1, 2, 0))                   # (B, 9, T) == stack(out, 2)


# -------------------------- host-side parameter prep ------------------------
def init_raw_params(key):
    """Raw PyTorch-layout parameters (Linear: (out,in); LSTM: (4H,in); BN running stats)."""
    ks = iter(jax.random.split(key, 64))

    def linear(fan_out, fan_in):
        bound = 1.0 / (fan_in ** 0.5)
        w = jax.random.uniform(next(ks), (fan_out, fan_in), jnp.float32, -bound, bound)
        b = jax.random.uniform(next(ks), (fan_out,), jnp.float32, -bound, bound)
        return w, b

    def batchnorm(n):
        gamma = jax.random.uniform(next(ks), (n,), jnp.float32, 0.5, 1.5)
        beta  = jax.random.uniform(next(ks), (n,), jnp.float32, -0.2, 0.2)
        mean  = jax.random.normal(next(ks), (n,), jnp.float32) * 0.1
        var   = jax.random.uniform(next(ks), (n,), jnp.float32, 0.5, 1.5)
        return gamma, beta, mean, var

    def lstm_layer(in_sz):
        bound = 1.0 / (H_LSTM ** 0.5)
        w_ih = jax.random.uniform(next(ks), (4 * H_LSTM, in_sz), jnp.float32, -bound, bound)
        w_hh = jax.random.uniform(next(ks), (4 * H_LSTM, H_LSTM), jnp.float32, -bound, bound)
        b_ih = jax.random.uniform(next(ks), (4 * H_LSTM,), jnp.float32, -bound, bound)
        b_hh = jax.random.uniform(next(ks), (4 * H_LSTM,), jnp.float32, -bound, bound)
        return w_ih, w_hh, b_ih, b_hh

    w1, b1 = linear(H1, D_IN); bn1 = batchnorm(H1)
    w2, b2 = linear(H2, H1);   bn2 = batchnorm(H2)
    w_ih0, w_hh0, b_ih0, b_hh0 = lstm_layer(LSTM_IN)
    w_ih1, w_hh1, b_ih1, b_hh1 = lstm_layer(H_LSTM)
    wp1, bp1 = linear(P1, N_DLQ + H_LSTM); bnp1 = batchnorm(P1)
    wp2, bp2 = linear(N_DLQ, P1);          bnp2 = batchnorm(N_DLQ)
    return dict(w1=w1, b1=b1, bn1=bn1, w2=w2, b2=b2, bn2=bn2,
                w_ih0=w_ih0, w_hh0=w_hh0, b_ih0=b_ih0, b_hh0=b_hh0,
                w_ih1=w_ih1, w_hh1=w_hh1, b_ih1=b_ih1, b_hh1=b_hh1,
                wp1=wp1, bp1=bp1, bnp1=bnp1, wp2=wp2, bp2=bp2, bnp2=bnp2)


def pack_params(raw):
    """Fold eval-mode BN of the first layer of each LinearBlock into the following
    linear, drop the dead LSTM forget gate, transpose to (in,out), and pack every
    parameter into two VMEM slabs (matrices / bias-scale rows)."""
    def bn_fold(p):
        gamma, beta, mean, var = p
        scale = gamma / jnp.sqrt(var + 1e-5)
        return scale, beta - mean * scale

    s1, sh1   = bn_fold(raw['bn1'])
    s2, sh2   = bn_fold(raw['bn2'])
    sp1, shp1 = bn_fold(raw['bnp1'])
    sp2, shp2 = bn_fold(raw['bnp2'])

    w1 = raw['w1'].T                                   # (D_IN, H1)
    b1 = raw['b1']
    w2 = raw['w2'].T                                   # (H1, H2)
    w2f = w2 * s1[:, None]                             # BN1 folded into linear2
    b2f = sh1 @ w2 + raw['b2']

    def gate3(w_ih, b_ih, b_hh):                       # keep [i, g, o]; drop forget gate
        sel = jnp.concatenate([jnp.arange(0, H_LSTM),
                               jnp.arange(2 * H_LSTM, 3 * H_LSTM),
                               jnp.arange(3 * H_LSTM, 4 * H_LSTM)])
        return w_ih[sel].T, (b_ih + b_hh)[sel]         # W_hh unused: h_prev == 0 exactly

    wih0, bih0 = gate3(raw['w_ih0'], raw['b_ih0'], raw['b_hh0'])   # (40, 96)
    wih1, bih1 = gate3(raw['w_ih1'], raw['b_ih1'], raw['b_hh1'])   # (32, 96)
    w_z, w_d, w_m = wih0[:H2], wih0[H2:H2 + N_DLQ], wih0[H2 + N_DLQ:]

    wp1 = raw['wp1'].T                                 # (41, P1)
    wp1_d, wp1_h = wp1[:N_DLQ], wp1[N_DLQ:]
    bp1 = raw['bp1']
    wp2 = raw['wp2'].T                                 # (P1, 9)
    wp2f = wp2 * sp1[:, None]                          # post-BN1 folded into linear2
    bp2f = shp1 @ wp2 + raw['bp2']

    w_slab = jnp.zeros((W_ROWS, 128), jnp.float32)
    for row, mat in ((RO_W1, w1), (RO_W2, w2f), (RO_WZ, w_z), (RO_WD, w_d),
                     (RO_WM, w_m), (RO_WL1, wih1), (RO_WP1D, wp1_d),
                     (RO_WP1H, wp1_h), (RO_WP2, wp2f)):
        r, c = mat.shape
        w_slab = w_slab.at[row:row + r, 0:c].set(mat)

    b_slab = jnp.zeros((B_ROWS, 128), jnp.float32)
    for row, vec in ((BR_B1, b1), (BR_B2, b2f), (BR_S2, s2), (BR_SH2, sh2),
                     (BR_BIH0, bih0), (BR_BIH1, bih1), (BR_BP1, bp1),
                     (BR_BP2, bp2f), (BR_SP2, sp2), (BR_SHP2, shp2)):
        b_slab = b_slab.at[row, 0:vec.shape[0]].set(vec)
    return w_slab, b_slab


# ------------------------------- reference ----------------------------------
def reference(zim, dlq0, macro, raw):
    """Plain-JAX transcription of the eval-mode PyTorch forward (ground truth)."""
    def bn(x, p):
        gamma, beta, mean, var = p
        return (x - mean) / jnp.sqrt(var + 1e-5) * gamma + beta

    def linblock(x, layers):
        for w, b, bnp in layers:                       # Linear -> ReLU -> BN -> Dropout(eval)
            x = bn(jnp.maximum(x @ w.T + b, 0.0), bnp)
        return x

    def lstm_cell(x, w_ih, w_hh, b_ih, b_hh):
        h_prev = jnp.zeros((x.shape[0], H_LSTM), jnp.float32)
        c_prev = jnp.zeros((x.shape[0], H_LSTM), jnp.float32)
        g = x @ w_ih.T + b_ih + h_prev @ w_hh.T + b_hh
        i, f, gg, o = jnp.split(g, 4, axis=1)
        c = jax.nn.sigmoid(f) * c_prev + jax.nn.sigmoid(i) * jnp.tanh(gg)
        return jax.nn.sigmoid(o) * jnp.tanh(c)

    zimp = linblock(zim, [(raw['w1'], raw['b1'], raw['bn1']),
                          (raw['w2'], raw['b2'], raw['bn2'])])
    dlq = dlq0
    outs = []
    for t in range(T):
        x = jnp.concatenate([zimp, dlq, macro[:, t, :]], axis=1)
        h_l0 = lstm_cell(x, raw['w_ih0'], raw['w_hh0'], raw['b_ih0'], raw['b_hh0'])
        h_l1 = lstm_cell(h_l0, raw['w_ih1'], raw['w_hh1'], raw['b_ih1'], raw['b_hh1'])
        dist = linblock(jnp.concatenate([dlq, h_l1], axis=1),
                        [(raw['wp1'], raw['bp1'], raw['bnp1']),
                         (raw['wp2'], raw['bp2'], raw['bnp2'])])
        outs.append(dist)
        idx = jnp.argmax(jax.nn.softmax(dist, axis=1), axis=1)
        dlq = jax.nn.one_hot(idx, N_DLQ, dtype=jnp.float32)
    return jnp.stack(outs, axis=2)                     # (B, 9, T)


if __name__ == "__main__":
    key = jax.random.PRNGKey(0)
    kz, kd, km, kp = jax.random.split(key, 4)
    zim   = jax.random.normal(kz, (B, D_IN), jnp.float32)
    dlq0  = jax.nn.one_hot(jax.random.randint(kd, (B,), 0, N_DLQ), N_DLQ,
                           dtype=jnp.float32)
    macro = jax.random.normal(km, (B, T, D_MACRO), jnp.float32)

    raw = init_raw_params(kp)
    w_slab, b_slab = pack_params(raw)

    out = jax.block_until_ready(macro_mort_decoder(zim, dlq0, macro, w_slab, b_slab))
    ref = jax.block_until_ready(reference(zim, dlq0, macro, raw))

    assert out.shape == (B, N_DLQ, T), out.shape
    assert bool(jnp.allclose(out, ref, atol=1e-3, rtol=1e-3)), \
        float(jnp.max(jnp.abs(out - ref)))
    print("KERNEL_OK")
</pallas_src>

<mosaic_0001>
module attributes {stable_mosaic.version = 11 : i64} {
  func.func @_decoder_kernel(%arg0: memref<4x16xf32, #tpu.memory_space<vmem>>, %arg1: memref<4x9xf32, #tpu.memory_space<vmem>>, %arg2: memref<12x4x7xf32, #tpu.memory_space<vmem>>, %arg3: memref<192x128xf32, #tpu.memory_space<vmem>>, %arg4: memref<16x128xf32, #tpu.memory_space<vmem>>, %arg5: memref<12x4x9xf32, #tpu.memory_space<vmem>>) attributes {dimension_semantics = [], scalar_prefetch = 0 : i64, scratch_operands = 0 : i64, tpu.core_type = #tpu.core_type<tc>} {
    %c0 = arith.constant 0 : index
    %c0_0 = arith.constant 0 : index
    %0 = vector.load %arg3[%c0, %c0_0] : memref<192x128xf32, #tpu.memory_space<vmem>>, vector<16x32xf32>
    %c16 = arith.constant 16 : index
    %c0_1 = arith.constant 0 : index
    %1 = vector.load %arg3[%c16, %c0_1] : memref<192x128xf32, #tpu.memory_space<vmem>>, vector<32x24xf32>
    %c48 = arith.constant 48 : index
    %c0_2 = arith.constant 0 : index
    %2 = vector.load %arg3[%c48, %c0_2] : memref<192x128xf32, #tpu.memory_space<vmem>>, vector<24x96xf32>
    %c72 = arith.constant 72 : index
    %c0_3 = arith.constant 0 : index
    %3 = vector.load %arg3[%c72, %c0_3] : memref<192x128xf32, #tpu.memory_space<vmem>>, vector<9x96xf32>
    %c88 = arith.constant 88 : index
    %c0_4 = arith.constant 0 : index
    %4 = vector.load %arg3[%c88, %c0_4] : memref<192x128xf32, #tpu.memory_space<vmem>>, vector<7x96xf32>
    %c96 = arith.constant 96 : index
    %c0_5 = arith.constant 0 : index
    %5 = vector.load %arg3[%c96, %c0_5] : memref<192x128xf32, #tpu.memory_space<vmem>>, vector<32x96xf32>
    %c128 = arith.constant 128 : index
    %c0_6 = arith.constant 0 : index
    %6 = vector.load %arg3[%c128, %c0_6] : memref<192x128xf32, #tpu.memory_space<vmem>>, vector<9x16xf32>
    %c144 = arith.constant 144 : index
    %c0_7 = arith.constant 0 : index
    %7 = vector.load %arg3[%c144, %c0_7] : memref<192x128xf32, #tpu.memory_space<vmem>>, vector<32x16xf32>
    %c176 = arith.constant 176 : index
    %c0_8 = arith.constant 0 : index
    %8 = vector.load %arg3[%c176, %c0_8] : memref<192x128xf32, #tpu.memory_space<vmem>>, vector<16x9xf32>
    %c0_9 = arith.constant 0 : index
    %c0_10 = arith.constant 0 : index
    %9 = vector.load %arg4[%c0_9, %c0_10] : memref<16x128xf32, #tpu.memory_space<vmem>>, vector<1x32xf32>
    %c1 = arith.constant 1 : index
    %c0_11 = arith.constant 0 : index
    %10 = vector.load %arg4[%c1, %c0_11] : memref<16x128xf32, #tpu.memory_space<vmem>>, vector<1x24xf32>
    %c2 = arith.constant 2 : index
    %c0_12 = arith.constant 0 : index
    %11 = vector.load %arg4[%c2, %c0_12] : memref<16x128xf32, #tpu.memory_space<vmem>>, vector<1x24xf32>
    %c3 = arith.constant 3 : index
    %c0_13 = arith.constant 0 : index
    %12 = vector.load %arg4[%c3, %c0_13] : memref<16x128xf32, #tpu.memory_space<vmem>>, vector<1x24xf32>
    %c4 = arith.constant 4 : index
    %c0_14 = arith.constant 0 : index
    %13 = vector.load %arg4[%c4, %c0_14] : memref<16x128xf32, #tpu.memory_space<vmem>>, vector<1x96xf32>
    %c5 = arith.constant 5 : index
    %c0_15 = arith.constant 0 : index
    %14 = vector.load %arg4[%c5, %c0_15] : memref<16x128xf32, #tpu.memory_space<vmem>>, vector<1x96xf32>
    %c6 = arith.constant 6 : index
    %c0_16 = arith.constant 0 : index
    %15 = vector.load %arg4[%c6, %c0_16] : memref<16x128xf32, #tpu.memory_space<vmem>>, vector<1x16xf32>
    %c7 = arith.constant 7 : index
    %c0_17 = arith.constant 0 : index
    %16 = vector.load %arg4[%c7, %c0_17] : memref<16x128xf32, #tpu.memory_space<vmem>>, vector<1x9xf32>
    %c8 = arith.constant 8 : index
    %c0_18 = arith.constant 0 : index
    %17 = vector.load %arg4[%c8, %c0_18] : memref<16x128xf32, #tpu.memory_space<vmem>>, vector<1x9xf32>
    %c9 = arith.constant 9 : index
    %c0_19 = arith.constant 0 : index
    %18 = vector.load %arg4[%c9, %c0_19] : memref<16x128xf32, #tpu.memory_space<vmem>>, vector<1x9xf32>
    %c0_20 = arith.constant 0 : index
    %c0_21 = arith.constant 0 : index
    %19 = vector.load %arg0[%c0_20, %c0_21] : memref<4x16xf32, #tpu.memory_space<vmem>>, vector<4x16xf32>
    %cst = arith.constant dense<0.000000e+00> : vector<4x32xf32>
    %20 = tpu.matmul %19, %0, %cst {dimension_numbers = #tpu.dot_dimension_numbers<[1], [0], [0], [1], [0, 0, 1, 1], [], []>} : vector<4x16xf32>, vector<16x32xf32>, vector<4x32xf32> -> vector<4x32xf32>
    %21 = vector.broadcast %9 : vector<1x32xf32> to vector<4x32xf32>
    %22 = arith.addf %20, %21 : vector<4x32xf32>
    %cst_22 = arith.constant 0.000000e+00 : f32
    %23 = vector.broadcast %cst_22 : f32 to vector<4x32xf32>
    %24 = arith.maximumf %22, %23 : vector<4x32xf32>
    %cst_23 = arith.constant dense<0.000000e+00> : vector<4x24xf32>
    %25 = tpu.matmul %24, %1, %cst_23 {dimension_numbers = #tpu.dot_dimension_numbers<[1], [0], [0], [1], [0, 0, 1, 1], [], []>} : vector<4x32xf32>, vector<32x24xf32>, vector<4x24xf32> -> vector<4x24xf32>
    %26 = vector.broadcast %10 : vector<1x24xf32> to vector<4x24xf32>
    %27 = arith.addf %25, %26 : vector<4x24xf32>
    %cst_24 = arith.constant 0.000000e+00 : f32
    %28 = vector.broadcast %cst_24 : f32 to vector<4x24xf32>
    %29 = arith.maximumf %27, %28 : vector<4x24xf32>
    %30 = vector.broadcast %11 : vector<1x24xf32> to vector<4x24xf32>
    %31 = arith.mulf %29, %30 : vector<4x24xf32>
    %32 = vector.broadcast %12 : vector<1x24xf32> to vector<4x24xf32>
    %33 = arith.addf %31, %32 : vector<4x24xf32>
    %cst_25 = arith.constant dense<0.000000e+00> : vector<4x96xf32>
    %34 = tpu.matmul %33, %2, %cst_25 {dimension_numbers = #tpu.dot_dimension_numbers<[1], [0], [0], [1], [0, 0, 1, 1], [], []>} : vector<4x24xf32>, vector<24x96xf32>, vector<4x96xf32> -> vector<4x96xf32>
    %35 = vector.broadcast %13 : vector<1x96xf32> to vector<4x96xf32>
    %36 = arith.addf %34, %35 : vector<4x96xf32>
    %c0_26 = arith.constant 0 : index
    %c0_27 = arith.constant 0 : index
    %37 = vector.load %arg1[%c0_26, %c0_27] : memref<4x9xf32, #tpu.memory_space<vmem>>, vector<4x9xf32>
    %c0_28 = arith.constant 0 : index
    %c0_29 = arith.constant 0 : index
    %c0_30 = arith.constant 0 : index
    %38 = vector.load %arg2[%c0_28, %c0_29, %c0_30] : memref<12x4x7xf32, #tpu.memory_space<vmem>>, vector<1x4x7xf32>
    %39 = vector.shape_cast %38 : vector<1x4x7xf32> to vector<4x7xf32>
    %cst_31 = arith.constant dense<0.000000e+00> : vector<4x96xf32>
    %40 = tpu.matmul %37, %3, %cst_31 {dimension_numbers = #tpu.dot_dimension_numbers<[1], [0], [0], [1], [0, 0, 1, 1], [], []>} : vector<4x9xf32>, vector<9x96xf32>, vector<4x96xf32> -> vector<4x96xf32>
    %cst_32 = arith.constant dense<0.000000e+00> : vector<4x96xf32>
    %41 = tpu.matmul %39, %4, %cst_32 {dimension_numbers = #tpu.dot_dimension_numbers<[1], [0], [0], [1], [0, 0, 1, 1], [], []>} : vector<4x7xf32>, vector<7x96xf32>, vector<4x96xf32> -> vector<4x96xf32>
    %42 = arith.addf %40, %41 : vector<4x96xf32>
    %43 = arith.addf %42, %36 : vector<4x96xf32>
    %44 = vector.extract_strided_slice %43 {offsets = [0, 0], sizes = [4, 32], strides = [1, 1]} : vector<4x96xf32> to vector<4x32xf32>
    %45 = arith.negf %44 : vector<4x32xf32>
    %46 = math.exp %45 : vector<4x32xf32>
    %cst_33 = arith.constant 1.000000e+00 : f32
    %47 = vector.broadcast %cst_33 : f32 to vector<4x32xf32>
    %48 = arith.addf %47, %46 : vector<4x32xf32>
    %49 = arith.divf %47, %48 : vector<4x32xf32>
    %50 = vector.extract_strided_slice %43 {offsets = [0, 32], sizes = [4, 32], strides = [1, 1]} : vector<4x96xf32> to vector<4x32xf32>
    %51 = math.tanh %50 : vector<4x32xf32>
    %52 = arith.mulf %49, %51 : vector<4x32xf32>
    %53 = vector.extract_strided_slice %43 {offsets = [0, 64], sizes = [4, 32], strides = [1, 1]} : vector<4x96xf32> to vector<4x32xf32>
    %54 = arith.negf %53 : vector<4x32xf32>
    %55 = math.exp %54 : vector<4x32xf32>
    %cst_34 = arith.constant 1.000000e+00 : f32
    %56 = vector.broadcast %cst_34 : f32 to vector<4x32xf32>
    %57 = arith.addf %56, %55 : vector<4x32xf32>
    %58 = arith.divf %56, %57 : vector<4x32xf32>
    %59 = math.tanh %52 : vector<4x32xf32>
    %60 = arith.mulf %58, %59 : vector<4x32xf32>
    %cst_35 = arith.constant dense<0.000000e+00> : vector<4x96xf32>
    %61 = tpu.matmul %60, %5, %cst_35 {dimension_numbers = #tpu.dot_dimension_numbers<[1], [0], [0], [1], [0, 0, 1, 1], [], []>} : vector<4x32xf32>, vector<32x96xf32>, vector<4x96xf32> -> vector<4x96xf32>
    %62 = vector.broadcast %14 : vector<1x96xf32> to vector<4x96xf32>
    %63 = arith.addf %61, %62 : vector<4x96xf32>
    %64 = vector.extract_strided_slice %63 {offsets = [0, 0], sizes = [4, 32], strides = [1, 1]} : vector<4x96xf32> to vector<4x32xf32>
    %65 = arith.negf %64 : vector<4x32xf32>
    %66 = math.exp %65 : vector<4x32xf32>
    %cst_36 = arith.constant 1.000000e+00 : f32
    %67 = vector.broadcast %cst_36 : f32 to vector<4x32xf32>
    %68 = arith.addf %67, %66 : vector<4x32xf32>
    %69 = arith.divf %67, %68 : vector<4x32xf32>
    %70 = vector.extract_strided_slice %63 {offsets = [0, 32], sizes = [4, 32], strides = [1, 1]} : vector<4x96xf32> to vector<4x32xf32>
    %71 = math.tanh %70 : vector<4x32xf32>
    %72 = arith.mulf %69, %71 : vector<4x32xf32>
    %73 = vector.extract_strided_slice %63 {offsets = [0, 64], sizes = [4, 32], strides = [1, 1]} : vector<4x96xf32> to vector<4x32xf32>
    %74 = arith.negf %73 : vector<4x32xf32>
    %75 = math.exp %74 : vector<4x32xf32>
    %cst_37 = arith.constant 1.000000e+00 : f32
    %76 = vector.broadcast %cst_37 : f32 to vector<4x32xf32>
    %77 = arith.addf %76, %75 : vector<4x32xf32>
    %78 = arith.divf %76, %77 : vector<4x32xf32>
    %79 = math.tanh %72 : vector<4x32xf32>
    %80 = arith.mulf %78, %79 : vector<4x32xf32>
    %cst_38 = arith.constant dense<0.000000e+00> : vector<4x16xf32>
    %81 = tpu.matmul %37, %6, %cst_38 {dimension_numbers = #tpu.dot_dimension_numbers<[1], [0], [0], [1], [0, 0, 1, 1], [], []>} : vector<4x9xf32>, vector<9x16xf32>, vector<4x16xf32> -> vector<4x16xf32>
    %cst_39 = arith.constant dense<0.000000e+00> : vector<4x16xf32>
    %82 = tpu.matmul %80, %7, %cst_39 {dimension_numbers = #tpu.dot_dimension_numbers<[1], [0], [0], [1], [0, 0, 1, 1], [], []>} : vector<4x32xf32>, vector<32x16xf32>, vector<4x16xf32> -> vector<4x16xf32>
    %83 = arith.addf %81, %82 : vector<4x16xf32>
    %84 = vector.broadcast %15 : vector<1x16xf32> to vector<4x16xf32>
    %85 = arith.addf %83, %84 : vector<4x16xf32>
    %cst_40 = arith.constant 0.000000e+00 : f32
    %86 = vector.broadcast %cst_40 : f32 to vector<4x16xf32>
    %87 = arith.maximumf %85, %86 : vector<4x16xf32>
    %cst_41 = arith.constant dense<0.000000e+00> : vector<4x9xf32>
    %88 = tpu.matmul %87, %8, %cst_41 {dimension_numbers = #tpu.dot_dimension_numbers<[1], [0], [0], [1], [0, 0, 1, 1], [], []>} : vector<4x16xf32>, vector<16x9xf32>, vector<4x9xf32> -> vector<4x9xf32>
    %89 = vector.broadcast %16 : vector<1x9xf32> to vector<4x9xf32>
    %90 = arith.addf %88, %89 : vector<4x9xf32>
    %cst_42 = arith.constant 0.000000e+00 : f32
    %91 = vector.broadcast %cst_42 : f32 to vector<4x9xf32>
    %92 = arith.maximumf %90, %91 : vector<4x9xf32>
    %93 = vector.broadcast %17 : vector<1x9xf32> to vector<4x9xf32>
    %94 = arith.mulf %92, %93 : vector<4x9xf32>
    %95 = vector.broadcast %18 : vector<1x9xf32> to vector<4x9xf32>
    %96 = arith.addf %94, %95 : vector<4x9xf32>
    %c0_43 = arith.constant 0 : index
    %c0_44 = arith.constant 0 : index
    %c0_45 = arith.constant 0 : index
    %97 = vector.load %arg5[%c0_43, %c0_44, %c0_45] : memref<12x4x9xf32, #tpu.memory_space<vmem>>, vector<1x4x9xf32>
    %98 = vector.shape_cast %97 : vector<1x4x9xf32> to vector<4x9xf32>
    %99 = vector.shape_cast %96 : vector<4x9xf32> to vector<1x4x9xf32>
    tpu.vector_store %arg5[%c0_43, %c0_44, %c0_45], %99 {strides = array<i32>} : memref<12x4x9xf32, #tpu.memory_space<vmem>>, vector<1x4x9xf32>,
    %cst_46 = arith.constant dense<0xFF800000> : vector<4xf32>
    %100 = vector.multi_reduction <maximumf>, %96, %cst_46 [1] : vector<4x9xf32> to vector<4xf32>
    %101 = vector.shape_cast %100 : vector<4xf32> to vector<4x1xf32>
    %102 = tpu.iota {dimensions = array<i32: 1>} : vector<4x9xi32>
    %103 = vector.broadcast %101 : vector<4x1xf32> to vector<4x9xf32>
    %104 = arith.cmpf oeq, %96, %103 : vector<4x9xf32>
    %c9_i32 = arith.constant 9 : i32
    %105 = vector.broadcast %c9_i32 : i32 to vector<4x9xi32>
    %106 = arith.select %104, %102, %105 : vector<4x9xi1>, vector<4x9xi32>
    %cst_47 = arith.constant dense<2147483647> : vector<4xi32>
    %107 = vector.multi_reduction <minsi>, %106, %cst_47 [1] : vector<4x9xi32> to vector<4xi32>
    %108 = vector.shape_cast %107 : vector<4xi32> to vector<4x1xi32>
    %109 = vector.broadcast %108 : vector<4x1xi32> to vector<4x9xi32>
    %110 = arith.cmpi eq, %102, %109 : vector<4x9xi32>
    %111 = arith.extui %110 : vector<4x9xi1> to vector<4x9xi32>
    %112 = arith.sitofp %111 : vector<4x9xi32> to vector<4x9xf32>
    %c1_48 = arith.constant 1 : index
    %c0_49 = arith.constant 0 : index
    %c0_50 = arith.constant 0 : index
    %113 = vector.load %arg2[%c1_48, %c0_49, %c0_50] : memref<12x4x7xf32, #tpu.memory_space<vmem>>, vector<1x4x7xf32>
    %114 = vector.shape_cast %113 : vector<1x4x7xf32> to vector<4x7xf32>
    %cst_51 = arith.constant dense<0.000000e+00> : vector<4x96xf32>
    %115 = tpu.matmul %112, %3, %cst_51 {dimension_numbers = #tpu.dot_dimension_numbers<[1], [0], [0], [1], [0, 0, 1, 1], [], []>} : vector<4x9xf32>, vector<9x96xf32>, vector<4x96xf32> -> vector<4x96xf32>
    %cst_52 = arith.constant dense<0.000000e+00> : vector<4x96xf32>
    %116 = tpu.matmul %114, %4, %cst_52 {dimension_numbers = #tpu.dot_dimension_numbers<[1], [0], [0], [1], [0, 0, 1, 1], [], []>} : vector<4x7xf32>, vector<7x96xf32>, vector<4x96xf32> -> vector<4x96xf32>
    %117 = arith.addf %115, %116 : vector<4x96xf32>
    %118 = arith.addf %117, %36 : vector<4x96xf32>
    %119 = vector.extract_strided_slice %118 {offsets = [0, 0], sizes = [4, 32], strides = [1, 1]} : vector<4x96xf32> to vector<4x32xf32>
    %120 = arith.negf %119 : vector<4x32xf32>
    %121 = math.exp %120 : vector<4x32xf32>
    %cst_53 = arith.constant 1.000000e+00 : f32
    %122 = vector.broadcast %cst_53 : f32 to vector<4x32xf32>
    %123 = arith.addf %122, %121 : vector<4x32xf32>
    %124 = arith.divf %122, %123 : vector<4x32xf32>
    %125 = vector.extract_strided_slice %118 {offsets = [0, 32], sizes = [4, 32], strides = [1, 1]} : vector<4x96xf32> to vector<4x32xf32>
    %126 = math.tanh %125 : vector<4x32xf32>
    %127 = arith.mulf %124, %126 : vector<4x32xf32>
    %128 = vector.extract_strided_slice %118 {offsets = [0, 64], sizes = [4, 32], strides = [1, 1]} : vector<4x96xf32> to vector<4x32xf32>
    %129 = arith.negf %128 : vector<4x32xf32>
    %130 = math.exp %129 : vector<4x32xf32>
    %cst_54 = arith.constant 1.000000e+00 : f32
    %131 = vector.broadcast %cst_54 : f32 to vector<4x32xf32>
    %132 = arith.addf %131, %130 : vector<4x32xf32>
    %133 = arith.divf %131, %132 : vector<4x32xf32>
    %134 = math.tanh %127 : vector<4x32xf32>
    %135 = arith.mulf %133, %134 : vector<4x32xf32>
    %cst_55 = arith.constant dense<0.000000e+00> : vector<4x96xf32>
    %136 = tpu.matmul %135, %5, %cst_55 {dimension_numbers = #tpu.dot_dimension_numbers<[1], [0], [0], [1], [0, 0, 1, 1], [], []>} : vector<4x32xf32>, vector<32x96xf32>, vector<4x96xf32> -> vector<4x96xf32>
    %137 = vector.broadcast %14 : vector<1x96xf32> to vector<4x96xf32>
    %138 = arith.addf %136, %137 : vector<4x96xf32>
    %139 = vector.extract_strided_slice %138 {offsets = [0, 0], sizes = [4, 32], strides = [1, 1]} : vector<4x96xf32> to vector<4x32xf32>
    %140 = arith.negf %139 : vector<4x32xf32>
    %141 = math.exp %140 : vector<4x32xf32>
    %cst_56 = arith.constant 1.000000e+00 : f32
    %142 = vector.broadcast %cst_56 : f32 to vector<4x32xf32>
    %143 = arith.addf %142, %141 : vector<4x32xf32>
    %144 = arith.divf %142, %143 : vector<4x32xf32>
    %145 = vector.extract_strided_slice %138 {offsets = [0, 32], sizes = [4, 32], strides = [1, 1]} : vector<4x96xf32> to vector<4x32xf32>
    %146 = math.tanh %145 : vector<4x32xf32>
    %147 = arith.mulf %144, %146 : vector<4x32xf32>
    %148 = vector.extract_strided_slice %138 {offsets = [0, 64], sizes = [4, 32], strides = [1, 1]} : vector<4x96xf32> to vector<4x32xf32>
    %149 = arith.negf %148 : vector<4x32xf32>
    %150 = math.exp %149 : vector<4x32xf32>
    %cst_57 = arith.constant 1.000000e+00 : f32
    %151 = vector.broadcast %cst_57 : f32 to vector<4x32xf32>
    %152 = arith.addf %151, %150 : vector<4x32xf32>
    %153 = arith.divf %151, %152 : vector<4x32xf32>
    %154 = math.tanh %147 : vector<4x32xf32>
    %155 = arith.mulf %153, %154 : vector<4x32xf32>
    %cst_58 = arith.constant dense<0.000000e+00> : vector<4x16xf32>
    %156 = tpu.matmul %112, %6, %cst_58 {dimension_numbers = #tpu.dot_dimension_numbers<[1], [0], [0], [1], [0, 0, 1, 1], [], []>} : vector<4x9xf32>, vector<9x16xf32>, vector<4x16xf32> -> vector<4x16xf32>
    %cst_59 = arith.constant dense<0.000000e+00> : vector<4x16xf32>
    %157 = tpu.matmul %155, %7, %cst_59 {dimension_numbers = #tpu.dot_dimension_numbers<[1], [0], [0], [1], [0, 0, 1, 1], [], []>} : vector<4x32xf32>, vector<32x16xf32>, vector<4x16xf32> -> vector<4x16xf32>
    %158 = arith.addf %156, %157 : vector<4x16xf32>
    %159 = vector.broadcast %15 : vector<1x16xf32> to vector<4x16xf32>
    %160 = arith.addf %158, %159 : vector<4x16xf32>
    %cst_60 = arith.constant 0.000000e+00 : f32
    %161 = vector.broadcast %cst_60 : f32 to vector<4x16xf32>
    %162 = arith.maximumf %160, %161 : vector<4x16xf32>
    %cst_61 = arith.constant dense<0.000000e+00> : vector<4x9xf32>
    %163 = tpu.matmul %162, %8, %cst_61 {dimension_numbers = #tpu.dot_dimension_numbers<[1], [0], [0], [1], [0, 0, 1, 1], [], []>} : vector<4x16xf32>, vector<16x9xf32>, vector<4x9xf32> -> vector<4x9xf32>
    %164 = vector.broadcast %16 : vector<1x9xf32> to vector<4x9xf32>
    %165 = arith.addf %163, %164 : vector<4x9xf32>
    %cst_62 = arith.constant 0.000000e+00 : f32
    %166 = vector.broadcast %cst_62 : f32 to vector<4x9xf32>
    %167 = arith.maximumf %165, %166 : vector<4x9xf32>
    %168 = vector.broadcast %17 : vector<1x9xf32> to vector<4x9xf32>
    %169 = arith.mulf %167, %168 : vector<4x9xf32>
    %170 = vector.broadcast %18 : vector<1x9xf32> to vector<4x9xf32>
    %171 = arith.addf %169, %170 : vector<4x9xf32>
    %c1_63 = arith.constant 1 : index
    %c0_64 = arith.constant 0 : index
    %c0_65 = arith.constant 0 : index
    %172 = vector.load %arg5[%c1_63, %c0_64, %c0_65] : memref<12x4x9xf32, #tpu.memory_space<vmem>>, vector<1x4x9xf32>
    %173 = vector.shape_cast %172 : vector<1x4x9xf32> to vector<4x9xf32>
    %174 = vector.shape_cast %171 : vector<4x9xf32> to vector<1x4x9xf32>
    tpu.vector_store %arg5[%c1_63, %c0_64, %c0_65], %174 {strides = array<i32>} : memref<12x4x9xf32, #tpu.memory_space<vmem>>, vector<1x4x9xf32>,
    %cst_66 = arith.constant dense<0xFF800000> : vector<4xf32>
    %175 = vector.multi_reduction <maximumf>, %171, %cst_66 [1] : vector<4x9xf32> to vector<4xf32>
    %176 = vector.shape_cast %175 : vector<4xf32> to vector<4x1xf32>
    %177 = tpu.iota {dimensions = array<i32: 1>} : vector<4x9xi32>
    %178 = vector.broadcast %176 : vector<4x1xf32> to vector<4x9xf32>
    %179 = arith.cmpf oeq, %171, %178 : vector<4x9xf32>
    %c9_i32_67 = arith.constant 9 : i32
    %180 = vector.broadcast %c9_i32_67 : i32 to vector<4x9xi32>
    %181 = arith.select %179, %177, %180 : vector<4x9xi1>, vector<4x9xi32>
    %cst_68 = arith.constant dense<2147483647> : vector<4xi32>
    %182 = vector.multi_reduction <minsi>, %181, %cst_68 [1] : vector<4x9xi32> to vector<4xi32>
    %183 = vector.shape_cast %182 : vector<4xi32> to vector<4x1xi32>
    %184 = vector.broadcast %183 : vector<4x1xi32> to vector<4x9xi32>
    %185 = arith.cmpi eq, %177, %184 : vector<4x9xi32>
    %186 = arith.extui %185 : vector<4x9xi1> to vector<4x9xi32>
    %187 = arith.sitofp %186 : vector<4x9xi32> to vector<4x9xf32>
    %c2_69 = arith.constant 2 : index
    %c0_70 = arith.constant 0 : index
    %c0_71 = arith.constant 0 : index
    %188 = vector.load %arg2[%c2_69, %c0_70, %c0_71] : memref<12x4x7xf32, #tpu.memory_space<vmem>>, vector<1x4x7xf32>
    %189 = vector.shape_cast %188 : vector<1x4x7xf32> to vector<4x7xf32>
    %cst_72 = arith.constant dense<0.000000e+00> : vector<4x96xf32>
    %190 = tpu.matmul %187, %3, %cst_72 {dimension_numbers = #tpu.dot_dimension_numbers<[1], [0], [0], [1], [0, 0, 1, 1], [], []>} : vector<4x9xf32>, vector<9x96xf32>, vector<4x96xf32> -> vector<4x96xf32>
    %cst_73 = arith.constant dense<0.000000e+00> : vector<4x96xf32>
    %191 = tpu.matmul %189, %4, %cst_73 {dimension_numbers = #tpu.dot_dimension_numbers<[1], [0], [0], [1], [0, 0, 1, 1], [], []>} : vector<4x7xf32>, vector<7x96xf32>, vector<4x96xf32> -> vector<4x96xf32>
    %192 = arith.addf %190, %191 : vector<4x96xf32>
    %193 = arith.addf %192, %36 : vector<4x96xf32>
    %194 = vector.extract_strided_slice %193 {offsets = [0, 0], sizes = [4, 32], strides = [1, 1]} : vector<4x96xf32> to vector<4x32xf32>
    %195 = arith.negf %194 : vector<4x32xf32>
    %196 = math.exp %195 : vector<4x32xf32>
    %cst_74 = arith.constant 1.000000e+00 : f32
    %197 = vector.broadcast %cst_74 : f32 to vector<4x32xf32>
    %198 = arith.addf %197, %196 : vector<4x32xf32>
    %199 = arith.divf %197, %198 : vector<4x32xf32>
    %200 = vector.extract_strided_slice %193 {offsets = [0, 32], sizes = [4, 32], strides = [1, 1]} : vector<4x96xf32> to vector<4x32xf32>
    %201 = math.tanh %200 : vector<4x32xf32>
    %202 = arith.mulf %199, %201 : vector<4x32xf32>
    %203 = vector.extract_strided_slice %193 {offsets = [0, 64], sizes = [4, 32], strides = [1, 1]} : vector<4x96xf32> to vector<4x32xf32>
    %204 = arith.negf %203 : vector<4x32xf32>
    %205 = math.exp %204 : vector<4x32xf32>
    %cst_75 = arith.constant 1.000000e+00 : f32
    %206 = vector.broadcast %cst_75 : f32 to vector<4x32xf32>
    %207 = arith.addf %206, %205 : vector<4x32xf32>
    %208 = arith.divf %206, %207 : vector<4x32xf32>
    %209 = math.tanh %202 : vector<4x32xf32>
    %210 = arith.mulf %208, %209 : vector<4x32xf32>
    %cst_76 = arith.constant dense<0.000000e+00> : vector<4x96xf32>
    %211 = tpu.matmul %210, %5, %cst_76 {dimension_numbers = #tpu.dot_dimension_numbers<[1], [0], [0], [1], [0, 0, 1, 1], [], []>} : vector<4x32xf32>, vector<32x96xf32>, vector<4x96xf32> -> vector<4x96xf32>
    %212 = vector.broadcast %14 : vector<1x96xf32> to vector<4x96xf32>
    %213 = arith.addf %211, %212 : vector<4x96xf32>
    %214 = vector.extract_strided_slice %213 {offsets = [0, 0], sizes = [4, 32], strides = [1, 1]} : vector<4x96xf32> to vector<4x32xf32>
    %215 = arith.negf %214 : vector<4x32xf32>
    %216 = math.exp %215 : vector<4x32xf32>
    %cst_77 = arith.constant 1.000000e+00 : f32
    %217 = vector.broadcast %cst_77 : f32 to vector<4x32xf32>
    %218 = arith.addf %217, %216 : vector<4x32xf32>
    %219 = arith.divf %217, %218 : vector<4x32xf32>
    %220 = vector.extract_strided_slice %213 {offsets = [0, 32], sizes = [4, 32], strides = [1, 1]} : vector<4x96xf32> to vector<4x32xf32>
    %221 = math.tanh %220 : vector<4x32xf32>
    %222 = arith.mulf %219, %221 : vector<4x32xf32>
    %223 = vector.extract_strided_slice %213 {offsets = [0, 64], sizes = [4, 32], strides = [1, 1]} : vector<4x96xf32> to vector<4x32xf32>
    %224 = arith.negf %223 : vector<4x32xf32>
    %225 = math.exp %224 : vector<4x32xf32>
    %cst_78 = arith.constant 1.000000e+00 : f32
    %226 = vector.broadcast %cst_78 : f32 to vector<4x32xf32>
    %227 = arith.addf %226, %225 : vector<4x32xf32>
    %228 = arith.divf %226, %227 : vector<4x32xf32>
    %229 = math.tanh %222 : vector<4x32xf32>
    %230 = arith.mulf %228, %229 : vector<4x32xf32>
    %cst_79 = arith.constant dense<0.000000e+00> : vector<4x16xf32>
    %231 = tpu.matmul %187, %6, %cst_79 {dimension_numbers = #tpu.dot_dimension_numbers<[1], [0], [0], [1], [0, 0, 1, 1], [], []>} : vector<4x9xf32>, vector<9x16xf32>, vector<4x16xf32> -> vector<4x16xf32>
    %cst_80 = arith.constant dense<0.000000e+00> : vector<4x16xf32>
    %232 = tpu.matmul %230, %7, %cst_80 {dimension_numbers = #tpu.dot_dimension_numbers<[1], [0], [0], [1], [0, 0, 1, 1], [], []>} : vector<4x32xf32>, vector<32x16xf32>, vector<4x16xf32> -> vector<4x16xf32>
    %233 = arith.addf %231, %232 : vector<4x16xf32>
    %234 = vector.broadcast %15 : vector<1x16xf32> to vector<4x16xf32>
    %235 = arith.addf %233, %234 : vector<4x16xf32>
    %cst_81 = arith.constant 0.000000e+00 : f32
    %236 = vector.broadcast %cst_81 : f32 to vector<4x16xf32>
    %237 = arith.maximumf %235, %236 : vector<4x16xf32>
    %cst_82 = arith.constant dense<0.000000e+00> : vector<4x9xf32>
    %238 = tpu.matmul %237, %8, %cst_82 {dimension_numbers = #tpu.dot_dimension_numbers<[1], [0], [0], [1], [0, 0, 1, 1], [], []>} : vector<4x16xf32>, vector<16x9xf32>, vector<4x9xf32> -> vector<4x9xf32>
    %239 = vector.broadcast %16 : vector<1x9xf32> to vector<4x9xf32>
    %240 = arith.addf %238, %239 : vector<4x9xf32>
    %cst_83 = arith.constant 0.000000e+00 : f32
    %241 = vector.broadcast %cst_83 : f32 to vector<4x9xf32>
    %242 = arith.maximumf %240, %241 : vector<4x9xf32>
    %243 = vector.broadcast %17 : vector<1x9xf32> to vector<4x9xf32>
    %244 = arith.mulf %242, %243 : vector<4x9xf32>
    %245 = vector.broadcast %18 : vector<1x9xf32> to vector<4x9xf32>
    %246 = arith.addf %244, %245 : vector<4x9xf32>
    %c2_84 = arith.constant 2 : index
    %c0_85 = arith.constant 0 : index
    %c0_86 = arith.constant 0 : index
    %247 = vector.load %arg5[%c2_84, %c0_85, %c0_86] : memref<12x4x9xf32, #tpu.memory_space<vmem>>, vector<1x4x9xf32>
    %248 = vector.shape_cast %247 : vector<1x4x9xf32> to vector<4x9xf32>
    %249 = vector.shape_cast %246 : vector<4x9xf32> to vector<1x4x9xf32>
    tpu.vector_store %arg5[%c2_84, %c0_85, %c0_86], %249 {strides = array<i32>} : memref<12x4x9xf32, #tpu.memory_space<vmem>>, vector<1x4x9xf32>,
    %cst_87 = arith.constant dense<0xFF800000> : vector<4xf32>
    %250 = vector.multi_reduction <maximumf>, %246, %cst_87 [1] : vector<4x9xf32> to vector<4xf32>
    %251 = vector.shape_cast %250 : vector<4xf32> to vector<4x1xf32>
    %252 = tpu.iota {dimensions = array<i32: 1>} : vector<4x9xi32>
    %253 = vector.broadcast %251 : vector<4x1xf32> to vector<4x9xf32>
    %254 = arith.cmpf oeq, %246, %253 : vector<4x9xf32>
    %c9_i32_88 = arith.constant 9 : i32
    %255 = vector.broadcast %c9_i32_88 : i32 to vector<4x9xi32>
    %256 = arith.select %254, %252, %255 : vector<4x9xi1>, vector<4x9xi32>
    %cst_89 = arith.constant dense<2147483647> : vector<4xi32>
    %257 = vector.multi_reduction <minsi>, %256, %cst_89 [1] : vector<4x9xi32> to vector<4xi32>
    %258 = vector.shape_cast %257 : vector<4xi32> to vector<4x1xi32>
    %259 = vector.broadcast %258 : vector<4x1xi32> to vector<4x9xi32>
    %260 = arith.cmpi eq, %252, %259 : vector<4x9xi32>
    %261 = arith.extui %260 : vector<4x9xi1> to vector<4x9xi32>
    %262 = arith.sitofp %261 : vector<4x9xi32> to vector<4x9xf32>
    %c3_90 = arith.constant 3 : index
    %c0_91 = arith.constant 0 : index
    %c0_92 = arith.constant 0 : index
    %263 = vector.load %arg2[%c3_90, %c0_91, %c0_92] : memref<12x4x7xf32, #tpu.memory_space<vmem>>, vector<1x4x7xf32>
    %264 = vector.shape_cast %263 : vector<1x4x7xf32> to vector<4x7xf32>
    %cst_93 = arith.constant dense<0.000000e+00> : vector<4x96xf32>
    %265 = tpu.matmul %262, %3, %cst_93 {dimension_numbers = #tpu.dot_dimension_numbers<[1], [0], [0], [1], [0, 0, 1, 1], [], []>} : vector<4x9xf32>, vector<9x96xf32>, vector<4x96xf32> -> vector<4x96xf32>
    %cst_94 = arith.constant dense<0.000000e+00> : vector<4x96xf32>
    %266 = tpu.matmul %264, %4, %cst_94 {dimension_numbers = #tpu.dot_dimension_numbers<[1], [0], [0], [1], [0, 0, 1, 1], [], []>} : vector<4x7xf32>, vector<7x96xf32>, vector<4x96xf32> -> vector<4x96xf32>
    %267 = arith.addf %265, %266 : vector<4x96xf32>
    %268 = arith.addf %267, %36 : vector<4x96xf32>
    %269 = vector.extract_strided_slice %268 {offsets = [0, 0], sizes = [4, 32], strides = [1, 1]} : vector<4x96xf32> to vector<4x32xf32>
    %270 = arith.negf %269 : vector<4x32xf32>
    %271 = math.exp %270 : vector<4x32xf32>
    %cst_95 = arith.constant 1.000000e+00 : f32
    %272 = vector.broadcast %cst_95 : f32 to vector<4x32xf32>
    %273 = arith.addf %272, %271 : vector<4x32xf32>
    %274 = arith.divf %272, %273 : vector<4x32xf32>
    %275 = vector.extract_strided_slice %268 {offsets = [0, 32], sizes = [4, 32], strides = [1, 1]} : vector<4x96xf32> to vector<4x32xf32>
    %276 = math.tanh %275 : vector<4x32xf32>
    %277 = arith.mulf %274, %276 : vector<4x32xf32>
    %278 = vector.extract_strided_slice %268 {offsets = [0, 64], sizes = [4, 32], strides = [1, 1]} : vector<4x96xf32> to vector<4x32xf32>
    %279 = arith.negf %278 : vector<4x32xf32>
    %280 = math.exp %279 : vector<4x32xf32>
    %cst_96 = arith.constant 1.000000e+00 : f32
    %281 = vector.broadcast %cst_96 : f32 to vector<4x32xf32>
    %282 = arith.addf %281, %280 : vector<4x32xf32>
    %283 = arith.divf %281, %282 : vector<4x32xf32>
    %284 = math.tanh %277 : vector<4x32xf32>
    %285 = arith.mulf %283, %284 : vector<4x32xf32>
    %cst_97 = arith.constant dense<0.000000e+00> : vector<4x96xf32>
    %286 = tpu.matmul %285, %5, %cst_97 {dimension_numbers = #tpu.dot_dimension_numbers<[1], [0], [0], [1], [0, 0, 1, 1], [], []>} : vector<4x32xf32>, vector<32x96xf32>, vector<4x96xf32> -> vector<4x96xf32>
    %287 = vector.broadcast %14 : vector<1x96xf32> to vector<4x96xf32>
    %288 = arith.addf %286, %287 : vector<4x96xf32>
    %289 = vector.extract_strided_slice %288 {offsets = [0, 0], sizes = [4, 32], strides = [1, 1]} : vector<4x96xf32> to vector<4x32xf32>
    %290 = arith.negf %289 : vector<4x32xf32>
    %291 = math.exp %290 : vector<4x32xf32>
    %cst_98 = arith.constant 1.000000e+00 : f32
    %292 = vector.broadcast %cst_98 : f32 to vector<4x32xf32>
    %293 = arith.addf %292, %291 : vector<4x32xf32>
    %294 = arith.divf %292, %293 : vector<4x32xf32>
    %295 = vector.extract_strided_slice %288 {offsets = [0, 32], sizes = [4, 32], strides = [1, 1]} : vector<4x96xf32> to vector<4x32xf32>
    %296 = math.tanh %295 : vector<4x32xf32>
    %297 = arith.mulf %294, %296 : vector<4x32xf32>
    %298 = vector.extract_strided_slice %288 {offsets = [0, 64], sizes = [4, 32], strides = [1, 1]} : vector<4x96xf32> to vector<4x32xf32>
    %299 = arith.negf %298 : vector<4x32xf32>
    %300 = math.exp %299 : vector<4x32xf32>
    %cst_99 = arith.constant 1.000000e+00 : f32
    %301 = vector.broadcast %cst_99 : f32 to vector<4x32xf32>
    %302 = arith.addf %301, %300 : vector<4x32xf32>
    %303 = arith.divf %301, %302 : vector<4x32xf32>
    %304 = math.tanh %297 : vector<4x32xf32>
    %305 = arith.mulf %303, %304 : vector<4x32xf32>
    %cst_100 = arith.constant dense<0.000000e+00> : vector<4x16xf32>
    %306 = tpu.matmul %262, %6, %cst_100 {dimension_numbers = #tpu.dot_dimension_numbers<[1], [0], [0], [1], [0, 0, 1, 1], [], []>} : vector<4x9xf32>, vector<9x16xf32>, vector<4x16xf32> -> vector<4x16xf32>
    %cst_101 = arith.constant dense<0.000000e+00> : vector<4x16xf32>
    %307 = tpu.matmul %305, %7, %cst_101 {dimension_numbers = #tpu.dot_dimension_numbers<[1], [0], [0], [1], [0, 0, 1, 1], [], []>} : vector<4x32xf32>, vector<32x16xf32>, vector<4x16xf32> -> vector<4x16xf32>
    %308 = arith.addf %306, %307 : vector<4x16xf32>
    %309 = vector.broadcast %15 : vector<1x16xf32> to vector<4x16xf32>
    %310 = arith.addf %308, %309 : vector<4x16xf32>
    %cst_102 = arith.constant 0.000000e+00 : f32
    %311 = vector.broadcast %cst_102 : f32 to vector<4x16xf32>
    %312 = arith.maximumf %310, %311 : vector<4x16xf32>
    %cst_103 = arith.constant dense<0.000000e+00> : vector<4x9xf32>
    %313 = tpu.matmul %312, %8, %cst_103 {dimension_numbers = #tpu.dot_dimension_numbers<[1], [0], [0], [1], [0, 0, 1, 1], [], []>} : vector<4x16xf32>, vector<16x9xf32>, vector<4x9xf32> -> vector<4x9xf32>
    %314 = vector.broadcast %16 : vector<1x9xf32> to vector<4x9xf32>
    %315 = arith.addf %313, %314 : vector<4x9xf32>
    %cst_104 = arith.constant 0.000000e+00 : f32
    %316 = vector.broadcast %cst_104 : f32 to vector<4x9xf32>
    %317 = arith.maximumf %315, %316 : vector<4x9xf32>
    %318 = vector.broadcast %17 : vector<1x9xf32> to vector<4x9xf32>
    %319 = arith.mulf %317, %318 : vector<4x9xf32>
    %320 = vector.broadcast %18 : vector<1x9xf32> to vector<4x9xf32>
    %321 = arith.addf %319, %320 : vector<4x9xf32>
    %c3_105 = arith.constant 3 : index
    %c0_106 = arith.constant 0 : index
    %c0_107 = arith.constant 0 : index
    %322 = vector.load %arg5[%c3_105, %c0_106, %c0_107] : memref<12x4x9xf32, #tpu.memory_space<vmem>>, vector<1x4x9xf32>
    %323 = vector.shape_cast %322 : vector<1x4x9xf32> to vector<4x9xf32>
    %324 = vector.shape_cast %321 : vector<4x9xf32> to vector<1x4x9xf32>
    tpu.vector_store %arg5[%c3_105, %c0_106, %c0_107], %324 {strides = array<i32>} : memref<12x4x9xf32, #tpu.memory_space<vmem>>, vector<1x4x9xf32>,
    %cst_108 = arith.constant dense<0xFF800000> : vector<4xf32>
    %325 = vector.multi_reduction <maximumf>, %321, %cst_108 [1] : vector<4x9xf32> to vector<4xf32>
    %326 = vector.shape_cast %325 : vector<4xf32> to vector<4x1xf32>
    %327 = tpu.iota {dimensions = array<i32: 1>} : vector<4x9xi32>
    %328 = vector.broadcast %326 : vector<4x1xf32> to vector<4x9xf32>
    %329 = arith.cmpf oeq, %321, %328 : vector<4x9xf32>
    %c9_i32_109 = arith.constant 9 : i32
    %330 = vector.broadcast %c9_i32_109 : i32 to vector<4x9xi32>
    %331 = arith.select %329, %327, %330 : vector<4x9xi1>, vector<4x9xi32>
    %cst_110 = arith.constant dense<2147483647> : vector<4xi32>
    %332 = vector.multi_reduction <minsi>, %331, %cst_110 [1] : vector<4x9xi32> to vector<4xi32>
    %333 = vector.shape_cast %332 : vector<4xi32> to vector<4x1xi32>
    %334 = vector.broadcast %333 : vector<4x1xi32> to vector<4x9xi32>
    %335 = arith.cmpi eq, %327, %334 : vector<4x9xi32>
    %336 = arith.extui %335 : vector<4x9xi1> to vector<4x9xi32>
    %337 = arith.sitofp %336 : vector<4x9xi32> to vector<4x9xf32>
    %c4_111 = arith.constant 4 : index
    %c0_112 = arith.constant 0 : index
    %c0_113 = arith.constant 0 : index
    %338 = vector.load %arg2[%c4_111, %c0_112, %c0_113] : memref<12x4x7xf32, #tpu.memory_space<vmem>>, vector<1x4x7xf32>
    %339 = vector.shape_cast %338 : vector<1x4x7xf32> to vector<4x7xf32>
    %cst_114 = arith.constant dense<0.000000e+00> : vector<4x96xf32>
    %340 = tpu.matmul %337, %3, %cst_114 {dimension_numbers = #tpu.dot_dimension_numbers<[1], [0], [0], [1], [0, 0, 1, 1], [], []>} : vector<4x9xf32>, vector<9x96xf32>, vector<4x96xf32> -> vector<4x96xf32>
    %cst_115 = arith.constant dense<0.000000e+00> : vector<4x96xf32>
    %341 = tpu.matmul %339, %4, %cst_115 {dimension_numbers = #tpu.dot_dimension_numbers<[1], [0], [0], [1], [0, 0, 1, 1], [], []>} : vector<4x7xf32>, vector<7x96xf32>, vector<4x96xf32> -> vector<4x96xf32>
    %342 = arith.addf %340, %341 : vector<4x96xf32>
    %343 = arith.addf %342, %36 : vector<4x96xf32>
    %344 = vector.extract_strided_slice %343 {offsets = [0, 0], sizes = [4, 32], strides = [1, 1]} : vector<4x96xf32> to vector<4x32xf32>
    %345 = arith.negf %344 : vector<4x32xf32>
    %346 = math.exp %345 : vector<4x32xf32>
    %cst_116 = arith.constant 1.000000e+00 : f32
    %347 = vector.broadcast %cst_116 : f32 to vector<4x32xf32>
    %348 = arith.addf %347, %346 : vector<4x32xf32>
    %349 = arith.divf %347, %348 : vector<4x32xf32>
    %350 = vector.extract_strided_slice %343 {offsets = [0, 32], sizes = [4, 32], strides = [1, 1]} : vector<4x96xf32> to vector<4x32xf32>
    %351 = math.tanh %350 : vector<4x32xf32>
    %352 = arith.mulf %349, %351 : vector<4x32xf32>
    %353 = vector.extract_strided_slice %343 {offsets = [0, 64], sizes = [4, 32], strides = [1, 1]} : vector<4x96xf32> to vector<4x32xf32>
    %354 = arith.negf %353 : vector<4x32xf32>
    %355 = math.exp %354 : vector<4x32xf32>
    %cst_117 = arith.constant 1.000000e+00 : f32
    %356 = vector.broadcast %cst_117 : f32 to vector<4x32xf32>
    %357 = arith.addf %356, %355 : vector<4x32xf32>
    %358 = arith.divf %356, %357 : vector<4x32xf32>
    %359 = math.tanh %352 : vector<4x32xf32>
    %360 = arith.mulf %358, %359 : vector<4x32xf32>
    %cst_118 = arith.constant dense<0.000000e+00> : vector<4x96xf32>
    %361 = tpu.matmul %360, %5, %cst_118 {dimension_numbers = #tpu.dot_dimension_numbers<[1], [0], [0], [1], [0, 0, 1, 1], [], []>} : vector<4x32xf32>, vector<32x96xf32>, vector<4x96xf32> -> vector<4x96xf32>
    %362 = vector.broadcast %14 : vector<1x96xf32> to vector<4x96xf32>
    %363 = arith.addf %361, %362 : vector<4x96xf32>
    %364 = vector.extract_strided_slice %363 {offsets = [0, 0], sizes = [4, 32], strides = [1, 1]} : vector<4x96xf32> to vector<4x32xf32>
    %365 = arith.negf %364 : vector<4x32xf32>
    %366 = math.exp %365 : vector<4x32xf32>
    %cst_119 = arith.constant 1.000000e+00 : f32
    %367 = vector.broadcast %cst_119 : f32 to vector<4x32xf32>
    %368 = arith.addf %367, %366 : vector<4x32xf32>
    %369 = arith.divf %367, %368 : vector<4x32xf32>
    %370 = vector.extract_strided_slice %363 {offsets = [0, 32], sizes = [4, 32], strides = [1, 1]} : vector<4x96xf32> to vector<4x32xf32>
    %371 = math.tanh %370 : vector<4x32xf32>
    %372 = arith.mulf %369, %371 : vector<4x32xf32>
    %373 = vector.extract_strided_slice %363 {offsets = [0, 64], sizes = [4, 32], strides = [1, 1]} : vector<4x96xf32> to vector<4x32xf32>
    %374 = arith.negf %373 : vector<4x32xf32>
    %375 = math.exp %374 : vector<4x32xf32>
    %cst_120 = arith.constant 1.000000e+00 : f32
    %376 = vector.broadcast %cst_120 : f32 to vector<4x32xf32>
    %377 = arith.addf %376, %375 : vector<4x32xf32>
    %378 = arith.divf %376, %377 : vector<4x32xf32>
    %379 = math.tanh %372 : vector<4x32xf32>
    %380 = arith.mulf %378, %379 : vector<4x32xf32>
    %cst_121 = arith.constant dense<0.000000e+00> : vector<4x16xf32>
    %381 = tpu.matmul %337, %6, %cst_121 {dimension_numbers = #tpu.dot_dimension_numbers<[1], [0], [0], [1], [0, 0, 1, 1], [], []>} : vector<4x9xf32>, vector<9x16xf32>, vector<4x16xf32> -> vector<4x16xf32>
    %cst_122 = arith.constant dense<0.000000e+00> : vector<4x16xf32>
    %382 = tpu.matmul %380, %7, %cst_122 {dimension_numbers = #tpu.dot_dimension_numbers<[1], [0], [0], [1], [0, 0, 1, 1], [], []>} : vector<4x32xf32>, vector<32x16xf32>, vector<4x16xf32> -> vector<4x16xf32>
    %383 = arith.addf %381, %382 : vector<4x16xf32>
    %384 = vector.broadcast %15 : vector<1x16xf32> to vector<4x16xf32>
    %385 = arith.addf %383, %384 : vector<4x16xf32>
    %cst_123 = arith.constant 0.000000e+00 : f32
    %386 = vector.broadcast %cst_123 : f32 to vector<4x16xf32>
    %387 = arith.maximumf %385, %386 : vector<4x16xf32>
    %cst_124 = arith.constant dense<0.000000e+00> : vector<4x9xf32>
    %388 = tpu.matmul %387, %8, %cst_124 {dimension_numbers = #tpu.dot_dimension_numbers<[1], [0], [0], [1], [0, 0, 1, 1], [], []>} : vector<4x16xf32>, vector<16x9xf32>, vector<4x9xf32> -> vector<4x9xf32>
    %389 = vector.broadcast %16 : vector<1x9xf32> to vector<4x9xf32>
    %390 = arith.addf %388, %389 : vector<4x9xf32>
    %cst_125 = arith.constant 0.000000e+00 : f32
    %391 = vector.broadcast %cst_125 : f32 to vector<4x9xf32>
    %392 = arith.maximumf %390, %391 : vector<4x9xf32>
    %393 = vector.broadcast %17 : vector<1x9xf32> to vector<4x9xf32>
    %394 = arith.mulf %392, %393 : vector<4x9xf32>
    %395 = vector.broadcast %18 : vector<1x9xf32> to vector<4x9xf32>
    %396 = arith.addf %394, %395 : vector<4x9xf32>
    %c4_126 = arith.constant 4 : index
    %c0_127 = arith.constant 0 : index
    %c0_128 = arith.constant 0 : index
    %397 = vector.load %arg5[%c4_126, %c0_127, %c0_128] : memref<12x4x9xf32, #tpu.memory_space<vmem>>, vector<1x4x9xf32>
    %398 = vector.shape_cast %397 : vector<1x4x9xf32> to vector<4x9xf32>
    %399 = vector.shape_cast %396 : vector<4x9xf32> to vector<1x4x9xf32>
    tpu.vector_store %arg5[%c4_126, %c0_127, %c0_128], %399 {strides = array<i32>} : memref<12x4x9xf32, #tpu.memory_space<vmem>>, vector<1x4x9xf32>,
    %cst_129 = arith.constant dense<0xFF800000> : vector<4xf32>
    %400 = vector.multi_reduction <maximumf>, %396, %cst_129 [1] : vector<4x9xf32> to vector<4xf32>
    %401 = vector.shape_cast %400 : vector<4xf32> to vector<4x1xf32>
    %402 = tpu.iota {dimensions = array<i32: 1>} : vector<4x9xi32>
    %403 = vector.broadcast %401 : vector<4x1xf32> to vector<4x9xf32>
    %404 = arith.cmpf oeq, %396, %403 : vector<4x9xf32>
    %c9_i32_130 = arith.constant 9 : i32
    %405 = vector.broadcast %c9_i32_130 : i32 to vector<4x9xi32>
    %406 = arith.select %404, %402, %405 : vector<4x9xi1>, vector<4x9xi32>
    %cst_131 = arith.constant dense<2147483647> : vector<4xi32>
    %407 = vector.multi_reduction <minsi>, %406, %cst_131 [1] : vector<4x9xi32> to vector<4xi32>
    %408 = vector.shape_cast %407 : vector<4xi32> to vector<4x1xi32>
    %409 = vector.broadcast %408 : vector<4x1xi32> to vector<4x9xi32>
    %410 = arith.cmpi eq, %402, %409 : vector<4x9xi32>
    %411 = arith.extui %410 : vector<4x9xi1> to vector<4x9xi32>
    %412 = arith.sitofp %411 : vector<4x9xi32> to vector<4x9xf32>
    %c5_132 = arith.constant 5 : index
    %c0_133 = arith.constant 0 : index
    %c0_134 = arith.constant 0 : index
    %413 = vector.load %arg2[%c5_132, %c0_133, %c0_134] : memref<12x4x7xf32, #tpu.memory_space<vmem>>, vector<1x4x7xf32>
    %414 = vector.shape_cast %413 : vector<1x4x7xf32> to vector<4x7xf32>
    %cst_135 = arith.constant dense<0.000000e+00> : vector<4x96xf32>
    %415 = tpu.matmul %412, %3, %cst_135 {dimension_numbers = #tpu.dot_dimension_numbers<[1], [0], [0], [1], [0, 0, 1, 1], [], []>} : vector<4x9xf32>, vector<9x96xf32>, vector<4x96xf32> -> vector<4x96xf32>
    %cst_136 = arith.constant dense<0.000000e+00> : vector<4x96xf32>
    %416 = tpu.matmul %414, %4, %cst_136 {dimension_numbers = #tpu.dot_dimension_numbers<[1], [0], [0], [1], [0, 0, 1, 1], [], []>} : vector<4x7xf32>, vector<7x96xf32>, vector<4x96xf32> -> vector<4x96xf32>
    %417 = arith.addf %415, %416 : vector<4x96xf32>
    %418 = arith.addf %417, %36 : vector<4x96xf32>
    %419 = vector.extract_strided_slice %418 {offsets = [0, 0], sizes = [4, 32], strides = [1, 1]} : vector<4x96xf32> to vector<4x32xf32>
    %420 = arith.negf %419 : vector<4x32xf32>
    %421 = math.exp %420 : vector<4x32xf32>
    %cst_137 = arith.constant 1.000000e+00 : f32
    %422 = vector.broadcast %cst_137 : f32 to vector<4x32xf32>
    %423 = arith.addf %422, %421 : vector<4x32xf32>
    %424 = arith.divf %422, %423 : vector<4x32xf32>
    %425 = vector.extract_strided_slice %418 {offsets = [0, 32], sizes = [4, 32], strides = [1, 1]} : vector<4x96xf32> to vector<4x32xf32>
    %426 = math.tanh %425 : vector<4x32xf32>
    %427 = arith.mulf %424, %426 : vector<4x32xf32>
    %428 = vector.extract_strided_slice %418 {offsets = [0, 64], sizes = [4, 32], strides = [1, 1]} : vector<4x96xf32> to vector<4x32xf32>
    %429 = arith.negf %428 : vector<4x32xf32>
    %430 = math.exp %429 : vector<4x32xf32>
    %cst_138 = arith.constant 1.000000e+00 : f32
    %431 = vector.broadcast %cst_138 : f32 to vector<4x32xf32>
    %432 = arith.addf %431, %430 : vector<4x32xf32>
    %433 = arith.divf %431, %432 : vector<4x32xf32>
    %434 = math.tanh %427 : vector<4x32xf32>
    %435 = arith.mulf %433, %434 : vector<4x32xf32>
    %cst_139 = arith.constant dense<0.000000e+00> : vector<4x96xf32>
    %436 = tpu.matmul %435, %5, %cst_139 {dimension_numbers = #tpu.dot_dimension_numbers<[1], [0], [0], [1], [0, 0, 1, 1], [], []>} : vector<4x32xf32>, vector<32x96xf32>, vector<4x96xf32> -> vector<4x96xf32>
    %437 = vector.broadcast %14 : vector<1x96xf32> to vector<4x96xf32>
    %438 = arith.addf %436, %437 : vector<4x96xf32>
    %439 = vector.extract_strided_slice %438 {offsets = [0, 0], sizes = [4, 32], strides = [1, 1]} : vector<4x96xf32> to vector<4x32xf32>
    %440 = arith.negf %439 : vector<4x32xf32>
    %441 = math.exp %440 : vector<4x32xf32>
    %cst_140 = arith.constant 1.000000e+00 : f32
    %442 = vector.broadcast %cst_140 : f32 to vector<4x32xf32>
    %443 = arith.addf %442, %441 : vector<4x32xf32>
    %444 = arith.divf %442, %443 : vector<4x32xf32>
    %445 = vector.extract_strided_slice %438 {offsets = [0, 32], sizes = [4, 32], strides = [1, 1]} : vector<4x96xf32> to vector<4x32xf32>
    %446 = math.tanh %445 : vector<4x32xf32>
    %447 = arith.mulf %444, %446 : vector<4x32xf32>
    %448 = vector.extract_strided_slice %438 {offsets = [0, 64], sizes = [4, 32], strides = [1, 1]} : vector<4x96xf32> to vector<4x32xf32>
    %449 = arith.negf %448 : vector<4x32xf32>
    %450 = math.exp %449 : vector<4x32xf32>
    %cst_141 = arith.constant 1.000000e+00 : f32
    %451 = vector.broadcast %cst_141 : f32 to vector<4x32xf32>
    %452 = arith.addf %451, %450 : vector<4x32xf32>
    %453 = arith.divf %451, %452 : vector<4x32xf32>
    %454 = math.tanh %447 : vector<4x32xf32>
    %455 = arith.mulf %453, %454 : vector<4x32xf32>
    %cst_142 = arith.constant dense<0.000000e+00> : vector<4x16xf32>
    %456 = tpu.matmul %412, %6, %cst_142 {dimension_numbers = #tpu.dot_dimension_numbers<[1], [0], [0], [1], [0, 0, 1, 1], [], []>} : vector<4x9xf32>, vector<9x16xf32>, vector<4x16xf32> -> vector<4x16xf32>
    %cst_143 = arith.constant dense<0.000000e+00> : vector<4x16xf32>
    %457 = tpu.matmul %455, %7, %cst_143 {dimension_numbers = #tpu.dot_dimension_numbers<[1], [0], [0], [1], [0, 0, 1, 1], [], []>} : vector<4x32xf32>, vector<32x16xf32>, vector<4x16xf32> -> vector<4x16xf32>
    %458 = arith.addf %456, %457 : vector<4x16xf32>
    %459 = vector.broadcast %15 : vector<1x16xf32> to vector<4x16xf32>
    %460 = arith.addf %458, %459 : vector<4x16xf32>
    %cst_144 = arith.constant 0.000000e+00 : f32
    %461 = vector.broadcast %cst_144 : f32 to vector<4x16xf32>
    %462 = arith.maximumf %460, %461 : vector<4x16xf32>
    %cst_145 = arith.constant dense<0.000000e+00> : vector<4x9xf32>
    %463 = tpu.matmul %462, %8, %cst_145 {dimension_numbers = #tpu.dot_dimension_numbers<[1], [0], [0], [1], [0, 0, 1, 1], [], []>} : vector<4x16xf32>, vector<16x9xf32>, vector<4x9xf32> -> vector<4x9xf32>
    %464 = vector.broadcast %16 : vector<1x9xf32> to vector<4x9xf32>
    %465 = arith.addf %463, %464 : vector<4x9xf32>
    %cst_146 = arith.constant 0.000000e+00 : f32
    %466 = vector.broadcast %cst_146 : f32 to vector<4x9xf32>
    %467 = arith.maximumf %465, %466 : vector<4x9xf32>
    %468 = vector.broadcast %17 : vector<1x9xf32> to vector<4x9xf32>
    %469 = arith.mulf %467, %468 : vector<4x9xf32>
    %470 = vector.broadcast %18 : vector<1x9xf32> to vector<4x9xf32>
    %471 = arith.addf %469, %470 : vector<4x9xf32>
    %c5_147 = arith.constant 5 : index
    %c0_148 = arith.constant 0 : index
    %c0_149 = arith.constant 0 : index
    %472 = vector.load %arg5[%c5_147, %c0_148, %c0_149] : memref<12x4x9xf32, #tpu.memory_space<vmem>>, vector<1x4x9xf32>
    %473 = vector.shape_cast %472 : vector<1x4x9xf32> to vector<4x9xf32>
    %474 = vector.shape_cast %471 : vector<4x9xf32> to vector<1x4x9xf32>
    tpu.vector_store %arg5[%c5_147, %c0_148, %c0_149], %474 {strides = array<i32>} : memref<12x4x9xf32, #tpu.memory_space<vmem>>, vector<1x4x9xf32>,
    %cst_150 = arith.constant dense<0xFF800000> : vector<4xf32>
    %475 = vector.multi_reduction <maximumf>, %471, %cst_150 [1] : vector<4x9xf32> to vector<4xf32>
    %476 = vector.shape_cast %475 : vector<4xf32> to vector<4x1xf32>
    %477 = tpu.iota {dimensions = array<i32: 1>} : vector<4x9xi32>
    %478 = vector.broadcast %476 : vector<4x1xf32> to vector<4x9xf32>
    %479 = arith.cmpf oeq, %471, %478 : vector<4x9xf32>
    %c9_i32_151 = arith.constant 9 : i32
    %480 = vector.broadcast %c9_i32_151 : i32 to vector<4x9xi32>
    %481 = arith.select %479, %477, %480 : vector<4x9xi1>, vector<4x9xi32>
    %cst_152 = arith.constant dense<2147483647> : vector<4xi32>
    %482 = vector.multi_reduction <minsi>, %481, %cst_152 [1] : vector<4x9xi32> to vector<4xi32>
    %483 = vector.shape_cast %482 : vector<4xi32> to vector<4x1xi32>
    %484 = vector.broadcast %483 : vector<4x1xi32> to vector<4x9xi32>
    %485 = arith.cmpi eq, %477, %484 : vector<4x9xi32>
    %486 = arith.extui %485 : vector<4x9xi1> to vector<4x9xi32>
    %487 = arith.sitofp %486 : vector<4x9xi32> to vector<4x9xf32>
    %c6_153 = arith.constant 6 : index
    %c0_154 = arith.constant 0 : index
    %c0_155 = arith.constant 0 : index
    %488 = vector.load %arg2[%c6_153, %c0_154, %c0_155] : memref<12x4x7xf32, #tpu.memory_space<vmem>>, vector<1x4x7xf32>
    %489 = vector.shape_cast %488 : vector<1x4x7xf32> to vector<4x7xf32>
    %cst_156 = arith.constant dense<0.000000e+00> : vector<4x96xf32>
    %490 = tpu.matmul %487, %3, %cst_156 {dimension_numbers = #tpu.dot_dimension_numbers<[1], [0], [0], [1], [0, 0, 1, 1], [], []>} : vector<4x9xf32>, vector<9x96xf32>, vector<4x96xf32> -> vector<4x96xf32>
    %cst_157 = arith.constant dense<0.000000e+00> : vector<4x96xf32>
    %491 = tpu.matmul %489, %4, %cst_157 {dimension_numbers = #tpu.dot_dimension_numbers<[1], [0], [0], [1], [0, 0, 1, 1], [], []>} : vector<4x7xf32>, vector<7x96xf32>, vector<4x96xf32> -> vector<4x96xf32>
    %492 = arith.addf %490, %491 : vector<4x96xf32>
    %493 = arith.addf %492, %36 : vector<4x96xf32>
    %494 = vector.extract_strided_slice %493 {offsets = [0, 0], sizes = [4, 32], strides = [1, 1]} : vector<4x96xf32> to vector<4x32xf32>
    %495 = arith.negf %494 : vector<4x32xf32>
    %496 = math.exp %495 : vector<4x32xf32>
    %cst_158 = arith.constant 1.000000e+00 : f32
    %497 = vector.broadcast %cst_158 : f32 to vector<4x32xf32>
    %498 = arith.addf %497, %496 : vector<4x32xf32>
    %499 = arith.divf %497, %498 : vector<4x32xf32>
    %500 = vector.extract_strided_slice %493 {offsets = [0, 32], sizes = [4, 32], strides = [1, 1]} : vector<4x96xf32> to vector<4x32xf32>
    %501 = math.tanh %500 : vector<4x32xf32>
    %502 = arith.mulf %499, %501 : vector<4x32xf32>
    %503 = vector.extract_strided_slice %493 {offsets = [0, 64], sizes = [4, 32], strides = [1, 1]} : vector<4x96xf32> to vector<4x32xf32>
    %504 = arith.negf %503 : vector<4x32xf32>
    %505 = math.exp %504 : vector<4x32xf32>
    %cst_159 = arith.constant 1.000000e+00 : f32
    %506 = vector.broadcast %cst_159 : f32 to vector<4x32xf32>
    %507 = arith.addf %506, %505 : vector<4x32xf32>
    %508 = arith.divf %506, %507 : vector<4x32xf32>
    %509 = math.tanh %502 : vector<4x32xf32>
    %510 = arith.mulf %508, %509 : vector<4x32xf32>
    %cst_160 = arith.constant dense<0.000000e+00> : vector<4x96xf32>
    %511 = tpu.matmul %510, %5, %cst_160 {dimension_numbers = #tpu.dot_dimension_numbers<[1], [0], [0], [1], [0, 0, 1, 1], [], []>} : vector<4x32xf32>, vector<32x96xf32>, vector<4x96xf32> -> vector<4x96xf32>
    %512 = vector.broadcast %14 : vector<1x96xf32> to vector<4x96xf32>
    %513 = arith.addf %511, %512 : vector<4x96xf32>
    %514 = vector.extract_strided_slice %513 {offsets = [0, 0], sizes = [4, 32], strides = [1, 1]} : vector<4x96xf32> to vector<4x32xf32>
    %515 = arith.negf %514 : vector<4x32xf32>
    %516 = math.exp %515 : vector<4x32xf32>
    %cst_161 = arith.constant 1.000000e+00 : f32
    %517 = vector.broadcast %cst_161 : f32 to vector<4x32xf32>
    %518 = arith.addf %517, %516 : vector<4x32xf32>
    %519 = arith.divf %517, %518 : vector<4x32xf32>
    %520 = vector.extract_strided_slice %513 {offsets = [0, 32], sizes = [4, 32], strides = [1, 1]} : vector<4x96xf32> to vector<4x32xf32>
    %521 = math.tanh %520 : vector<4x32xf32>
    %522 = arith.mulf %519, %521 : vector<4x32xf32>
    %523 = vector.extract_strided_slice %513 {offsets = [0, 64], sizes = [4, 32], strides = [1, 1]} : vector<4x96xf32> to vector<4x32xf32>
    %524 = arith.negf %523 : vector<4x32xf32>
    %525 = math.exp %524 : vector<4x32xf32>
    %cst_162 = arith.constant 1.000000e+00 : f32
    %526 = vector.broadcast %cst_162 : f32 to vector<4x32xf32>
    %527 = arith.addf %526, %525 : vector<4x32xf32>
    %528 = arith.divf %526, %527 : vector<4x32xf32>
    %529 = math.tanh %522 : vector<4x32xf32>
    %530 = arith.mulf %528, %529 : vector<4x32xf32>
    %cst_163 = arith.constant dense<0.000000e+00> : vector<4x16xf32>
    %531 = tpu.matmul %487, %6, %cst_163 {dimension_numbers = #tpu.dot_dimension_numbers<[1], [0], [0], [1], [0, 0, 1, 1], [], []>} : vector<4x9xf32>, vector<9x16xf32>, vector<4x16xf32> -> vector<4x16xf32>
    %cst_164 = arith.constant dense<0.000000e+00> : vector<4x16xf32>
    %532 = tpu.matmul %530, %7, %cst_164 {dimension_numbers = #tpu.dot_dimension_numbers<[1], [0], [0], [1], [0, 0, 1, 1], [], []>} : vector<4x32xf32>, vector<32x16xf32>, vector<4x16xf32> -> vector<4x16xf32>
    %533 = arith.addf %531, %532 : vector<4x16xf32>
    %534 = vector.broadcast %15 : vector<1x16xf32> to vector<4x16xf32>
    %535 = arith.addf %533, %534 : vector<4x16xf32>
    %cst_165 = arith.constant 0.000000e+00 : f32
    %536 = vector.broadcast %cst_165 : f32 to vector<4x16xf32>
    %537 = arith.maximumf %535, %536 : vector<4x16xf32>
    %cst_166 = arith.constant dense<0.000000e+00> : vector<4x9xf32>
    %538 = tpu.matmul %537, %8, %cst_166 {dimension_numbers = #tpu.dot_dimension_numbers<[1], [0], [0], [1], [0, 0, 1, 1], [], []>} : vector<4x16xf32>, vector<16x9xf32>, vector<4x9xf32> -> vector<4x9xf32>
    %539 = vector.broadcast %16 : vector<1x9xf32> to vector<4x9xf32>
    %540 = arith.addf %538, %539 : vector<4x9xf32>
    %cst_167 = arith.constant 0.000000e+00 : f32
    %541 = vector.broadcast %cst_167 : f32 to vector<4x9xf32>
    %542 = arith.maximumf %540, %541 : vector<4x9xf32>
    %543 = vector.broadcast %17 : vector<1x9xf32> to vector<4x9xf32>
    %544 = arith.mulf %542, %543 : vector<4x9xf32>
    %545 = vector.broadcast %18 : vector<1x9xf32> to vector<4x9xf32>
    %546 = arith.addf %544, %545 : vector<4x9xf32>
    %c6_168 = arith.constant 6 : index
    %c0_169 = arith.constant 0 : index
    %c0_170 = arith.constant 0 : index
    %547 = vector.load %arg5[%c6_168, %c0_169, %c0_170] : memref<12x4x9xf32, #tpu.memory_space<vmem>>, vector<1x4x9xf32>
    %548 = vector.shape_cast %547 : vector<1x4x9xf32> to vector<4x9xf32>
    %549 = vector.shape_cast %546 : vector<4x9xf32> to vector<1x4x9xf32>
    tpu.vector_store %arg5[%c6_168, %c0_169, %c0_170], %549 {strides = array<i32>} : memref<12x4x9xf32, #tpu.memory_space<vmem>>, vector<1x4x9xf32>,
    %cst_171 = arith.constant dense<0xFF800000> : vector<4xf32>
    %550 = vector.multi_reduction <maximumf>, %546, %cst_171 [1] : vector<4x9xf32> to vector<4xf32>
    %551 = vector.shape_cast %550 : vector<4xf32> to vector<4x1xf32>
    %552 = tpu.iota {dimensions = array<i32: 1>} : vector<4x9xi32>
    %553 = vector.broadcast %551 : vector<4x1xf32> to vector<4x9xf32>
    %554 = arith.cmpf oeq, %546, %553 : vector<4x9xf32>
    %c9_i32_172 = arith.constant 9 : i32
    %555 = vector.broadcast %c9_i32_172 : i32 to vector<4x9xi32>
    %556 = arith.select %554, %552, %555 : vector<4x9xi1>, vector<4x9xi32>
    %cst_173 = arith.constant dense<2147483647> : vector<4xi32>
    %557 = vector.multi_reduction <minsi>, %556, %cst_173 [1] : vector<4x9xi32> to vector<4xi32>
    %558 = vector.shape_cast %557 : vector<4xi32> to vector<4x1xi32>
    %559 = vector.broadcast %558 : vector<4x1xi32> to vector<4x9xi32>
    %560 = arith.cmpi eq, %552, %559 : vector<4x9xi32>
    %561 = arith.extui %560 : vector<4x9xi1> to vector<4x9xi32>
    %562 = arith.sitofp %561 : vector<4x9xi32> to vector<4x9xf32>
    %c7_174 = arith.constant 7 : index
    %c0_175 = arith.constant 0 : index
    %c0_176 = arith.constant 0 : index
    %563 = vector.load %arg2[%c7_174, %c0_175, %c0_176] : memref<12x4x7xf32, #tpu.memory_space<vmem>>, vector<1x4x7xf32>
    %564 = vector.shape_cast %563 : vector<1x4x7xf32> to vector<4x7xf32>
    %cst_177 = arith.constant dense<0.000000e+00> : vector<4x96xf32>
    %565 = tpu.matmul %562, %3, %cst_177 {dimension_numbers = #tpu.dot_dimension_numbers<[1], [0], [0], [1], [0, 0, 1, 1], [], []>} : vector<4x9xf32>, vector<9x96xf32>, vector<4x96xf32> -> vector<4x96xf32>
    %cst_178 = arith.constant dense<0.000000e+00> : vector<4x96xf32>
    %566 = tpu.matmul %564, %4, %cst_178 {dimension_numbers = #tpu.dot_dimension_numbers<[1], [0], [0], [1], [0, 0, 1, 1], [], []>} : vector<4x7xf32>, vector<7x96xf32>, vector<4x96xf32> -> vector<4x96xf32>
    %567 = arith.addf %565, %566 : vector<4x96xf32>
    %568 = arith.addf %567, %36 : vector<4x96xf32>
    %569 = vector.extract_strided_slice %568 {offsets = [0, 0], sizes = [4, 32], strides = [1, 1]} : vector<4x96xf32> to vector<4x32xf32>
    %570 = arith.negf %569 : vector<4x32xf32>
    %571 = math.exp %570 : vector<4x32xf32>
    %cst_179 = arith.constant 1.000000e+00 : f32
    %572 = vector.broadcast %cst_179 : f32 to vector<4x32xf32>
    %573 = arith.addf %572, %571 : vector<4x32xf32>
    %574 = arith.divf %572, %573 : vector<4x32xf32>
    %575 = vector.extract_strided_slice %568 {offsets = [0, 32], sizes = [4, 32], strides = [1, 1]} : vector<4x96xf32> to vector<4x32xf32>
    %576 = math.tanh %575 : vector<4x32xf32>
    %577 = arith.mulf %574, %576 : vector<4x32xf32>
    %578 = vector.extract_strided_slice %568 {offsets = [0, 64], sizes = [4, 32], strides = [1, 1]} : vector<4x96xf32> to vector<4x32xf32>
    %579 = arith.negf %578 : vector<4x32xf32>
    %580 = math.exp %579 : vector<4x32xf32>
    %cst_180 = arith.constant 1.000000e+00 : f32
    %581 = vector.broadcast %cst_180 : f32 to vector<4x32xf32>
    %582 = arith.addf %581, %580 : vector<4x32xf32>
    %583 = arith.divf %581, %582 : vector<4x32xf32>
    %584 = math.tanh %577 : vector<4x32xf32>
    %585 = arith.mulf %583, %584 : vector<4x32xf32>
    %cst_181 = arith.constant dense<0.000000e+00> : vector<4x96xf32>
    %586 = tpu.matmul %585, %5, %cst_181 {dimension_numbers = #tpu.dot_dimension_numbers<[1], [0], [0], [1], [0, 0, 1, 1], [], []>} : vector<4x32xf32>, vector<32x96xf32>, vector<4x96xf32> -> vector<4x96xf32>
    %587 = vector.broadcast %14 : vector<1x96xf32> to vector<4x96xf32>
    %588 = arith.addf %586, %587 : vector<4x96xf32>
    %589 = vector.extract_strided_slice %588 {offsets = [0, 0], sizes = [4, 32], strides = [1, 1]} : vector<4x96xf32> to vector<4x32xf32>
    %590 = arith.negf %589 : vector<4x32xf32>
    %591 = math.exp %590 : vector<4x32xf32>
    %cst_182 = arith.constant 1.000000e+00 : f32
    %592 = vector.broadcast %cst_182 : f32 to vector<4x32xf32>
    %593 = arith.addf %592, %591 : vector<4x32xf32>
    %594 = arith.divf %592, %593 : vector<4x32xf32>
    %595 = vector.extract_strided_slice %588 {offsets = [0, 32], sizes = [4, 32], strides = [1, 1]} : vector<4x96xf32> to vector<4x32xf32>
    %596 = math.tanh %595 : vector<4x32xf32>
    %597 = arith.mulf %594, %596 : vector<4x32xf32>
    %598 = vector.extract_strided_slice %588 {offsets = [0, 64], sizes = [4, 32], strides = [1, 1]} : vector<4x96xf32> to vector<4x32xf32>
    %599 = arith.negf %598 : vector<4x32xf32>
    %600 = math.exp %599 : vector<4x32xf32>
    %cst_183 = arith.constant 1.000000e+00 : f32
    %601 = vector.broadcast %cst_183 : f32 to vector<4x32xf32>
    %602 = arith.addf %601, %600 : vector<4x32xf32>
    %603 = arith.divf %601, %602 : vector<4x32xf32>
    %604 = math.tanh %597 : vector<4x32xf32>
    %605 = arith.mulf %603, %604 : vector<4x32xf32>
    %cst_184 = arith.constant dense<0.000000e+00> : vector<4x16xf32>
    %606 = tpu.matmul %562, %6, %cst_184 {dimension_numbers = #tpu.dot_dimension_numbers<[1], [0], [0], [1], [0, 0, 1, 1], [], []>} : vector<4x9xf32>, vector<9x16xf32>, vector<4x16xf32> -> vector<4x16xf32>
    %cst_185 = arith.constant dense<0.000000e+00> : vector<4x16xf32>
    %607 = tpu.matmul %605, %7, %cst_185 {dimension_numbers = #tpu.dot_dimension_numbers<[1], [0], [0], [1], [0, 0, 1, 1], [], []>} : vector<4x32xf32>, vector<32x16xf32>, vector<4x16xf32> -> vector<4x16xf32>
    %608 = arith.addf %606, %607 : vector<4x16xf32>
    %609 = vector.broadcast %15 : vector<1x16xf32> to vector<4x16xf32>
    %610 = arith.addf %608, %609 : vector<4x16xf32>
    %cst_186 = arith.constant 0.000000e+00 : f32
    %611 = vector.broadcast %cst_186 : f32 to vector<4x16xf32>
    %612 = arith.maximumf %610, %611 : vector<4x16xf32>
    %cst_187 = arith.constant dense<0.000000e+00> : vector<4x9xf32>
    %613 = tpu.matmul %612, %8, %cst_187 {dimension_numbers = #tpu.dot_dimension_numbers<[1], [0], [0], [1], [0, 0, 1, 1], [], []>} : vector<4x16xf32>, vector<16x9xf32>, vector<4x9xf32> -> vector<4x9xf32>
    %614 = vector.broadcast %16 : vector<1x9xf32> to vector<4x9xf32>
    %615 = arith.addf %613, %614 : vector<4x9xf32>
    %cst_188 = arith.constant 0.000000e+00 : f32
    %616 = vector.broadcast %cst_188 : f32 to vector<4x9xf32>
    %617 = arith.maximumf %615, %616 : vector<4x9xf32>
    %618 = vector.broadcast %17 : vector<1x9xf32> to vector<4x9xf32>
    %619 = arith.mulf %617, %618 : vector<4x9xf32>
    %620 = vector.broadcast %18 : vector<1x9xf32> to vector<4x9xf32>
    %621 = arith.addf %619, %620 : vector<4x9xf32>
    %c7_189 = arith.constant 7 : index
    %c0_190 = arith.constant 0 : index
    %c0_191 = arith.constant 0 : index
    %622 = vector.load %arg5[%c7_189, %c0_190, %c0_191] : memref<12x4x9xf32, #tpu.memory_space<vmem>>, vector<1x4x9xf32>
    %623 = vector.shape_cast %622 : vector<1x4x9xf32> to vector<4x9xf32>
    %624 = vector.shape_cast %621 : vector<4x9xf32> to vector<1x4x9xf32>
    tpu.vector_store %arg5[%c7_189, %c0_190, %c0_191], %624 {strides = array<i32>} : memref<12x4x9xf32, #tpu.memory_space<vmem>>, vector<1x4x9xf32>,
    %cst_192 = arith.constant dense<0xFF800000> : vector<4xf32>
    %625 = vector.multi_reduction <maximumf>, %621, %cst_192 [1] : vector<4x9xf32> to vector<4xf32>
    %626 = vector.shape_cast %625 : vector<4xf32> to vector<4x1xf32>
    %627 = tpu.iota {dimensions = array<i32: 1>} : vector<4x9xi32>
    %628 = vector.broadcast %626 : vector<4x1xf32> to vector<4x9xf32>
    %629 = arith.cmpf oeq, %621, %628 : vector<4x9xf32>
    %c9_i32_193 = arith.constant 9 : i32
    %630 = vector.broadcast %c9_i32_193 : i32 to vector<4x9xi32>
    %631 = arith.select %629, %627, %630 : vector<4x9xi1>, vector<4x9xi32>
    %cst_194 = arith.constant dense<2147483647> : vector<4xi32>
    %632 = vector.multi_reduction <minsi>, %631, %cst_194 [1] : vector<4x9xi32> to vector<4xi32>
    %633 = vector.shape_cast %632 : vector<4xi32> to vector<4x1xi32>
    %634 = vector.broadcast %633 : vector<4x1xi32> to vector<4x9xi32>
    %635 = arith.cmpi eq, %627, %634 : vector<4x9xi32>
    %636 = arith.extui %635 : vector<4x9xi1> to vector<4x9xi32>
    %637 = arith.sitofp %636 : vector<4x9xi32> to vector<4x9xf32>
    %c8_195 = arith.constant 8 : index
    %c0_196 = arith.constant 0 : index
    %c0_197 = arith.constant 0 : index
    %638 = vector.load %arg2[%c8_195, %c0_196, %c0_197] : memref<12x4x7xf32, #tpu.memory_space<vmem>>, vector<1x4x7xf32>
    %639 = vector.shape_cast %638 : vector<1x4x7xf32> to vector<4x7xf32>
    %cst_198 = arith.constant dense<0.000000e+00> : vector<4x96xf32>
    %640 = tpu.matmul %637, %3, %cst_198 {dimension_numbers = #tpu.dot_dimension_numbers<[1], [0], [0], [1], [0, 0, 1, 1], [], []>} : vector<4x9xf32>, vector<9x96xf32>, vector<4x96xf32> -> vector<4x96xf32>
    %cst_199 = arith.constant dense<0.000000e+00> : vector<4x96xf32>
    %641 = tpu.matmul %639, %4, %cst_199 {dimension_numbers = #tpu.dot_dimension_numbers<[1], [0], [0], [1], [0, 0, 1, 1], [], []>} : vector<4x7xf32>, vector<7x96xf32>, vector<4x96xf32> -> vector<4x96xf32>
    %642 = arith.addf %640, %641 : vector<4x96xf32>
    %643 = arith.addf %642, %36 : vector<4x96xf32>
    %644 = vector.extract_strided_slice %643 {offsets = [0, 0], sizes = [4, 32], strides = [1, 1]} : vector<4x96xf32> to vector<4x32xf32>
    %645 = arith.negf %644 : vector<4x32xf32>
    %646 = math.exp %645 : vector<4x32xf32>
    %cst_200 = arith.constant 1.000000e+00 : f32
    %647 = vector.broadcast %cst_200 : f32 to vector<4x32xf32>
    %648 = arith.addf %647, %646 : vector<4x32xf32>
    %649 = arith.divf %647, %648 : vector<4x32xf32>
    %650 = vector.extract_strided_slice %643 {offsets = [0, 32], sizes = [4, 32], strides = [1, 1]} : vector<4x96xf32> to vector<4x32xf32>
    %651 = math.tanh %650 : vector<4x32xf32>
    %652 = arith.mulf %649, %651 : vector<4x32xf32>
    %653 = vector.extract_strided_slice %643 {offsets = [0, 64], sizes = [4, 32], strides = [1, 1]} : vector<4x96xf32> to vector<4x32xf32>
    %654 = arith.negf %653 : vector<4x32xf32>
    %655 = math.exp %654 : vector<4x32xf32>
    %cst_201 = arith.constant 1.000000e+00 : f32
    %656 = vector.broadcast %cst_201 : f32 to vector<4x32xf32>
    %657 = arith.addf %656, %655 : vector<4x32xf32>
    %658 = arith.divf %656, %657 : vector<4x32xf32>
    %659 = math.tanh %652 : vector<4x32xf32>
    %660 = arith.mulf %658, %659 : vector<4x32xf32>
    %cst_202 = arith.constant dense<0.000000e+00> : vector<4x96xf32>
    %661 = tpu.matmul %660, %5, %cst_202 {dimension_numbers = #tpu.dot_dimension_numbers<[1], [0], [0], [1], [0, 0, 1, 1], [], []>} : vector<4x32xf32>, vector<32x96xf32>, vector<4x96xf32> -> vector<4x96xf32>
    %662 = vector.broadcast %14 : vector<1x96xf32> to vector<4x96xf32>
    %663 = arith.addf %661, %662 : vector<4x96xf32>
    %664 = vector.extract_strided_slice %663 {offsets = [0, 0], sizes = [4, 32], strides = [1, 1]} : vector<4x96xf32> to vector<4x32xf32>
    %665 = arith.negf %664 : vector<4x32xf32>
    %666 = math.exp %665 : vector<4x32xf32>
    %cst_203 = arith.constant 1.000000e+00 : f32
    %667 = vector.broadcast %cst_203 : f32 to vector<4x32xf32>
    %668 = arith.addf %667, %666 : vector<4x32xf32>
    %669 = arith.divf %667, %668 : vector<4x32xf32>
    %670 = vector.extract_strided_slice %663 {offsets = [0, 32], sizes = [4, 32], strides = [1, 1]} : vector<4x96xf32> to vector<4x32xf32>
    %671 = math.tanh %670 : vector<4x32xf32>
    %672 = arith.mulf %669, %671 : vector<4x32xf32>
    %673 = vector.extract_strided_slice %663 {offsets = [0, 64], sizes = [4, 32], strides = [1, 1]} : vector<4x96xf32> to vector<4x32xf32>
    %674 = arith.negf %673 : vector<4x32xf32>
    %675 = math.exp %674 : vector<4x32xf32>
    %cst_204 = arith.constant 1.000000e+00 : f32
    %676 = vector.broadcast %cst_204 : f32 to vector<4x32xf32>
    %677 = arith.addf %676, %675 : vector<4x32xf32>
    %678 = arith.divf %676, %677 : vector<4x32xf32>
    %679 = math.tanh %672 : vector<4x32xf32>
    %680 = arith.mulf %678, %679 : vector<4x32xf32>
    %cst_205 = arith.constant dense<0.000000e+00> : vector<4x16xf32>
    %681 = tpu.matmul %637, %6, %cst_205 {dimension_numbers = #tpu.dot_dimension_numbers<[1], [0], [0], [1], [0, 0, 1, 1], [], []>} : vector<4x9xf32>, vector<9x16xf32>, vector<4x16xf32> -> vector<4x16xf32>
    %cst_206 = arith.constant dense<0.000000e+00> : vector<4x16xf32>
    %682 = tpu.matmul %680, %7, %cst_206 {dimension_numbers = #tpu.dot_dimension_numbers<[1], [0], [0], [1], [0, 0, 1, 1], [], []>} : vector<4x32xf32>, vector<32x16xf32>, vector<4x16xf32> -> vector<4x16xf32>
    %683 = arith.addf %681, %682 : vector<4x16xf32>
    %684 = vector.broadcast %15 : vector<1x16xf32> to vector<4x16xf32>
    %685 = arith.addf %683, %684 : vector<4x16xf32>
    %cst_207 = arith.constant 0.000000e+00 : f32
    %686 = vector.broadcast %cst_207 : f32 to vector<4x16xf32>
    %687 = arith.maximumf %685, %686 : vector<4x16xf32>
    %cst_208 = arith.constant dense<0.000000e+00> : vector<4x9xf32>
    %688 = tpu.matmul %687, %8, %cst_208 {dimension_numbers = #tpu.dot_dimension_numbers<[1], [0], [0], [1], [0, 0, 1, 1], [], []>} : vector<4x16xf32>, vector<16x9xf32>, vector<4x9xf32> -> vector<4x9xf32>
    %689 = vector.broadcast %16 : vector<1x9xf32> to vector<4x9xf32>
    %690 = arith.addf %688, %689 : vector<4x9xf32>
    %cst_209 = arith.constant 0.000000e+00 : f32
    %691 = vector.broadcast %cst_209 : f32 to vector<4x9xf32>
    %692 = arith.maximumf %690, %691 : vector<4x9xf32>
    %693 = vector.broadcast %17 : vector<1x9xf32> to vector<4x9xf32>
    %694 = arith.mulf %692, %693 : vector<4x9xf32>
    %695 = vector.broadcast %18 : vector<1x9xf32> to vector<4x9xf32>
    %696 = arith.addf %694, %695 : vector<4x9xf32>
    %c8_210 = arith.constant 8 : index
    %c0_211 = arith.constant 0 : index
    %c0_212 = arith.constant 0 : index
    %697 = vector.load %arg5[%c8_210, %c0_211, %c0_212] : memref<12x4x9xf32, #tpu.memory_space<vmem>>, vector<1x4x9xf32>
    %698 = vector.shape_cast %697 : vector<1x4x9xf32> to vector<4x9xf32>
    %699 = vector.shape_cast %696 : vector<4x9xf32> to vector<1x4x9xf32>
    tpu.vector_store %arg5[%c8_210, %c0_211, %c0_212], %699 {strides = array<i32>} : memref<12x4x9xf32, #tpu.memory_space<vmem>>, vector<1x4x9xf32>,
    %cst_213 = arith.constant dense<0xFF800000> : vector<4xf32>
    %700 = vector.multi_reduction <maximumf>, %696, %cst_213 [1] : vector<4x9xf32> to vector<4xf32>
    %701 = vector.shape_cast %700 : vector<4xf32> to vector<4x1xf32>
    %702 = tpu.iota {dimensions = array<i32: 1>} : vector<4x9xi32>
    %703 = vector.broadcast %701 : vector<4x1xf32> to vector<4x9xf32>
    %704 = arith.cmpf oeq, %696, %703 : vector<4x9xf32>
    %c9_i32_214 = arith.constant 9 : i32
    %705 = vector.broadcast %c9_i32_214 : i32 to vector<4x9xi32>
    %706 = arith.select %704, %702, %705 : vector<4x9xi1>, vector<4x9xi32>
    %cst_215 = arith.constant dense<2147483647> : vector<4xi32>
    %707 = vector.multi_reduction <minsi>, %706, %cst_215 [1] : vector<4x9xi32> to vector<4xi32>
    %708 = vector.shape_cast %707 : vector<4xi32> to vector<4x1xi32>
    %709 = vector.broadcast %708 : vector<4x1xi32> to vector<4x9xi32>
    %710 = arith.cmpi eq, %702, %709 : vector<4x9xi32>
    %711 = arith.extui %710 : vector<4x9xi1> to vector<4x9xi32>
    %712 = arith.sitofp %711 : vector<4x9xi32> to vector<4x9xf32>
    %c9_216 = arith.constant 9 : index
    %c0_217 = arith.constant 0 : index
    %c0_218 = arith.constant 0 : index
    %713 = vector.load %arg2[%c9_216, %c0_217, %c0_218] : memref<12x4x7xf32, #tpu.memory_space<vmem>>, vector<1x4x7xf32>
    %714 = vector.shape_cast %713 : vector<1x4x7xf32> to vector<4x7xf32>
    %cst_219 = arith.constant dense<0.000000e+00> : vector<4x96xf32>
    %715 = tpu.matmul %712, %3, %cst_219 {dimension_numbers = #tpu.dot_dimension_numbers<[1], [0], [0], [1], [0, 0, 1, 1], [], []>} : vector<4x9xf32>, vector<9x96xf32>, vector<4x96xf32> -> vector<4x96xf32>
    %cst_220 = arith.constant dense<0.000000e+00> : vector<4x96xf32>
    %716 = tpu.matmul %714, %4, %cst_220 {dimension_numbers = #tpu.dot_dimension_numbers<[1], [0], [0], [1], [0, 0, 1, 1], [], []>} : vector<4x7xf32>, vector<7x96xf32>, vector<4x96xf32> -> vector<4x96xf32>
    %717 = arith.addf %715, %716 : vector<4x96xf32>
    %718 = arith.addf %717, %36 : vector<4x96xf32>
    %719 = vector.extract_strided_slice %718 {offsets = [0, 0], sizes = [4, 32], strides = [1, 1]} : vector<4x96xf32> to vector<4x32xf32>
    %720 = arith.negf %719 : vector<4x32xf32>
    %721 = math.exp %720 : vector<4x32xf32>
    %cst_221 = arith.constant 1.000000e+00 : f32
    %722 = vector.broadcast %cst_221 : f32 to vector<4x32xf32>
    %723 = arith.addf %722, %721 : vector<4x32xf32>
    %724 = arith.divf %722, %723 : vector<4x32xf32>
    %725 = vector.extract_strided_slice %718 {offsets = [0, 32], sizes = [4, 32], strides = [1, 1]} : vector<4x96xf32> to vector<4x32xf32>
    %726 = math.tanh %725 : vector<4x32xf32>
    %727 = arith.mulf %724, %726 : vector<4x32xf32>
    %728 = vector.extract_strided_slice %718 {offsets = [0, 64], sizes = [4, 32], strides = [1, 1]} : vector<4x96xf32> to vector<4x32xf32>
    %729 = arith.negf %728 : vector<4x32xf32>
    %730 = math.exp %729 : vector<4x32xf32>
    %cst_222 = arith.constant 1.000000e+00 : f32
    %731 = vector.broadcast %cst_222 : f32 to vector<4x32xf32>
    %732 = arith.addf %731, %730 : vector<4x32xf32>
    %733 = arith.divf %731, %732 : vector<4x32xf32>
    %734 = math.tanh %727 : vector<4x32xf32>
    %735 = arith.mulf %733, %734 : vector<4x32xf32>
    %cst_223 = arith.constant dense<0.000000e+00> : vector<4x96xf32>
    %736 = tpu.matmul %735, %5, %cst_223 {dimension_numbers = #tpu.dot_dimension_numbers<[1], [0], [0], [1], [0, 0, 1, 1], [], []>} : vector<4x32xf32>, vector<32x96xf32>, vector<4x96xf32> -> vector<4x96xf32>
    %737 = vector.broadcast %14 : vector<1x96xf32> to vector<4x96xf32>
    %738 = arith.addf %736, %737 : vector<4x96xf32>
    %739 = vector.extract_strided_slice %738 {offsets = [0, 0], sizes = [4, 32], strides = [1, 1]} : vector<4x96xf32> to vector<4x32xf32>
    %740 = arith.negf %739 : vector<4x32xf32>
    %741 = math.exp %740 : vector<4x32xf32>
    %cst_224 = arith.constant 1.000000e+00 : f32
    %742 = vector.broadcast %cst_224 : f32 to vector<4x32xf32>
    %743 = arith.addf %742, %741 : vector<4x32xf32>
    %744 = arith.divf %742, %743 : vector<4x32xf32>
    %745 = vector.extract_strided_slice %738 {offsets = [0, 32], sizes = [4, 32], strides = [1, 1]} : vector<4x96xf32> to vector<4x32xf32>
    %746 = math.tanh %745 : vector<4x32xf32>
    %747 = arith.mulf %744, %746 : vector<4x32xf32>
    %748 = vector.extract_strided_slice %738 {offsets = [0, 64], sizes = [4, 32], strides = [1, 1]} : vector<4x96xf32> to vector<4x32xf32>
    %749 = arith.negf %748 : vector<4x32xf32>
    %750 = math.exp %749 : vector<4x32xf32>
    %cst_225 = arith.constant 1.000000e+00 : f32
    %751 = vector.broadcast %cst_225 : f32 to vector<4x32xf32>
    %752 = arith.addf %751, %750 : vector<4x32xf32>
    %753 = arith.divf %751, %752 : vector<4x32xf32>
    %754 = math.tanh %747 : vector<4x32xf32>
    %755 = arith.mulf %753, %754 : vector<4x32xf32>
    %cst_226 = arith.constant dense<0.000000e+00> : vector<4x16xf32>
    %756 = tpu.matmul %712, %6, %cst_226 {dimension_numbers = #tpu.dot_dimension_numbers<[1], [0], [0], [1], [0, 0, 1, 1], [], []>} : vector<4x9xf32>, vector<9x16xf32>, vector<4x16xf32> -> vector<4x16xf32>
    %cst_227 = arith.constant dense<0.000000e+00> : vector<4x16xf32>
    %757 = tpu.matmul %755, %7, %cst_227 {dimension_numbers = #tpu.dot_dimension_numbers<[1], [0], [0], [1], [0, 0, 1, 1], [], []>} : vector<4x32xf32>, vector<32x16xf32>, vector<4x16xf32> -> vector<4x16xf32>
    %758 = arith.addf %756, %757 : vector<4x16xf32>
    %759 = vector.broadcast %15 : vector<1x16xf32> to vector<4x16xf32>
    %760 = arith.addf %758, %759 : vector<4x16xf32>
    %cst_228 = arith.constant 0.000000e+00 : f32
    %761 = vector.broadcast %cst_228 : f32 to vector<4x16xf32>
    %762 = arith.maximumf %760, %761 : vector<4x16xf32>
    %cst_229 = arith.constant dense<0.000000e+00> : vector<4x9xf32>
    %763 = tpu.matmul %762, %8, %cst_229 {dimension_numbers = #tpu.dot_dimension_numbers<[1], [0], [0], [1], [0, 0, 1, 1], [], []>} : vector<4x16xf32>, vector<16x9xf32>, vector<4x9xf32> -> vector<4x9xf32>
    %764 = vector.broadcast %16 : vector<1x9xf32> to vector<4x9xf32>
    %765 = arith.addf %763, %764 : vector<4x9xf32>
    %cst_230 = arith.constant 0.000000e+00 : f32
    %766 = vector.broadcast %cst_230 : f32 to vector<4x9xf32>
    %767 = arith.maximumf %765, %766 : vector<4x9xf32>
    %768 = vector.broadcast %17 : vector<1x9xf32> to vector<4x9xf32>
    %769 = arith.mulf %767, %768 : vector<4x9xf32>
    %770 = vector.broadcast %18 : vector<1x9xf32> to vector<4x9xf32>
    %771 = arith.addf %769, %770 : vector<4x9xf32>
    %c9_231 = arith.constant 9 : index
    %c0_232 = arith.constant 0 : index
    %c0_233 = arith.constant 0 : index
    %772 = vector.load %arg5[%c9_231, %c0_232, %c0_233] : memref<12x4x9xf32, #tpu.memory_space<vmem>>, vector<1x4x9xf32>
    %773 = vector.shape_cast %772 : vector<1x4x9xf32> to vector<4x9xf32>
    %774 = vector.shape_cast %771 : vector<4x9xf32> to vector<1x4x9xf32>
    tpu.vector_store %arg5[%c9_231, %c0_232, %c0_233], %774 {strides = array<i32>} : memref<12x4x9xf32, #tpu.memory_space<vmem>>, vector<1x4x9xf32>,
    %cst_234 = arith.constant dense<0xFF800000> : vector<4xf32>
    %775 = vector.multi_reduction <maximumf>, %771, %cst_234 [1] : vector<4x9xf32> to vector<4xf32>
    %776 = vector.shape_cast %775 : vector<4xf32> to vector<4x1xf32>
    %777 = tpu.iota {dimensions = array<i32: 1>} : vector<4x9xi32>
    %778 = vector.broadcast %776 : vector<4x1xf32> to vector<4x9xf32>
    %779 = arith.cmpf oeq, %771, %778 : vector<4x9xf32>
    %c9_i32_235 = arith.constant 9 : i32
    %780 = vector.broadcast %c9_i32_235 : i32 to vector<4x9xi32>
    %781 = arith.select %779, %777, %780 : vector<4x9xi1>, vector<4x9xi32>
    %cst_236 = arith.constant dense<2147483647> : vector<4xi32>
    %782 = vector.multi_reduction <minsi>, %781, %cst_236 [1] : vector<4x9xi32> to vector<4xi32>
    %783 = vector.shape_cast %782 : vector<4xi32> to vector<4x1xi32>
    %784 = vector.broadcast %783 : vector<4x1xi32> to vector<4x9xi32>
    %785 = arith.cmpi eq, %777, %784 : vector<4x9xi32>
    %786 = arith.extui %785 : vector<4x9xi1> to vector<4x9xi32>
    %787 = arith.sitofp %786 : vector<4x9xi32> to vector<4x9xf32>
    %c10 = arith.constant 10 : index
    %c0_237 = arith.constant 0 : index
    %c0_238 = arith.constant 0 : index
    %788 = vector.load %arg2[%c10, %c0_237, %c0_238] : memref<12x4x7xf32, #tpu.memory_space<vmem>>, vector<1x4x7xf32>
    %789 = vector.shape_cast %788 : vector<1x4x7xf32> to vector<4x7xf32>
    %cst_239 = arith.constant dense<0.000000e+00> : vector<4x96xf32>
    %790 = tpu.matmul %787, %3, %cst_239 {dimension_numbers = #tpu.dot_dimension_numbers<[1], [0], [0], [1], [0, 0, 1, 1], [], []>} : vector<4x9xf32>, vector<9x96xf32>, vector<4x96xf32> -> vector<4x96xf32>
    %cst_240 = arith.constant dense<0.000000e+00> : vector<4x96xf32>
    %791 = tpu.matmul %789, %4, %cst_240 {dimension_numbers = #tpu.dot_dimension_numbers<[1], [0], [0], [1], [0, 0, 1, 1], [], []>} : vector<4x7xf32>, vector<7x96xf32>, vector<4x96xf32> -> vector<4x96xf32>
    %792 = arith.addf %790, %791 : vector<4x96xf32>
    %793 = arith.addf %792, %36 : vector<4x96xf32>
    %794 = vector.extract_strided_slice %793 {offsets = [0, 0], sizes = [4, 32], strides = [1, 1]} : vector<4x96xf32> to vector<4x32xf32>
    %795 = arith.negf %794 : vector<4x32xf32>
    %796 = math.exp %795 : vector<4x32xf32>
    %cst_241 = arith.constant 1.000000e+00 : f32
    %797 = vector.broadcast %cst_241 : f32 to vector<4x32xf32>
    %798 = arith.addf %797, %796 : vector<4x32xf32>
    %799 = arith.divf %797, %798 : vector<4x32xf32>
    %800 = vector.extract_strided_slice %793 {offsets = [0, 32], sizes = [4, 32], strides = [1, 1]} : vector<4x96xf32> to vector<4x32xf32>
    %801 = math.tanh %800 : vector<4x32xf32>
    %802 = arith.mulf %799, %801 : vector<4x32xf32>
    %803 = vector.extract_strided_slice %793 {offsets = [0, 64], sizes = [4, 32], strides = [1, 1]} : vector<4x96xf32> to vector<4x32xf32>
    %804 = arith.negf %803 : vector<4x32xf32>
    %805 = math.exp %804 : vector<4x32xf32>
    %cst_242 = arith.constant 1.000000e+00 : f32
    %806 = vector.broadcast %cst_242 : f32 to vector<4x32xf32>
    %807 = arith.addf %806, %805 : vector<4x32xf32>
    %808 = arith.divf %806, %807 : vector<4x32xf32>
    %809 = math.tanh %802 : vector<4x32xf32>
    %810 = arith.mulf %808, %809 : vector<4x32xf32>
    %cst_243 = arith.constant dense<0.000000e+00> : vector<4x96xf32>
    %811 = tpu.matmul %810, %5, %cst_243 {dimension_numbers = #tpu.dot_dimension_numbers<[1], [0], [0], [1], [0, 0, 1, 1], [], []>} : vector<4x32xf32>, vector<32x96xf32>, vector<4x96xf32> -> vector<4x96xf32>
    %812 = vector.broadcast %14 : vector<1x96xf32> to vector<4x96xf32>
    %813 = arith.addf %811, %812 : vector<4x96xf32>
    %814 = vector.extract_strided_slice %813 {offsets = [0, 0], sizes = [4, 32], strides = [1, 1]} : vector<4x96xf32> to vector<4x32xf32>
    %815 = arith.negf %814 : vector<4x32xf32>
    %816 = math.exp %815 : vector<4x32xf32>
    %cst_244 = arith.constant 1.000000e+00 : f32
    %817 = vector.broadcast %cst_244 : f32 to vector<4x32xf32>
    %818 = arith.addf %817, %816 : vector<4x32xf32>
    %819 = arith.divf %817, %818 : vector<4x32xf32>
    %820 = vector.extract_strided_slice %813 {offsets = [0, 32], sizes = [4, 32], strides = [1, 1]} : vector<4x96xf32> to vector<4x32xf32>
    %821 = math.tanh %820 : vector<4x32xf32>
    %822 = arith.mulf %819, %821 : vector<4x32xf32>
    %823 = vector.extract_strided_slice %813 {offsets = [0, 64], sizes = [4, 32], strides = [1, 1]} : vector<4x96xf32> to vector<4x32xf32>
    %824 = arith.negf %823 : vector<4x32xf32>
    %825 = math.exp %824 : vector<4x32xf32>
    %cst_245 = arith.constant 1.000000e+00 : f32
    %826 = vector.broadcast %cst_245 : f32 to vector<4x32xf32>
    %827 = arith.addf %826, %825 : vector<4x32xf32>
    %828 = arith.divf %826, %827 : vector<4x32xf32>
    %829 = math.tanh %822 : vector<4x32xf32>
    %830 = arith.mulf %828, %829 : vector<4x32xf32>
    %cst_246 = arith.constant dense<0.000000e+00> : vector<4x16xf32>
    %831 = tpu.matmul %787, %6, %cst_246 {dimension_numbers = #tpu.dot_dimension_numbers<[1], [0], [0], [1], [0, 0, 1, 1], [], []>} : vector<4x9xf32>, vector<9x16xf32>, vector<4x16xf32> -> vector<4x16xf32>
    %cst_247 = arith.constant dense<0.000000e+00> : vector<4x16xf32>
    %832 = tpu.matmul %830, %7, %cst_247 {dimension_numbers = #tpu.dot_dimension_numbers<[1], [0], [0], [1], [0, 0, 1, 1], [], []>} : vector<4x32xf32>, vector<32x16xf32>, vector<4x16xf32> -> vector<4x16xf32>
    %833 = arith.addf %831, %832 : vector<4x16xf32>
    %834 = vector.broadcast %15 : vector<1x16xf32> to vector<4x16xf32>
    %835 = arith.addf %833, %834 : vector<4x16xf32>
    %cst_248 = arith.constant 0.000000e+00 : f32
    %836 = vector.broadcast %cst_248 : f32 to vector<4x16xf32>
    %837 = arith.maximumf %835, %836 : vector<4x16xf32>
    %cst_249 = arith.constant dense<0.000000e+00> : vector<4x9xf32>
    %838 = tpu.matmul %837, %8, %cst_249 {dimension_numbers = #tpu.dot_dimension_numbers<[1], [0], [0], [1], [0, 0, 1, 1], [], []>} : vector<4x16xf32>, vector<16x9xf32>, vector<4x9xf32> -> vector<4x9xf32>
    %839 = vector.broadcast %16 : vector<1x9xf32> to vector<4x9xf32>
    %840 = arith.addf %838, %839 : vector<4x9xf32>
    %cst_250 = arith.constant 0.000000e+00 : f32
    %841 = vector.broadcast %cst_250 : f32 to vector<4x9xf32>
    %842 = arith.maximumf %840, %841 : vector<4x9xf32>
    %843 = vector.broadcast %17 : vector<1x9xf32> to vector<4x9xf32>
    %844 = arith.mulf %842, %843 : vector<4x9xf32>
    %845 = vector.broadcast %18 : vector<1x9xf32> to vector<4x9xf32>
    %846 = arith.addf %844, %845 : vector<4x9xf32>
    %c10_251 = arith.constant 10 : index
    %c0_252 = arith.constant 0 : index
    %c0_253 = arith.constant 0 : index
    %847 = vector.load %arg5[%c10_251, %c0_252, %c0_253] : memref<12x4x9xf32, #tpu.memory_space<vmem>>, vector<1x4x9xf32>
    %848 = vector.shape_cast %847 : vector<1x4x9xf32> to vector<4x9xf32>
    %849 = vector.shape_cast %846 : vector<4x9xf32> to vector<1x4x9xf32>
    tpu.vector_store %arg5[%c10_251, %c0_252, %c0_253], %849 {strides = array<i32>} : memref<12x4x9xf32, #tpu.memory_space<vmem>>, vector<1x4x9xf32>,
    %cst_254 = arith.constant dense<0xFF800000> : vector<4xf32>
    %850 = vector.multi_reduction <maximumf>, %846, %cst_254 [1] : vector<4x9xf32> to vector<4xf32>
    %851 = vector.shape_cast %850 : vector<4xf32> to vector<4x1xf32>
    %852 = tpu.iota {dimensions = array<i32: 1>} : vector<4x9xi32>
    %853 = vector.broadcast %851 : vector<4x1xf32> to vector<4x9xf32>
    %854 = arith.cmpf oeq, %846, %853 : vector<4x9xf32>
    %c9_i32_255 = arith.constant 9 : i32
    %855 = vector.broadcast %c9_i32_255 : i32 to vector<4x9xi32>
    %856 = arith.select %854, %852, %855 : vector<4x9xi1>, vector<4x9xi32>
    %cst_256 = arith.constant dense<2147483647> : vector<4xi32>
    %857 = vector.multi_reduction <minsi>, %856, %cst_256 [1] : vector<4x9xi32> to vector<4xi32>
    %858 = vector.shape_cast %857 : vector<4xi32> to vector<4x1xi32>
    %859 = vector.broadcast %858 : vector<4x1xi32> to vector<4x9xi32>
    %860 = arith.cmpi eq, %852, %859 : vector<4x9xi32>
    %861 = arith.extui %860 : vector<4x9xi1> to vector<4x9xi32>
    %862 = arith.sitofp %861 : vector<4x9xi32> to vector<4x9xf32>
    %c11 = arith.constant 11 : index
    %c0_257 = arith.constant 0 : index
    %c0_258 = arith.constant 0 : index
    %863 = vector.load %arg2[%c11, %c0_257, %c0_258] : memref<12x4x7xf32, #tpu.memory_space<vmem>>, vector<1x4x7xf32>
    %864 = vector.shape_cast %863 : vector<1x4x7xf32> to vector<4x7xf32>
    %cst_259 = arith.constant dense<0.000000e+00> : vector<4x96xf32>
    %865 = tpu.matmul %862, %3, %cst_259 {dimension_numbers = #tpu.dot_dimension_numbers<[1], [0], [0], [1], [0, 0, 1, 1], [], []>} : vector<4x9xf32>, vector<9x96xf32>, vector<4x96xf32> -> vector<4x96xf32>
    %cst_260 = arith.constant dense<0.000000e+00> : vector<4x96xf32>
    %866 = tpu.matmul %864, %4, %cst_260 {dimension_numbers = #tpu.dot_dimension_numbers<[1], [0], [0], [1], [0, 0, 1, 1], [], []>} : vector<4x7xf32>, vector<7x96xf32>, vector<4x96xf32> -> vector<4x96xf32>
    %867 = arith.addf %865, %866 : vector<4x96xf32>
    %868 = arith.addf %867, %36 : vector<4x96xf32>
    %869 = vector.extract_strided_slice %868 {offsets = [0, 0], sizes = [4, 32], strides = [1, 1]} : vector<4x96xf32> to vector<4x32xf32>
    %870 = arith.negf %869 : vector<4x32xf32>
    %871 = math.exp %870 : vector<4x32xf32>
    %cst_261 = arith.constant 1.000000e+00 : f32
    %872 = vector.broadcast %cst_261 : f32 to vector<4x32xf32>
    %873 = arith.addf %872, %871 : vector<4x32xf32>
    %874 = arith.divf %872, %873 : vector<4x32xf32>
    %875 = vector.extract_strided_slice %868 {offsets = [0, 32], sizes = [4, 32], strides = [1, 1]} : vector<4x96xf32> to vector<4x32xf32>
    %876 = math.tanh %875 : vector<4x32xf32>
    %877 = arith.mulf %874, %876 : vector<4x32xf32>
    %878 = vector.extract_strided_slice %868 {offsets = [0, 64], sizes = [4, 32], strides = [1, 1]} : vector<4x96xf32> to vector<4x32xf32>
    %879 = arith.negf %878 : vector<4x32xf32>
    %880 = math.exp %879 : vector<4x32xf32>
    %cst_262 = arith.constant 1.000000e+00 : f32
    %881 = vector.broadcast %cst_262 : f32 to vector<4x32xf32>
    %882 = arith.addf %881, %880 : vector<4x32xf32>
    %883 = arith.divf %881, %882 : vector<4x32xf32>
    %884 = math.tanh %877 : vector<4x32xf32>
    %885 = arith.mulf %883, %884 : vector<4x32xf32>
    %cst_263 = arith.constant dense<0.000000e+00> : vector<4x96xf32>
    %886 = tpu.matmul %885, %5, %cst_263 {dimension_numbers = #tpu.dot_dimension_numbers<[1], [0], [0], [1], [0, 0, 1, 1], [], []>} : vector<4x32xf32>, vector<32x96xf32>, vector<4x96xf32> -> vector<4x96xf32>
    %887 = vector.broadcast %14 : vector<1x96xf32> to vector<4x96xf32>
    %888 = arith.addf %886, %887 : vector<4x96xf32>
    %889 = vector.extract_strided_slice %888 {offsets = [0, 0], sizes = [4, 32], strides = [1, 1]} : vector<4x96xf32> to vector<4x32xf32>
    %890 = arith.negf %889 : vector<4x32xf32>
    %891 = math.exp %890 : vector<4x32xf32>
    %cst_264 = arith.constant 1.000000e+00 : f32
    %892 = vector.broadcast %cst_264 : f32 to vector<4x32xf32>
    %893 = arith.addf %892, %891 : vector<4x32xf32>
    %894 = arith.divf %892, %893 : vector<4x32xf32>
    %895 = vector.extract_strided_slice %888 {offsets = [0, 32], sizes = [4, 32], strides = [1, 1]} : vector<4x96xf32> to vector<4x32xf32>
    %896 = math.tanh %895 : vector<4x32xf32>
    %897 = arith.mulf %894, %896 : vector<4x32xf32>
    %898 = vector.extract_strided_slice %888 {offsets = [0, 64], sizes = [4, 32], strides = [1, 1]} : vector<4x96xf32> to vector<4x32xf32>
    %899 = arith.negf %898 : vector<4x32xf32>
    %900 = math.exp %899 : vector<4x32xf32>
    %cst_265 = arith.constant 1.000000e+00 : f32
    %901 = vector.broadcast %cst_265 : f32 to vector<4x32xf32>
    %902 = arith.addf %901, %900 : vector<4x32xf32>
    %903 = arith.divf %901, %902 : vector<4x32xf32>
    %904 = math.tanh %897 : vector<4x32xf32>
    %905 = arith.mulf %903, %904 : vector<4x32xf32>
    %cst_266 = arith.constant dense<0.000000e+00> : vector<4x16xf32>
    %906 = tpu.matmul %862, %6, %cst_266 {dimension_numbers = #tpu.dot_dimension_numbers<[1], [0], [0], [1], [0, 0, 1, 1], [], []>} : vector<4x9xf32>, vector<9x16xf32>, vector<4x16xf32> -> vector<4x16xf32>
    %cst_267 = arith.constant dense<0.000000e+00> : vector<4x16xf32>
    %907 = tpu.matmul %905, %7, %cst_267 {dimension_numbers = #tpu.dot_dimension_numbers<[1], [0], [0], [1], [0, 0, 1, 1], [], []>} : vector<4x32xf32>, vector<32x16xf32>, vector<4x16xf32> -> vector<4x16xf32>
    %908 = arith.addf %906, %907 : vector<4x16xf32>
    %909 = vector.broadcast %15 : vector<1x16xf32> to vector<4x16xf32>
    %910 = arith.addf %908, %909 : vector<4x16xf32>
    %cst_268 = arith.constant 0.000000e+00 : f32
    %911 = vector.broadcast %cst_268 : f32 to vector<4x16xf32>
    %912 = arith.maximumf %910, %911 : vector<4x16xf32>
    %cst_269 = arith.constant dense<0.000000e+00> : vector<4x9xf32>
    %913 = tpu.matmul %912, %8, %cst_269 {dimension_numbers = #tpu.dot_dimension_numbers<[1], [0], [0], [1], [0, 0, 1, 1], [], []>} : vector<4x16xf32>, vector<16x9xf32>, vector<4x9xf32> -> vector<4x9xf32>
    %914 = vector.broadcast %16 : vector<1x9xf32> to vector<4x9xf32>
    %915 = arith.addf %913, %914 : vector<4x9xf32>
    %cst_270 = arith.constant 0.000000e+00 : f32
    %916 = vector.broadcast %cst_270 : f32 to vector<4x9xf32>
    %917 = arith.maximumf %915, %916 : vector<4x9xf32>
    %918 = vector.broadcast %17 : vector<1x9xf32> to vector<4x9xf32>
    %919 = arith.mulf %917, %918 : vector<4x9xf32>
    %920 = vector.broadcast %18 : vector<1x9xf32> to vector<4x9xf32>
    %921 = arith.addf %919, %920 : vector<4x9xf32>
    %c11_271 = arith.constant 11 : index
    %c0_272 = arith.constant 0 : index
    %c0_273 = arith.constant 0 : index
    %922 = vector.load %arg5[%c11_271, %c0_272, %c0_273] : memref<12x4x9xf32, #tpu.memory_space<vmem>>, vector<1x4x9xf32>
    %923 = vector.shape_cast %922 : vector<1x4x9xf32> to vector<4x9xf32>
    %924 = vector.shape_cast %921 : vector<4x9xf32> to vector<1x4x9xf32>
    tpu.vector_store %arg5[%c11_271, %c0_272, %c0_273], %924 {strides = array<i32>} : memref<12x4x9xf32, #tpu.memory_space<vmem>>, vector<1x4x9xf32>,
    return
  }
}

</mosaic_0001>

<bundles_post_ra>
// kernel: macro_mort_decoder.1
= control target key start
LH: loop header
LB: loop body
LE: loop exit
PB: predicated region body
PF: predicated region fallthrough
CT: control target
= control target key end

     0   :  { %10 = vsyncpa [#allocation3], 0  ;;  %s7734_s18 = smov [#allocation2]   ;;  %s8880_s0 = inlined_call_operand.vmem [shape: f32[4,16], index: 0, kind: input, shape index: {}]   ;;  %s8881_s1 = inlined_call_operand.vmem [shape: f32[4,9], index: 1, kind: input, shape index: {}]   ;;  %s8882_s2 = inlined_call_operand.vmem [shape: f32[12,4,7], index: 2, kind: input, shape index: {}]   ;;  %s8883_s3 = inlined_call_operand.hbm [shape: f32[192,128], index: 3, kind: input, shape index: {}]   ;;  %s8884_s4 = inlined_call_operand.vmem [shape: f32[16,128], index: 4, kind: input, shape index: {}]   ;;  %s8885_s5 = inlined_call_operand.vmem [shape: f32[12,4,9], index: 5, kind: output, shape index: {}]  }
   0x1   :  { %s22_s19 = sshll.u32 %s7734_s18, 4  ;;  %s23_s19 = int_to_ptr.vmem [resolvable:$true] %s22_s19 }
   0x2   :  { %s7720_s20 = scalar_lea.vmem %s23_s19, 3072  ;;  %p7725_p1 = scmp.lt.s32.totalorder %s23_s19, %s23_s19 }
   0x3   :  { %p7721_p0 = scmp.ne.s32.totalorder %s23_s19, %s7720_s20  ;;  %p7726_p2 = scmp.lt.s32.totalorder %s7720_s20, %s7720_s20 }
   0x5   :  { %p7727_p3 = por %p7726_p2, %p7725_p1 }
   0x7   :  { %p7728_p4 = pnand %p7727_p3, %p7721_p0 }
   0x9   :  { %7731 = shalt.err (!%p7728_p4)
}
   0xa   :  { %s7735_s21 = smov 128   ;;  %s7736_s22 = smov 8  }
   0xb   :  { %28 = dma.hbm_to_vmem [thread:$0]  %s8883_s3, 3072, %s23_s19, [#allocation3], %s7735_s21, %s7735_s21, %s7736_s22  }
   0xc   :  { %7732 = dma.done.wait [#allocation3], 3072  }
   0xd   :  { %7733 = vsyncadd [#allocation3], 4294964224  ;;  %v7737_v0 = vmov 0.0   ;;  %vm7738_vm0 = vmmov 0   ;;  %v35_v1 = vld [vmem:[#allocation2 + $0x8] sm:$0xff]  ;;  %v34_v2 = vld [vmem:[#allocation2] sm:$0xff] }
   0xe   :  { %6870 = vmatprep.subr.mxu0 %v7737_v0  ;;  %6874 = vmatprep.mubr.msk.f32.mxu0 %vm7738_vm0, %v7737_v0  ;;  %v68_v3 = vld [vmem:[%s8880_s0] sm:$0xf]  ;;  %vm73_vm1 = vcmask 130048   ;;  %v39_v4 = vld [vmem:[#allocation2 + $0x28] sm:$0xff]  ;;  %v37_v6 = vld [vmem:[#allocation2 + $0x18] sm:$0xff]  ;;  %vm152_vm2 = vcmask 261120  }
   0xf   :  { %6877 = vmatprep.subr.mxu1 %v7737_v0  ;;  %6885 = vmatprep.mubr.msk.f32.mxu1 %vm7738_vm0, %v7737_v0  ;;  %v38_v5 = vld [vmem:[#allocation2 + $0x20] sm:$0xff]  ;;  %v36_v7 = vld [vmem:[#allocation2 + $0x10] sm:$0xff]  ;;  %v41_v14 = vld [vmem:[#allocation2 + $0x38] sm:$0xff]  ;;  %vm321_vm3 = vcmask 1046528   ;;  %vm317_vm4 = vcmask 56320   ;;  %vm241_vm5 = vcmask 195584  }
  0x10   :  { %6871 = vmatpush3.msra.mxu0 %v35_v1  ;;  %6878 = vmatpush3.msra.mxu1 %v39_v4  ;;  %v6428_v8 = vld [vmem:[%s8884_s4] ss:$0 sm:$0xff]  ;;  %v40_v15 = vld [vmem:[#allocation2 + $0x30] sm:$0xff]  ;;  %v7801_v16 = vld [vmem:[#allocation2 + $0x58] sm:$0x7f]  ;;  %vm399_vm6 = vcmask 1040384  }
  0x11   :  { %6872 = vmatprep.subr.mxu0 %v7737_v0  ;;  %6879 = vmatprep.subr.mxu1 %v7737_v0  ;;  %v42_v13 = vld [vmem:[#allocation2 + $0x40] sm:$0xff]  ;;  %v7821_v27 = vld [vmem:[#allocation2 + $0x50] sm:$0x1]  ;;  %v7823_v28 = vld [vmem:[#allocation2 + $0x48] sm:$0xff]  ;;  %vm395_vm7 = vcmask 72704   ;;  %s7740_s14 = smov 64  }
  0x12   :  { %6873 = vmatpush3.msra.mxu0 %v34_v2  ;;  %6880 = vmatpush3.msra.mxu1 %v38_v5  ;;  %v316_v17 = vld [vmem:[%s8882_s2] sm:$0xf]  ;;  %v6434_v33 = vld [vmem:[%s8884_s4 + $0x4] ss:$0 sm:$0xff]  ;;  %v7848_v47 = vld [vmem:[#allocation2 + $0x78] sm:$0xff]  ;;  %vm831_vm8 = vcmask 68608  }
  0x13   :  { %6875 = vmatmul.mubr.msk.f32.vlgmr.msra.gmra.mxu0 %vm73_vm1, %v68_v3  ;;  %6888 = vmatprep.subr.mxu0 %v7737_v0  ;;  %v6430_v18 = vld [vmem:[%s8884_s4 + $0x1] ss:$0 sm:$0xff]  ;;  %v6432_v21 = vld [vmem:[%s8884_s4 + $0x2] ss:$0 sm:$0xff]  ;;  %v6433_v24 = vld [vmem:[%s8884_s4 + $0x3] ss:$0 sm:$0xff] }
  0x14   :  { %6894 = vmatprep.mubr.msk.f32.mxu0 %vm7738_vm0, %v7737_v0  ;;  %6881 = vmatprep.subr.mxu1 %v7737_v0  ;;  %v7832_v29 = vld [vmem:[%s8881_s1] sm:$0xf]  ;;  %s7739_s1 = smov 96   ;;  %v7850_v48 = vld [vmem:[#allocation2 + $0x70] sm:$0xff]  ;;  %v7854_v49 = vld [vmem:[#allocation2 + $0x68] sm:$0xff] }
  0x15   :  { %6882 = vmatpush3.msra.mxu1 %v37_v6  ;;  %6889 = vmatpush3.msra.mxu0 %v42_v13  ;;  %v7858_v50 = vld [vmem:[#allocation2 + $0x60] sm:$0xff]  ;;  %v7876_v3 = vld [vmem:[#allocation2 + $0xa8] sm:$0xff] }
  0x16   :  { %6883 = vmatprep.subr.mxu1 %v7737_v0  ;;  %6890 = vmatprep.subr.mxu0 %v7737_v0  ;;  %v7872_v55 = vld [vmem:[%s8884_s4 + $0x5] ss:$0 sm:$0xff]  ;;  %v7880_v5 = vld [vmem:[#allocation2 + $0x88] sm:$0x1] }
  0x17   :  { %6884 = vmatpush3.msra.mxu1 %v36_v7  ;;  %6891 = vmatpush3.msra.mxu0 %v41_v14  ;;  %v7878_v4 = vld [vmem:[#allocation2 + $0xa0] sm:$0xff]  ;;  %v7889_v7 = vld [vmem:[#allocation2 + $0x98] sm:$0xff] }
  0x18   :  { %6897 = vmatprep.subr.mxu1 %v7737_v0  ;;  %6892 = vmatprep.subr.mxu0 %v7737_v0  ;;  %v7885_v6 = vld [vmem:[#allocation2 + $0x80] sm:$0xff] }
  0x19   :  { %6893 = vmatpush3.msra.mxu0 %v40_v15  ;;  %v7913_v15 = vld [vmem:[#allocation2 + $0xb8] sm:$0xff] }
  0x1a   :  { %6902 = vmatprep.subr.mxu0 %v7737_v0 }
  0xd3   :  { %v143_v9 = vpop.f32.mrf.mxu0 }
  0xd4   :  { %v144_v10 = vadd.f32 %v6428_v8, %v143_v9  ;;  %v7896_v8 = vld [vmem:[#allocation2 + $0x90] sm:$0xff] }
  0xd5   :  { %v6876_v11 = vpop.f32.mrf.mxu0 }
  0xd6   :  { %v147_v12 = vmax.f32 %v144_v10, 0.0 }
  0xd8   :  { %6886 = vmatmul.mubr.msk.f32.vlgmr.msra.gmra.mxu1 %vm152_vm2, %v147_v12 }
  0xd9   :  { %6899 = vmatprep.mubr.msk.f32.mxu1 %vm7738_vm0, %v7737_v0  ;;  %6898 = vmatpush3.msk.msra.mxu1 %vm321_vm3, %v7801_v16 }
  0xda   :  { %6909 = vmatprep.subr.mxu1 %v7737_v0 }
  0xdc   :  { %6900 = vmatmul.mubr.msk.f32.vlgmr.msra.gmra.mxu1 %vm317_vm4, %v316_v17  ;;  %v7917_v17 = vld [vmem:[#allocation2 + $0xb0] sm:$0xff] }
  0xdd   :  { %6917 = vmatprep.mubr.msk.f32.mxu1 %vm7738_vm0, %v7737_v0  ;;  %6910 = vmatpush3.msra.mxu1 %v7848_v47 }
  0xde   :  { %6911 = vmatprep.subr.mxu1 %v7737_v0 }
  0xdf   :  { %6912 = vmatpush3.msra.mxu1 %v7850_v48 }
  0xe0   :  { %6913 = vmatprep.subr.mxu1 %v7737_v0 }
  0xe1   :  { %6914 = vmatpush3.msra.mxu1 %v7854_v49 }
  0xe2   :  { %6915 = vmatprep.subr.mxu1 %v7737_v0 }
  0xe3   :  { %6916 = vmatpush3.msra.mxu1 %v7858_v50 }
  0xe4   :  { %6931 = vmatprep.subr.mxu1 %v7737_v0 }
 0x198   :  { %v222_v19 = vpop.f32.mrf.mxu1 }
 0x199   :  { %v223_v20 = vadd.f32 %v6430_v18, %v222_v19  ;;  %v7924_v18 = vld [vmem:[%s8884_s4 + $0x6] ss:$0 sm:$0xff] }
 0x19a   :  { %v6887_v22 = vpop.f32.mrf.mxu1 }
 0x19b   :  { %v226_v23 = vmax.f32 %v223_v20, 0.0 }
 0x19c   :  { %v391_v30 = vpop.f32.mrf.mxu1 }
 0x19d   :  { %v231_v25 = vmul.f32 %v6432_v21, %v226_v23 }
 0x19e   :  { %v6901_v31 = vpop.f32.mrf.mxu1 }
 0x19f   :  { %v236_v26 = vadd.f32 %v6433_v24, %v231_v25  ;;  %v7938_v24 = vld [vmem:[%s8884_s4 + $0x7] ss:$0 sm:$0xff] }
 0x1a1   :  { %6895 = vmatmul.mubr.msk.f32.vlgmr.msra.gmra.mxu0 %vm241_vm5, %v236_v26 }
 0x1a2   :  { %6903 = vmatpush3.msk.msra.mxu0 %vm399_vm6, %v7821_v27  ;;  %6906 = vmatprep.mubr.msk.f32.mxu0 %vm7738_vm0, %v7737_v0 }
 0x1a3   :  { %6904 = vmatprep.subr.mxu0 %v7737_v0 }
 0x1a4   :  { %6905 = vmatpush3.msra.mxu0 %v7823_v28 }
 0x1a5   :  { %6907 = vmatmul.mubr.msk.f32.vlgmr.msra.gmra.mxu0 %vm395_vm7, %v7832_v29  ;;  %6920 = vmatprep.subr.mxu0 %v7737_v0 }
 0x1a6   :  { %6928 = vmatprep.mubr.msk.f32.mxu0 %vm7738_vm0, %v7737_v0  ;;  %6921 = vmatpush3.msra.mxu0 %v7876_v3 }
 0x1a7   :  { %6922 = vmatprep.subr.mxu0 %v7737_v0 }
 0x1a8   :  { %6923 = vmatpush3.msra.mxu0 %v7878_v4 }
 0x1a9   :  { %6924 = vmatprep.subr.mxu0 %v7737_v0 }
 0x1aa   :  { %6925 = vmatpush3.msra.mxu0 %v7889_v7 }
 0x1ab   :  { %6926 = vmatprep.subr.mxu0 %v7737_v0 }
 0x1ac   :  { %6927 = vmatpush3.msra.mxu0 %v7896_v8 }
 0x1ad   :  { %6938 = vmatprep.subr.mxu0 %v7737_v0 }
 0x261   :  { %v311_v32 = vpop.f32.mrf.mxu0 }
 0x262   :  { %v7844_v36 = vadd.f32 %v6434_v33, %v311_v32  ;;  %v7949_v32 = vld [vmem:[%s8884_s4 + $0x9] ss:$0 sm:$0xff] }
 0x263   :  { %v6896_v34 = vpop.f32.mrf.mxu0 }
 0x265   :  { %v469_v35 = vpop.f32.mrf.mxu0 }
 0x266   :  { %v470_v37 = vadd.f32 %v469_v35, %v391_v30 }
 0x267   :  { %v6908_v38 = vpop.f32.mrf.mxu0 }
 0x268   :  { %v473_v39 = vadd.f32 %v470_v37, %v7844_v36  ;;  %v836_v37 = vlaneseq }
 0x26a   :  { %7480 = vtanh.f32 %v473_v39  ;;  %v6440_v41 = vmul.f32 -1.442695, %v473_v39  ;;  %v7958_v38 = vand.u32 127, %v836_v37 }
 0x26c   :  { %7482 = vpow2.f32 %v6440_v41 }
 0x277   :  { %v7481_v40 = vpop.eup %7480 }
 0x278   :  { %482 = vrot.lane.b32.xlu0 %v7481_v40, %s7739_s1 }
 0x279   :  { %v7483_v42 = vpop.eup %7482 }
 0x27a   :  { %v477_v43 = vadd.f32 1.0, %v7483_v42 }
 0x27c   :  { %7484 = vrcp.f32 %v477_v43 }
 0x289   :  { %v7485_v44 = vpop.eup %7484 }
 0x2ea   :  { %v483_v45 = vpop.permute.xlu0 %482 }
 0x2eb   :  { %v485_v46 = vmul.f32 %v7485_v44, %v483_v45 }
 0x2ed   :  { %7486 = vtanh.f32 %v485_v46 }
 0x2fa   :  { %v7487_v51 = vpop.eup %7486 }
 0x2fb   :  { %488 = vrot.lane.b32.xlu0 %v7487_v51, %s7740_s14 }
 0x36d   :  { %v489_v52 = vpop.permute.xlu0 %488 }
 0x36e   :  { %v491_v53 = vmul.f32 %v7485_v44, %v489_v52  ;;  %v6453_v52 = vld [vmem:[%s8882_s2 + $0x4] sm:$0xf] }
 0x370   :  { %497 = vrot.lane.b32.xlu1 %v491_v53, %s7740_s14 }
 0x3e2   :  { %v498_v54 = vpop.permute.xlu1 %497 }
 0x3e3   :  { %6918 = vmatmul.mubr.msk.f32.vlgmr.msra.gmra.mxu1 %vm152_vm2, %v498_v54 }
 0x3e4   :  { %6935 = vmatprep.mubr.msk.f32.mxu1 %vm7738_vm0, %v7737_v0  ;;  %6932 = vmatpush3.msk.msra.mxu1 %vm399_vm6, %v7880_v5 }
 0x3e5   :  { %6933 = vmatprep.subr.mxu1 %v7737_v0 }
 0x3e6   :  { %6934 = vmatpush3.msra.mxu1 %v7885_v6 }
 0x3e7   :  { %6936 = vmatmul.mubr.msk.f32.vlgmr.msra.gmra.mxu1 %vm395_vm7, %v7832_v29  ;;  %6945 = vmatprep.subr.mxu1 %v7737_v0  ;;  %v7944_v29 = vld [vmem:[%s8884_s4 + $0x8] ss:$0 sm:$0xff] }
 0x3e8   :  { %6946 = vmatpush3.msk.msra.mxu1 %vm321_vm3, %v7801_v16  ;;  %6947 = vmatprep.mubr.msk.f32.mxu1 %vm7738_vm0, %v7737_v0 }
 0x3e9   :  { %6957 = vmatprep.subr.mxu1 %v7737_v0 }
 0x3eb   :  { %6948 = vmatmul.mubr.msk.f32.vlgmr.msra.gmra.mxu1 %vm317_vm4, %v6453_v52 }
 0x3ec   :  { %6958 = vmatpush3.msra.mxu1 %v7848_v47  ;;  %6965 = vmatprep.mubr.msk.f32.mxu1 %vm7738_vm0, %v7737_v0 }
 0x3ed   :  { %6959 = vmatprep.subr.mxu1 %v7737_v0 }
 0x3ee   :  { %6960 = vmatpush3.msra.mxu1 %v7850_v48 }
 0x3ef   :  { %6961 = vmatprep.subr.mxu1 %v7737_v0 }
 0x3f0   :  { %6962 = vmatpush3.msra.mxu1 %v7854_v49 }
 0x3f1   :  { %6963 = vmatprep.subr.mxu1 %v7737_v0 }
 0x3f2   :  { %6964 = vmatpush3.msra.mxu1 %v7858_v50 }
 0x3f3   :  { %6979 = vmatprep.subr.mxu1 %v7737_v0 }
 0x4a3   :  { %v567_v56 = vpop.f32.mrf.mxu1 }
 0x4a4   :  { %v568_v57 = vadd.f32 %v7872_v55, %v567_v56 }
 0x4a5   :  { %v6919_v58 = vpop.f32.mrf.mxu1 }
 0x4a6   :  { %7488 = vtanh.f32 %v568_v57  ;;  %v6443_v60 = vmul.f32 -1.442695, %v568_v57 }
 0x4a7   :  { %v733_v12 = vpop.f32.mrf.mxu1 }
 0x4a8   :  { %7490 = vpow2.f32 %v6443_v60 }
 0x4a9   :  { %v6937_v13 = vpop.f32.mrf.mxu1 }
 0x4ab   :  { %v929_v60 = vpop.f32.mrf.mxu1 }
 0x4b3   :  { %v7489_v59 = vpop.eup %7488 }
 0x4b4   :  { %579 = vrot.lane.b32.xlu1 %v7489_v59, %s7739_s1 }
 0x4b5   :  { %v7491_v61 = vpop.eup %7490 }
 0x4b6   :  { %v574_v62 = vadd.f32 1.0, %v7491_v61  ;;  %v6949_v61 = vpop.f32.mrf.mxu1 }
 0x4b8   :  { %7492 = vrcp.f32 %v574_v62 }
 0x4c5   :  { %v7493_v63 = vpop.eup %7492 }
 0x526   :  { %v580_v1 = vpop.permute.xlu1 %579 }
 0x527   :  { %v582_v2 = vmul.f32 %v7493_v63, %v580_v1 }
 0x529   :  { %7494 = vtanh.f32 %v582_v2 }
 0x536   :  { %v7495_v9 = vpop.eup %7494 }
 0x537   :  { %585 = vrot.lane.b32.xlu0 %v7495_v9, %s7740_s14 }
 0x5a9   :  { %v586_v10 = vpop.permute.xlu0 %585 }
 0x5aa   :  { %v588_v11 = vmul.f32 %v7493_v63, %v586_v10 }
 0x5ac   :  { %590 = vrot.lane.b32.xlu1 %v588_v11, %s7740_s14 }
 0x61e   :  { %v591_v14 = vpop.permute.xlu1 %590 }
 0x61f   :  { %6929 = vmatmul.mubr.msk.f32.vlgmr.msra.gmra.mxu0 %vm152_vm2, %v591_v14 }
 0x620   :  { %6942 = vmatprep.mubr.msk.f32.mxu0 %vm7738_vm0, %v7737_v0  ;;  %6939 = vmatpush3.msra.mxu0 %v7913_v15 }
 0x621   :  { %6940 = vmatprep.subr.mxu0 %v7737_v0 }
 0x622   :  { %6941 = vmatpush3.msra.mxu0 %v7917_v17 }
 0x623   :  { %6950 = vmatprep.subr.mxu0 %v7737_v0 }
 0x6df   :  { %v660_v19 = vpop.f32.mrf.mxu0 }
 0x6e0   :  { %v734_v20 = vadd.f32 %v733_v12, %v660_v19 }
 0x6e1   :  { %v6930_v21 = vpop.f32.mrf.mxu0 }
 0x6e2   :  { %v741_v22 = vadd.f32 %v7924_v18, %v734_v20 }
 0x6e4   :  { %v742_v23 = vmax.f32 %v741_v22, 0.0 }
 0x6e6   :  { %6943 = vmatmul.mubr.msk.f32.vlgmr.msra.gmra.mxu0 %vm73_vm1, %v742_v23 }
 0x6e7   :  { %6951 = vmatpush3.msk.msra.mxu0 %vm399_vm6, %v7821_v27  ;;  %6954 = vmatprep.mubr.msk.f32.mxu0 %vm7738_vm0, %v7737_v0 }
 0x6e8   :  { %6952 = vmatprep.subr.mxu0 %v7737_v0 }
 0x6e9   :  { %6953 = vmatpush3.msra.mxu0 %v7823_v28 }
 0x6ea   :  { %6968 = vmatprep.subr.mxu0 %v7737_v0 }
 0x7a6   :  { %v816_v25 = vpop.f32.mrf.mxu0 }
 0x7a7   :  { %v817_v26 = vadd.f32 %v7938_v24, %v816_v25 }
 0x7a8   :  { %v6944_v30 = vpop.f32.mrf.mxu0 }
 0x7a9   :  { %v820_v31 = vmax.f32 %v817_v26, 0.0 }
 0x7ab   :  { %v825_v33 = vmul.f32 %v7944_v29, %v820_v31 }
 0x7ad   :  { %v830_v34 = vadd.f32 %v7949_v32, %v825_v33 }
 0x7af   :  { %v833_v35 = vsel %vm831_vm8, %v830_v34, -inf  ;;  %832 = vst.msk [vmem:[%s8885_s5] sm:$0xf] %vm831_vm8, %v830_v34 }
 0x7b0   :  { %834 = vmax.xlane.f32.xlu0 %v833_v35 }
 0x839   :  { %v835_v39 = vpop.xlane.xlu0 %834 }
 0x83a   :  { %vm838_vm9 = vcmp.eq.f32.partialorder %v830_v34, %v835_v39 }
 0x83b   :  { %v839_v40 = vsel %vm838_vm9, %v7958_v38, 9 }
 0x83c   :  { %v840_v41 = vsel %vm831_vm8, %v839_v40, 2147483647 }
 0x83d   :  { %v842_v42 = vshra.s32 %v840_v41, 16  ;;  %v841_v44 = vand.u32 65535, %v840_v41 }
 0x83f   :  { %v844_v43 = vcvt.s32.f32 %v842_v42  ;;  %v843_v46 = vcvt.s32.f32 %v841_v44 }
 0x841   :  { %845 = vmin.xlane.f32.xlu1 %v844_v43 }
 0x8ca   :  { %v846_v45 = vpop.xlane.xlu1 %845 }
 0x8cb   :  { %vm847_vm10 = vcmp.eq.f32.partialorder %v844_v43, %v846_v45  ;;  %v852_v53 = vcvt.f32.s32 %v846_v45 }
 0x8cc   :  { %v848_v51 = vsel %vm847_vm10, %v843_v46, inf }
 0x8cd   :  { %849 = vmin.xlane.f32.xlu0 %v848_v51  ;;  %v853_v56 = vshll.u32 %v852_v53, 16 }
 0x956   :  { %v850_v54 = vpop.xlane.xlu0 %849 }
 0x957   :  { %v851_v57 = vcvt.f32.s32 %v850_v54 }
 0x959   :  { %v854_v58 = vadd.s32 %v853_v56, %v851_v57 }
 0x95b   :  { %vm855_vm11 = vcmp.eq.s32.totalorder %v7958_v38, %v854_v58 }
 0x95c   :  { %v6452_v59 = vsel %vm855_vm11, 1.0, %v7737_v0 }
 0x95d   :  { %6955 = vmatmul.mubr.msk.f32.vlgmr.msra.gmra.mxu0 %vm395_vm7, %v6452_v59 }
 0x95e   :  { %6969 = vmatpush3.msra.mxu0 %v7876_v3  ;;  %6976 = vmatprep.mubr.msk.f32.mxu0 %vm7738_vm0, %v7737_v0 }
 0x95f   :  { %6970 = vmatprep.subr.mxu0 %v7737_v0 }
 0x960   :  { %6971 = vmatpush3.msra.mxu0 %v7878_v4 }
 0x961   :  { %6972 = vmatprep.subr.mxu0 %v7737_v0 }
 0x962   :  { %6973 = vmatpush3.msra.mxu0 %v7889_v7 }
 0x963   :  { %6974 = vmatprep.subr.mxu0 %v7737_v0 }
 0x964   :  { %6975 = vmatpush3.msra.mxu0 %v7896_v8 }
 0x965   :  { %6986 = vmatprep.subr.mxu0 %v7737_v0 }
 0xa1d   :  { %v1002_v62 = vpop.f32.mrf.mxu0 }
 0xa1e   :  { %v1003_v63 = vadd.f32 %v1002_v62, %v929_v60 }
 0xa1f   :  { %v6956_v1 = vpop.f32.mrf.mxu0 }
 0xa20   :  { %v1006_v2 = vadd.f32 %v1003_v63, %v7844_v36 }
 0xa22   :  { %7496 = vtanh.f32 %v1006_v2  ;;  %v6458_v10 = vmul.f32 -1.442695, %v1006_v2 }
 0xa24   :  { %7498 = vpow2.f32 %v6458_v10 }
 0xa2f   :  { %v7497_v9 = vpop.eup %7496 }
 0xa30   :  { %1015 = vrot.lane.b32.xlu0 %v7497_v9, %s7739_s1 }
 0xa31   :  { %v7499_v11 = vpop.eup %7498 }
 0xa32   :  { %v1010_v12 = vadd.f32 1.0, %v7499_v11 }
 0xa34   :  { %7500 = vrcp.f32 %v1010_v12 }
 0xa41   :  { %v7501_v13 = vpop.eup %7500 }
 0xaa2   :  { %v1016_v14 = vpop.permute.xlu0 %1015 }
 0xaa3   :  { %v1018_v19 = vmul.f32 %v7501_v13, %v1016_v14 }
 0xaa5   :  { %7502 = vtanh.f32 %v1018_v19 }
 0xab2   :  { %v7503_v20 = vpop.eup %7502 }
 0xab3   :  { %1021 = vrot.lane.b32.xlu1 %v7503_v20, %s7740_s14  ;;  %v6467_v20 = vld [vmem:[%s8882_s2 + $0x8] sm:$0xf] }
 0xb25   :  { %v1022_v21 = vpop.permute.xlu1 %1021 }
 0xb26   :  { %v1024_v22 = vmul.f32 %v7501_v13, %v1022_v21 }
 0xb28   :  { %1026 = vrot.lane.b32.xlu1 %v1024_v22, %s7740_s14 }
 0xb9a   :  { %v1027_v23 = vpop.permute.xlu1 %1026 }
 0xb9b   :  { %6966 = vmatmul.mubr.msk.f32.vlgmr.msra.gmra.mxu1 %vm152_vm2, %v1027_v23 }
 0xb9c   :  { %6980 = vmatpush3.msk.msra.mxu1 %vm399_vm6, %v7880_v5  ;;  %6983 = vmatprep.mubr.msk.f32.mxu1 %vm7738_vm0, %v7737_v0 }
 0xb9d   :  { %6981 = vmatprep.subr.mxu1 %v7737_v0 }
 0xb9e   :  { %6982 = vmatpush3.msra.mxu1 %v7885_v6 }
 0xb9f   :  { %6984 = vmatmul.mubr.msk.f32.vlgmr.msra.gmra.mxu1 %vm395_vm7, %v6452_v59  ;;  %6993 = vmatprep.subr.mxu1 %v7737_v0 }
 0xba0   :  { %6994 = vmatpush3.msk.msra.mxu1 %vm321_vm3, %v7801_v16  ;;  %6995 = vmatprep.mubr.msk.f32.mxu1 %vm7738_vm0, %v7737_v0 }
 0xba1   :  { %7005 = vmatprep.subr.mxu1 %v7737_v0 }
 0xba3   :  { %6996 = vmatmul.mubr.msk.f32.vlgmr.msra.gmra.mxu1 %vm317_vm4, %v6467_v20 }
 0xba4   :  { %7006 = vmatpush3.msra.mxu1 %v7848_v47  ;;  %7013 = vmatprep.mubr.msk.f32.mxu1 %vm7738_vm0, %v7737_v0 }
 0xba5   :  { %7007 = vmatprep.subr.mxu1 %v7737_v0 }
 0xba6   :  { %7008 = vmatpush3.msra.mxu1 %v7850_v48 }
 0xba7   :  { %7009 = vmatprep.subr.mxu1 %v7737_v0 }
 0xba8   :  { %7010 = vmatpush3.msra.mxu1 %v7854_v49 }
 0xba9   :  { %7011 = vmatprep.subr.mxu1 %v7737_v0 }
 0xbaa   :  { %7012 = vmatpush3.msra.mxu1 %v7858_v50 }
 0xbab   :  { %7027 = vmatprep.subr.mxu1 %v7737_v0 }
 0xc5b   :  { %v1096_v25 = vpop.f32.mrf.mxu1 }
 0xc5c   :  { %v1097_v26 = vadd.f32 %v7872_v55, %v1096_v25 }
 0xc5d   :  { %v6967_v30 = vpop.f32.mrf.mxu1 }
 0xc5e   :  { %7504 = vtanh.f32 %v1097_v26  ;;  %v6460_v35 = vmul.f32 -1.442695, %v1097_v26 }
 0xc5f   :  { %v1259_v31 = vpop.f32.mrf.mxu1 }
 0xc60   :  { %7506 = vpow2.f32 %v6460_v35 }
 0xc61   :  { %v6985_v33 = vpop.f32.mrf.mxu1 }
 0xc6b   :  { %v7505_v34 = vpop.eup %7504 }
 0xc6c   :  { %1108 = vrot.lane.b32.xlu0 %v7505_v34, %s7739_s1 }
 0xc6d   :  { %v7507_v37 = vpop.eup %7506 }
 0xc6e   :  { %v1103_v39 = vadd.f32 1.0, %v7507_v37 }
 0xc70   :  { %7508 = vrcp.f32 %v1103_v39 }
 0xc7d   :  { %v7509_v40 = vpop.eup %7508 }
 0xcde   :  { %v1109_v41 = vpop.permute.xlu0 %1108 }
 0xcdf   :  { %v1111_v42 = vmul.f32 %v7509_v40, %v1109_v41 }
 0xce1   :  { %7510 = vtanh.f32 %v1111_v42 }
 0xcee   :  { %v7511_v43 = vpop.eup %7510 }
 0xcef   :  { %1114 = vrot.lane.b32.xlu1 %v7511_v43, %s7740_s14 }
 0xd61   :  { %v1115_v44 = vpop.permute.xlu1 %1114 }
 0xd62   :  { %v1117_v45 = vmul.f32 %v7509_v40, %v1115_v44 }
 0xd64   :  { %1119 = vrot.lane.b32.xlu0 %v1117_v45, %s7740_s14 }
 0xdd6   :  { %v1120_v46 = vpop.permute.xlu0 %1119 }
 0xdd7   :  { %6977 = vmatmul.mubr.msk.f32.vlgmr.msra.gmra.mxu0 %vm152_vm2, %v1120_v46 }
 0xdd8   :  { %6987 = vmatpush3.msra.mxu0 %v7913_v15  ;;  %6990 = vmatprep.mubr.msk.f32.mxu0 %vm7738_vm0, %v7737_v0 }
 0xdd9   :  { %6988 = vmatprep.subr.mxu0 %v7737_v0 }
 0xdda   :  { %6989 = vmatpush3.msra.mxu0 %v7917_v17 }
 0xddb   :  { %6998 = vmatprep.subr.mxu0 %v7737_v0 }
 0xe97   :  { %v1189_v51 = vpop.f32.mrf.mxu0 }
 0xe98   :  { %v1260_v52 = vadd.f32 %v1259_v31, %v1189_v51  ;;  %v1437_v31 = vpop.f32.mrf.mxu1 }
 0xe99   :  { %v6978_v53 = vpop.f32.mrf.mxu0 }
 0xe9a   :  { %v1263_v54 = vadd.f32 %v7924_v18, %v1260_v52  ;;  %v6997_v33 = vpop.f32.mrf.mxu1 }
 0xe9c   :  { %v1264_v56 = vmax.f32 %v1263_v54, 0.0 }
 0xe9e   :  { %6991 = vmatmul.mubr.msk.f32.vlgmr.msra.gmra.mxu0 %vm73_vm1, %v1264_v56 }
 0xe9f   :  { %6999 = vmatpush3.msk.msra.mxu0 %vm399_vm6, %v7821_v27  ;;  %7002 = vmatprep.mubr.msk.f32.mxu0 %vm7738_vm0, %v7737_v0 }
 0xea0   :  { %7000 = vmatprep.subr.mxu0 %v7737_v0 }
 0xea1   :  { %7001 = vmatpush3.msra.mxu0 %v7823_v28 }
 0xea2   :  { %7016 = vmatprep.subr.mxu0 %v7737_v0 }
 0xf5e   :  { %v1334_v57 = vpop.f32.mrf.mxu0 }
 0xf5f   :  { %v1335_v58 = vadd.f32 %v7938_v24, %v1334_v57 }
 0xf60   :  { %v6992_v59 = vpop.f32.mrf.mxu0 }
 0xf61   :  { %v1338_v60 = vmax.f32 %v1335_v58, 0.0 }
 0xf63   :  { %v1339_v61 = vmul.f32 %v7944_v29, %v1338_v60 }
 0xf65   :  { %v1340_v62 = vadd.f32 %v7949_v32, %v1339_v61 }
 0xf67   :  { %v1343_v63 = vsel %vm831_vm8, %v1340_v62, -inf  ;;  %6465 = vst.msk [vmem:[%s8885_s5 + $0x4] sm:$0xf] %vm831_vm8, %v1340_v62 }
 0xf68   :  { %1344 = vmax.xlane.f32.xlu1 %v1343_v63 }
 0xff1   :  { %v1345_v1 = vpop.xlane.xlu1 %1344 }
 0xff2   :  { %vm1346_vm12 = vcmp.eq.f32.partialorder %v1340_v62, %v1345_v1 }
 0xff3   :  { %v1347_v2 = vsel %vm1346_vm12, %v7958_v38, 9 }
 0xff4   :  { %v1348_v9 = vsel %vm831_vm8, %v1347_v2, 2147483647 }
 0xff5   :  { %v1350_v10 = vshra.s32 %v1348_v9, 16  ;;  %v1349_v12 = vand.u32 65535, %v1348_v9 }
 0xff7   :  { %v1352_v11 = vcvt.s32.f32 %v1350_v10  ;;  %v1351_v14 = vcvt.s32.f32 %v1349_v12 }
 0xff9   :  { %1353 = vmin.xlane.f32.xlu0 %v1352_v11 }
0x1082   :  { %v1354_v13 = vpop.xlane.xlu0 %1353 }
0x1083   :  { %vm1355_vm13 = vcmp.eq.f32.partialorder %v1352_v11, %v1354_v13  ;;  %v1360_v21 = vcvt.f32.s32 %v1354_v13 }
0x1084   :  { %v1356_v19 = vsel %vm1355_vm13, %v1351_v14, inf }
0x1085   :  { %1357 = vmin.xlane.f32.xlu0 %v1356_v19  ;;  %v1361_v23 = vshll.u32 %v1360_v21, 16 }
0x110e   :  { %v1358_v22 = vpop.xlane.xlu0 %1357 }
0x110f   :  { %v1359_v25 = vcvt.f32.s32 %v1358_v22 }
0x1111   :  { %v1362_v26 = vadd.s32 %v1361_v23, %v1359_v25 }
0x1113   :  { %vm1363_vm14 = vcmp.eq.s32.totalorder %v7958_v38, %v1362_v26 }
0x1114   :  { %v6466_v30 = vsel %vm1363_vm14, 1.0, %v7737_v0 }
0x1115   :  { %7003 = vmatmul.mubr.msk.f32.vlgmr.msra.gmra.mxu0 %vm395_vm7, %v6466_v30 }
0x1116   :  { %7017 = vmatpush3.msra.mxu0 %v7876_v3  ;;  %7024 = vmatprep.mubr.msk.f32.mxu0 %vm7738_vm0, %v7737_v0 }
0x1117   :  { %7018 = vmatprep.subr.mxu0 %v7737_v0 }
0x1118   :  { %7019 = vmatpush3.msra.mxu0 %v7878_v4 }
0x1119   :  { %7020 = vmatprep.subr.mxu0 %v7737_v0 }
0x111a   :  { %7021 = vmatpush3.msra.mxu0 %v7889_v7 }
0x111b   :  { %7022 = vmatprep.subr.mxu0 %v7737_v0 }
0x111c   :  { %7023 = vmatpush3.msra.mxu0 %v7896_v8 }
0x111d   :  { %7034 = vmatprep.subr.mxu0 %v7737_v0 }
0x11d5   :  { %v1510_v34 = vpop.f32.mrf.mxu0 }
0x11d6   :  { %v1511_v35 = vadd.f32 %v1510_v34, %v1437_v31 }
0x11d7   :  { %v7004_v37 = vpop.f32.mrf.mxu0 }
0x11d8   :  { %v1514_v39 = vadd.f32 %v1511_v35, %v7844_v36 }
0x11da   :  { %7512 = vtanh.f32 %v1514_v39  ;;  %v6472_v41 = vmul.f32 -1.442695, %v1514_v39 }
0x11dc   :  { %7514 = vpow2.f32 %v6472_v41 }
0x11e7   :  { %v7513_v40 = vpop.eup %7512 }
0x11e8   :  { %1523 = vrot.lane.b32.xlu1 %v7513_v40, %s7739_s1 }
0x11e9   :  { %v7515_v42 = vpop.eup %7514 }
0x11ea   :  { %v1518_v43 = vadd.f32 1.0, %v7515_v42 }
0x11ec   :  { %7516 = vrcp.f32 %v1518_v43 }
0x11f9   :  { %v7517_v44 = vpop.eup %7516 }
0x125a   :  { %v1524_v45 = vpop.permute.xlu1 %1523 }
0x125b   :  { %v1526_v46 = vmul.f32 %v7517_v44, %v1524_v45 }
0x125d   :  { %7518 = vtanh.f32 %v1526_v46 }
0x126a   :  { %v7519_v51 = vpop.eup %7518 }
0x126b   :  { %1529 = vrot.lane.b32.xlu0 %v7519_v51, %s7740_s14  ;;  %v6481_v51 = vld [vmem:[%s8882_s2 + $0xc] sm:$0xf] }
0x12dd   :  { %v1530_v52 = vpop.permute.xlu0 %1529 }
0x12de   :  { %v1532_v53 = vmul.f32 %v7517_v44, %v1530_v52 }
0x12e0   :  { %1534 = vrot.lane.b32.xlu1 %v1532_v53, %s7740_s14 }
0x1352   :  { %v1535_v54 = vpop.permute.xlu1 %1534 }
0x1353   :  { %7014 = vmatmul.mubr.msk.f32.vlgmr.msra.gmra.mxu1 %vm152_vm2, %v1535_v54 }
0x1354   :  { %7028 = vmatpush3.msk.msra.mxu1 %vm399_vm6, %v7880_v5  ;;  %7031 = vmatprep.mubr.msk.f32.mxu1 %vm7738_vm0, %v7737_v0 }
0x1355   :  { %7029 = vmatprep.subr.mxu1 %v7737_v0 }
0x1356   :  { %7030 = vmatpush3.msra.mxu1 %v7885_v6 }
0x1357   :  { %7032 = vmatmul.mubr.msk.f32.vlgmr.msra.gmra.mxu1 %vm395_vm7, %v6466_v30  ;;  %7041 = vmatprep.subr.mxu1 %v7737_v0 }
0x1358   :  { %7042 = vmatpush3.msk.msra.mxu1 %vm321_vm3, %v7801_v16  ;;  %7043 = vmatprep.mubr.msk.f32.mxu1 %vm7738_vm0, %v7737_v0 }
0x1359   :  { %7053 = vmatprep.subr.mxu1 %v7737_v0 }
0x135b   :  { %7044 = vmatmul.mubr.msk.f32.vlgmr.msra.gmra.mxu1 %vm317_vm4, %v6481_v51 }
0x135c   :  { %7054 = vmatpush3.msra.mxu1 %v7848_v47  ;;  %7061 = vmatprep.mubr.msk.f32.mxu1 %vm7738_vm0, %v7737_v0 }
0x135d   :  { %7055 = vmatprep.subr.mxu1 %v7737_v0 }
0x135e   :  { %7056 = vmatpush3.msra.mxu1 %v7850_v48 }
0x135f   :  { %7057 = vmatprep.subr.mxu1 %v7737_v0 }
0x1360   :  { %7058 = vmatpush3.msra.mxu1 %v7854_v49 }
0x1361   :  { %7059 = vmatprep.subr.mxu1 %v7737_v0 }
0x1362   :  { %7060 = vmatpush3.msra.mxu1 %v7858_v50 }
0x1363   :  { %7075 = vmatprep.subr.mxu1 %v7737_v0 }
0x1413   :  { %v1604_v56 = vpop.f32.mrf.mxu1 }
0x1414   :  { %v1605_v57 = vadd.f32 %v7872_v55, %v1604_v56 }
0x1415   :  { %v7015_v58 = vpop.f32.mrf.mxu1 }
0x1416   :  { %7520 = vtanh.f32 %v1605_v57  ;;  %v6474_v62 = vmul.f32 -1.442695, %v1605_v57 }
0x1417   :  { %v1767_v59 = vpop.f32.mrf.mxu1 }
0x1418   :  { %7522 = vpow2.f32 %v6474_v62 }
0x1419   :  { %v7033_v60 = vpop.f32.mrf.mxu1 }
0x1423   :  { %v7521_v61 = vpop.eup %7520 }
0x1424   :  { %1616 = vrot.lane.b32.xlu1 %v7521_v61, %s7739_s1 }
0x1425   :  { %v7523_v63 = vpop.eup %7522 }
0x1426   :  { %v1611_v1 = vadd.f32 1.0, %v7523_v63 }
0x1428   :  { %7524 = vrcp.f32 %v1611_v1 }
0x1435   :  { %v7525_v2 = vpop.eup %7524 }
0x1496   :  { %v1617_v9 = vpop.permute.xlu1 %1616 }
0x1497   :  { %v1619_v10 = vmul.f32 %v7525_v2, %v1617_v9 }
0x1499   :  { %7526 = vtanh.f32 %v1619_v10 }
0x14a6   :  { %v7527_v11 = vpop.eup %7526 }
0x14a7   :  { %1622 = vrot.lane.b32.xlu0 %v7527_v11, %s7740_s14 }
0x1519   :  { %v1623_v12 = vpop.permute.xlu0 %1622 }
0x151a   :  { %v1625_v13 = vmul.f32 %v7525_v2, %v1623_v12 }
0x151c   :  { %1627 = vrot.lane.b32.xlu1 %v1625_v13, %s7740_s14 }
0x158e   :  { %v1628_v14 = vpop.permute.xlu1 %1627 }
0x158f   :  { %7025 = vmatmul.mubr.msk.f32.vlgmr.msra.gmra.mxu0 %vm152_vm2, %v1628_v14 }
0x1590   :  { %7035 = vmatpush3.msra.mxu0 %v7913_v15  ;;  %7038 = vmatprep.mubr.msk.f32.mxu0 %vm7738_vm0, %v7737_v0 }
0x1591   :  { %7036 = vmatprep.subr.mxu0 %v7737_v0 }
0x1592   :  { %7037 = vmatpush3.msra.mxu0 %v7917_v17 }
0x1593   :  { %7046 = vmatprep.subr.mxu0 %v7737_v0 }
0x164f   :  { %v1697_v19 = vpop.f32.mrf.mxu0 }
0x1650   :  { %v1768_v20 = vadd.f32 %v1767_v59, %v1697_v19  ;;  %v1945_v59 = vpop.f32.mrf.mxu1 }
0x1651   :  { %v7026_v21 = vpop.f32.mrf.mxu0 }
0x1652   :  { %v1771_v22 = vadd.f32 %v7924_v18, %v1768_v20  ;;  %v7045_v60 = vpop.f32.mrf.mxu1 }
0x1654   :  { %v1772_v23 = vmax.f32 %v1771_v22, 0.0 }
0x1656   :  { %7039 = vmatmul.mubr.msk.f32.vlgmr.msra.gmra.mxu0 %vm73_vm1, %v1772_v23 }
0x1657   :  { %7047 = vmatpush3.msk.msra.mxu0 %vm399_vm6, %v7821_v27  ;;  %7050 = vmatprep.mubr.msk.f32.mxu0 %vm7738_vm0, %v7737_v0 }
0x1658   :  { %7048 = vmatprep.subr.mxu0 %v7737_v0 }
0x1659   :  { %7049 = vmatpush3.msra.mxu0 %v7823_v28 }
0x165a   :  { %7064 = vmatprep.subr.mxu0 %v7737_v0 }
0x1716   :  { %v1842_v25 = vpop.f32.mrf.mxu0 }
0x1717   :  { %v1843_v26 = vadd.f32 %v7938_v24, %v1842_v25 }
0x1718   :  { %v7040_v30 = vpop.f32.mrf.mxu0 }
0x1719   :  { %v1846_v31 = vmax.f32 %v1843_v26, 0.0 }
0x171b   :  { %v1847_v33 = vmul.f32 %v7944_v29, %v1846_v31 }
0x171d   :  { %v1848_v34 = vadd.f32 %v7949_v32, %v1847_v33 }
0x171f   :  { %v1851_v35 = vsel %vm831_vm8, %v1848_v34, -inf  ;;  %6479 = vst.msk [vmem:[%s8885_s5 + $0x8] sm:$0xf] %vm831_vm8, %v1848_v34 }
0x1720   :  { %1852 = vmax.xlane.f32.xlu0 %v1851_v35 }
0x17a9   :  { %v1853_v37 = vpop.xlane.xlu0 %1852 }
0x17aa   :  { %vm1854_vm15 = vcmp.eq.f32.partialorder %v1848_v34, %v1853_v37 }
0x17ab   :  { %v1855_v39 = vsel %vm1854_vm15, %v7958_v38, 9 }
0x17ac   :  { %v1856_v40 = vsel %vm831_vm8, %v1855_v39, 2147483647 }
0x17ad   :  { %v1858_v41 = vshra.s32 %v1856_v40, 16  ;;  %v1857_v43 = vand.u32 65535, %v1856_v40 }
0x17af   :  { %v1860_v42 = vcvt.s32.f32 %v1858_v41  ;;  %v1859_v45 = vcvt.s32.f32 %v1857_v43 }
0x17b1   :  { %1861 = vmin.xlane.f32.xlu1 %v1860_v42 }
0x183a   :  { %v1862_v44 = vpop.xlane.xlu1 %1861 }
0x183b   :  { %vm1863_vm5 = vcmp.eq.f32.partialorder %v1860_v42, %v1862_v44  ;;  %v1868_v52 = vcvt.f32.s32 %v1862_v44 }
0x183c   :  { %v1864_v46 = vsel %vm1863_vm5, %v1859_v45, inf }
0x183d   :  { %1865 = vmin.xlane.f32.xlu0 %v1864_v46  ;;  %v1869_v54 = vshll.u32 %v1868_v52, 16 }
0x18c6   :  { %v1866_v53 = vpop.xlane.xlu0 %1865 }
0x18c7   :  { %v1867_v56 = vcvt.f32.s32 %v1866_v53 }
0x18c9   :  { %v1870_v57 = vadd.s32 %v1869_v54, %v1867_v56 }
0x18cb   :  { %vm1871_vm9 = vcmp.eq.s32.totalorder %v7958_v38, %v1870_v57 }
0x18cc   :  { %v6480_v58 = vsel %vm1871_vm9, 1.0, %v7737_v0 }
0x18cd   :  { %7051 = vmatmul.mubr.msk.f32.vlgmr.msra.gmra.mxu0 %vm395_vm7, %v6480_v58 }
0x18ce   :  { %7065 = vmatpush3.msra.mxu0 %v7876_v3  ;;  %7072 = vmatprep.mubr.msk.f32.mxu0 %vm7738_vm0, %v7737_v0 }
0x18cf   :  { %7066 = vmatprep.subr.mxu0 %v7737_v0 }
0x18d0   :  { %7067 = vmatpush3.msra.mxu0 %v7878_v4 }
0x18d1   :  { %7068 = vmatprep.subr.mxu0 %v7737_v0 }
0x18d2   :  { %7069 = vmatpush3.msra.mxu0 %v7889_v7 }
0x18d3   :  { %7070 = vmatprep.subr.mxu0 %v7737_v0 }
0x18d4   :  { %7071 = vmatpush3.msra.mxu0 %v7896_v8 }
0x18d5   :  { %7082 = vmatprep.subr.mxu0 %v7737_v0 }
0x198d   :  { %v2018_v61 = vpop.f32.mrf.mxu0 }
0x198e   :  { %v2019_v62 = vadd.f32 %v2018_v61, %v1945_v59 }
0x198f   :  { %v7052_v63 = vpop.f32.mrf.mxu0 }
0x1990   :  { %v2022_v1 = vadd.f32 %v2019_v62, %v7844_v36 }
0x1992   :  { %7528 = vtanh.f32 %v2022_v1  ;;  %v6486_v9 = vmul.f32 -1.442695, %v2022_v1 }
0x1994   :  { %7530 = vpow2.f32 %v6486_v9 }
0x199f   :  { %v7529_v2 = vpop.eup %7528 }
0x19a0   :  { %2031 = vrot.lane.b32.xlu0 %v7529_v2, %s7739_s1 }
0x19a1   :  { %v7531_v10 = vpop.eup %7530 }
0x19a2   :  { %v2026_v11 = vadd.f32 1.0, %v7531_v10 }
0x19a4   :  { %7532 = vrcp.f32 %v2026_v11  ;;  %v6495_v11 = vld [vmem:[%s8882_s2 + $0x10] sm:$0xf] }
0x19b1   :  { %v7533_v12 = vpop.eup %7532 }
0x1a12   :  { %v2032_v13 = vpop.permute.xlu0 %2031 }
0x1a13   :  { %v2034_v14 = vmul.f32 %v7533_v12, %v2032_v13 }
0x1a15   :  { %7534 = vtanh.f32 %v2034_v14 }
0x1a22   :  { %v7535_v19 = vpop.eup %7534 }
0x1a23   :  { %2037 = vrot.lane.b32.xlu1 %v7535_v19, %s7740_s14 }
0x1a95   :  { %v2038_v20 = vpop.permute.xlu1 %2037 }
0x1a96   :  { %v2040_v21 = vmul.f32 %v7533_v12, %v2038_v20 }
0x1a98   :  { %2042 = vrot.lane.b32.xlu1 %v2040_v21, %s7740_s14 }
0x1b0a   :  { %v2043_v22 = vpop.permute.xlu1 %2042 }
0x1b0b   :  { %7062 = vmatmul.mubr.msk.f32.vlgmr.msra.gmra.mxu1 %vm152_vm2, %v2043_v22 }
0x1b0c   :  { %7076 = vmatpush3.msk.msra.mxu1 %vm399_vm6, %v7880_v5  ;;  %7079 = vmatprep.mubr.msk.f32.mxu1 %vm7738_vm0, %v7737_v0 }
0x1b0d   :  { %7077 = vmatprep.subr.mxu1 %v7737_v0 }
0x1b0e   :  { %7078 = vmatpush3.msra.mxu1 %v7885_v6 }
0x1b0f   :  { %7080 = vmatmul.mubr.msk.f32.vlgmr.msra.gmra.mxu1 %vm395_vm7, %v6480_v58  ;;  %7089 = vmatprep.subr.mxu1 %v7737_v0 }
0x1b10   :  { %7090 = vmatpush3.msk.msra.mxu1 %vm321_vm3, %v7801_v16  ;;  %7091 = vmatprep.mubr.msk.f32.mxu1 %vm7738_vm0, %v7737_v0 }
0x1b11   :  { %7101 = vmatprep.subr.mxu1 %v7737_v0 }
0x1b13   :  { %7092 = vmatmul.mubr.msk.f32.vlgmr.msra.gmra.mxu1 %vm317_vm4, %v6495_v11 }
0x1b14   :  { %7102 = vmatpush3.msra.mxu1 %v7848_v47  ;;  %7109 = vmatprep.mubr.msk.f32.mxu1 %vm7738_vm0, %v7737_v0 }
0x1b15   :  { %7103 = vmatprep.subr.mxu1 %v7737_v0 }
0x1b16   :  { %7104 = vmatpush3.msra.mxu1 %v7850_v48 }
0x1b17   :  { %7105 = vmatprep.subr.mxu1 %v7737_v0 }
0x1b18   :  { %7106 = vmatpush3.msra.mxu1 %v7854_v49 }
0x1b19   :  { %7107 = vmatprep.subr.mxu1 %v7737_v0 }
0x1b1a   :  { %7108 = vmatpush3.msra.mxu1 %v7858_v50 }
0x1b1b   :  { %7123 = vmatprep.subr.mxu1 %v7737_v0 }
0x1bcb   :  { %v2112_v23 = vpop.f32.mrf.mxu1 }
0x1bcc   :  { %v2113_v25 = vadd.f32 %v7872_v55, %v2112_v23 }
0x1bcd   :  { %v7063_v26 = vpop.f32.mrf.mxu1 }
0x1bce   :  { %7536 = vtanh.f32 %v2113_v25  ;;  %v6488_v34 = vmul.f32 -1.442695, %v2113_v25 }
0x1bcf   :  { %v2275_v30 = vpop.f32.mrf.mxu1 }
0x1bd0   :  { %7538 = vpow2.f32 %v6488_v34 }
0x1bd1   :  { %v7081_v31 = vpop.f32.mrf.mxu1 }
0x1bd3   :  { %v2453_v48 = vpop.f32.mrf.mxu1 }
0x1bd5   :  { %v7093_v49 = vpop.f32.mrf.mxu1 }
0x1bd6   :  { %v8291_v49 = vld [vmem:[#allocation2 + $0x60] sm:$0xff] }
0x1bdb   :  { %v7537_v33 = vpop.eup %7536 }
0x1bdc   :  { %2124 = vrot.lane.b32.xlu0 %v7537_v33, %s7739_s1 }
0x1bdd   :  { %v7539_v35 = vpop.eup %7538 }
0x1bde   :  { %v2119_v37 = vadd.f32 1.0, %v7539_v35 }
0x1be0   :  { %7540 = vrcp.f32 %v2119_v37  ;;  %v8227_v37 = vld [vmem:[#allocation2 + $0x58] sm:$0x7f] }
0x1bed   :  { %v7541_v16 = vpop.eup %7540 }
0x1c4e   :  { %v2125_v39 = vpop.permute.xlu0 %2124 }
0x1c4f   :  { %v2127_v40 = vmul.f32 %v7541_v16, %v2125_v39 }
0x1c51   :  { %7542 = vtanh.f32 %v2127_v40 }
0x1c5e   :  { %v7543_v41 = vpop.eup %7542 }
0x1c5f   :  { %2130 = vrot.lane.b32.xlu1 %v7543_v41, %s7740_s14 }
0x1cd1   :  { %v2131_v55 = vpop.permute.xlu1 %2130 }
0x1cd2   :  { %v2133_v42 = vmul.f32 %v7541_v16, %v2131_v55  ;;  %v8237_v16 = vld [vmem:[%s8884_s4 + $0x5] ss:$0 sm:$0xff] }
0x1cd4   :  { %2135 = vrot.lane.b32.xlu0 %v2133_v42, %s7740_s14 }
0x1d46   :  { %v2136_v43 = vpop.permute.xlu0 %2135 }
0x1d47   :  { %7073 = vmatmul.mubr.msk.f32.vlgmr.msra.gmra.mxu0 %vm152_vm2, %v2136_v43 }
0x1d48   :  { %7083 = vmatpush3.msra.mxu0 %v7913_v15  ;;  %7086 = vmatprep.mubr.msk.f32.mxu0 %vm7738_vm0, %v7737_v0 }
0x1d49   :  { %7084 = vmatprep.subr.mxu0 %v7737_v0 }
0x1d4a   :  { %7085 = vmatpush3.msra.mxu0 %v7917_v17 }
0x1d4b   :  { %7094 = vmatprep.subr.mxu0 %v7737_v0 }
0x1e07   :  { %v2205_v44 = vpop.f32.mrf.mxu0 }
0x1e08   :  { %v2276_v45 = vadd.f32 %v2275_v30, %v2205_v44 }
0x1e09   :  { %v7074_v46 = vpop.f32.mrf.mxu0 }
0x1e0a   :  { %v2279_v51 = vadd.f32 %v7924_v18, %v2276_v45 }
0x1e0c   :  { %v2280_v52 = vmax.f32 %v2279_v51, 0.0 }
0x1e0e   :  { %7087 = vmatmul.mubr.msk.f32.vlgmr.msra.gmra.mxu0 %vm73_vm1, %v2280_v52 }
0x1e0f   :  { %7095 = vmatpush3.msk.msra.mxu0 %vm399_vm6, %v7821_v27  ;;  %7098 = vmatprep.mubr.msk.f32.mxu0 %vm7738_vm0, %v7737_v0 }
0x1e10   :  { %7096 = vmatprep.subr.mxu0 %v7737_v0 }
0x1e11   :  { %7097 = vmatpush3.msra.mxu0 %v7823_v28 }
0x1e12   :  { %7112 = vmatprep.subr.mxu0 %v7737_v0 }
0x1ece   :  { %v2350_v53 = vpop.f32.mrf.mxu0 }
0x1ecf   :  { %v2351_v54 = vadd.f32 %v7938_v24, %v2350_v53 }
0x1ed0   :  { %v7088_v56 = vpop.f32.mrf.mxu0 }
0x1ed1   :  { %v2354_v57 = vmax.f32 %v2351_v54, 0.0 }
0x1ed3   :  { %v2355_v58 = vmul.f32 %v7944_v29, %v2354_v57 }
0x1ed5   :  { %v2356_v59 = vadd.f32 %v7949_v32, %v2355_v58 }
0x1ed7   :  { %v2359_v27 = vsel %vm831_vm8, %v2356_v59, -inf  ;;  %6493 = vst.msk [vmem:[%s8885_s5 + $0xc] sm:$0xf] %vm831_vm8, %v2356_v59 }
0x1ed8   :  { %2360 = vmax.xlane.f32.xlu1 %v2359_v27 }
0x1f61   :  { %v2361_v28 = vpop.xlane.xlu1 %2360 }
0x1f62   :  { %vm2362_vm10 = vcmp.eq.f32.partialorder %v2356_v59, %v2361_v28 }
0x1f63   :  { %v2363_v60 = vsel %vm2362_vm10, %v7958_v38, 9 }
0x1f64   :  { %v2364_v61 = vsel %vm831_vm8, %v2363_v60, 2147483647  ;;  %v8252_v60 = vld [vmem:[#allocation2 + $0x50] sm:$0x1] }
0x1f65   :  { %v2366_v62 = vshra.s32 %v2364_v61, 16  ;;  %v2365_v1 = vand.u32 65535, %v2364_v61 }
0x1f67   :  { %v2368_v63 = vcvt.s32.f32 %v2366_v62  ;;  %v2367_v9 = vcvt.s32.f32 %v2365_v1 }
0x1f69   :  { %2369 = vmin.xlane.f32.xlu0 %v2368_v63 }
0x1ff2   :  { %v2370_v2 = vpop.xlane.xlu0 %2369 }
0x1ff3   :  { %vm2371_vm11 = vcmp.eq.f32.partialorder %v2368_v63, %v2370_v2  ;;  %v2376_v12 = vcvt.f32.s32 %v2370_v2 }
0x1ff4   :  { %v2372_v10 = vsel %vm2371_vm11, %v2367_v9, inf }
0x1ff5   :  { %2373 = vmin.xlane.f32.xlu0 %v2372_v10  ;;  %v2377_v47 = vshll.u32 %v2376_v12, 16 }
0x207e   :  { %v2374_v13 = vpop.xlane.xlu0 %2373 }
0x207f   :  { %v2375_v14 = vcvt.f32.s32 %v2374_v13 }
0x2081   :  { %v2378_v19 = vadd.s32 %v2377_v47, %v2375_v14  ;;  %v6509_v14 = vld [vmem:[%s8882_s2 + $0x14] sm:$0xf] }
0x2083   :  { %vm2379_vm12 = vcmp.eq.s32.totalorder %v7958_v38, %v2378_v19  ;;  %v8277_v19 = vld [vmem:[#allocation2 + $0x78] sm:$0xff] }
0x2084   :  { %v6494_v20 = vsel %vm2379_vm12, 1.0, %v7737_v0 }
0x2085   :  { %7099 = vmatmul.mubr.msk.f32.vlgmr.msra.gmra.mxu0 %vm395_vm7, %v6494_v20 }
0x2086   :  { %7113 = vmatpush3.msra.mxu0 %v7876_v3  ;;  %7120 = vmatprep.mubr.msk.f32.mxu0 %vm7738_vm0, %v7737_v0 }
0x2087   :  { %7114 = vmatprep.subr.mxu0 %v7737_v0 }
0x2088   :  { %7115 = vmatpush3.msra.mxu0 %v7878_v4 }
0x2089   :  { %7116 = vmatprep.subr.mxu0 %v7737_v0 }
0x208a   :  { %7117 = vmatpush3.msra.mxu0 %v7889_v7 }
0x208b   :  { %7118 = vmatprep.subr.mxu0 %v7737_v0 }
0x208c   :  { %7119 = vmatpush3.msra.mxu0 %v7896_v8 }
0x208d   :  { %7130 = vmatprep.subr.mxu0 %v7737_v0 }
0x2145   :  { %v2526_v50 = vpop.f32.mrf.mxu0 }
0x2146   :  { %v2527_v3 = vadd.f32 %v2526_v50, %v2453_v48  ;;  %v8287_v48 = vld [vmem:[#allocation2 + $0x68] sm:$0xff] }
0x2147   :  { %v7100_v21 = vpop.f32.mrf.mxu0 }
0x2148   :  { %v2530_v22 = vadd.f32 %v2527_v3, %v7844_v36 }
0x214a   :  { %7544 = vtanh.f32 %v2530_v22  ;;  %v6500_v4 = vmul.f32 -1.442695, %v2530_v22 }
0x214c   :  { %7546 = vpow2.f32 %v6500_v4 }
0x2157   :  { %v7545_v23 = vpop.eup %7544 }
0x2158   :  { %2539 = vrot.lane.b32.xlu1 %v7545_v23, %s7739_s1 }
0x2159   :  { %v7547_v7 = vpop.eup %7546 }
0x215a   :  { %v2534_v25 = vadd.f32 1.0, %v7547_v7  ;;  %v8298_v7 = vld [vmem:[#allocation2 + $0xa8] sm:$0xff] }
0x215c   :  { %7548 = vrcp.f32 %v2534_v25  ;;  %v8304_v25 = vld [vmem:[#allocation2 + $0xa0] sm:$0xff] }
0x2169   :  { %v7549_v26 = vpop.eup %7548 }
0x21ca   :  { %v2540_v8 = vpop.permute.xlu1 %2539 }
0x21cb   :  { %v2542_v30 = vmul.f32 %v7549_v26, %v2540_v8  ;;  %v8312_v8 = vld [vmem:[#allocation2 + $0x90] sm:$0xff] }
0x21cd   :  { %7550 = vtanh.f32 %v2542_v30 }
0x21da   :  { %v7551_v31 = vpop.eup %7550 }
0x21db   :  { %2545 = vrot.lane.b32.xlu0 %v7551_v31, %s7740_s14 }
0x224d   :  { %v2546_v33 = vpop.permute.xlu0 %2545 }
0x224e   :  { %v2548_v34 = vmul.f32 %v7549_v26, %v2546_v33  ;;  %v8308_v26 = vld [vmem:[#allocation2 + $0x98] sm:$0xff] }
0x2250   :  { %2550 = vrot.lane.b32.xlu1 %v2548_v34, %s7740_s14 }
0x22c2   :  { %v2551_v35 = vpop.permute.xlu1 %2550 }
0x22c3   :  { %7110 = vmatmul.mubr.msk.f32.vlgmr.msra.gmra.mxu1 %vm152_vm2, %v2551_v35 }
0x22c4   :  { %7124 = vmatpush3.msk.msra.mxu1 %vm399_vm6, %v7880_v5  ;;  %7127 = vmatprep.mubr.msk.f32.mxu1 %vm7738_vm0, %v7737_v0 }
0x22c5   :  { %7125 = vmatprep.subr.mxu1 %v7737_v0 }
0x22c6   :  { %7126 = vmatpush3.msra.mxu1 %v7885_v6 }
0x22c7   :  { %7128 = vmatmul.mubr.msk.f32.vlgmr.msra.gmra.mxu1 %vm395_vm7, %v6494_v20  ;;  %7137 = vmatprep.subr.mxu1 %v7737_v0  ;;  %v8283_v20 = vld [vmem:[#allocation2 + $0x70] sm:$0xff] }
0x22c8   :  { %7138 = vmatpush3.msk.msra.mxu1 %vm321_vm3, %v8227_v37  ;;  %7139 = vmatprep.mubr.msk.f32.mxu1 %vm7738_vm0, %v7737_v0 }
0x22c9   :  { %7149 = vmatprep.subr.mxu1 %v7737_v0 }
0x22cb   :  { %7140 = vmatmul.mubr.msk.f32.vlgmr.msra.gmra.mxu1 %vm317_vm4, %v6509_v14 }
0x22cc   :  { %7150 = vmatpush3.msra.mxu1 %v8277_v19  ;;  %7157 = vmatprep.mubr.msk.f32.mxu1 %vm7738_vm0, %v7737_v0 }
0x22cd   :  { %7151 = vmatprep.subr.mxu1 %v7737_v0 }
0x22ce   :  { %7152 = vmatpush3.msra.mxu1 %v8283_v20 }
0x22cf   :  { %7153 = vmatprep.subr.mxu1 %v7737_v0 }
0x22d0   :  { %7154 = vmatpush3.msra.mxu1 %v8287_v48 }
0x22d1   :  { %7155 = vmatprep.subr.mxu1 %v7737_v0 }
0x22d2   :  { %7156 = vmatpush3.msra.mxu1 %v8291_v49 }
0x22d3   :  { %7171 = vmatprep.subr.mxu1 %v7737_v0 }
0x2383   :  { %v2620_v5 = vpop.f32.mrf.mxu1 }
0x2384   :  { %v2621_v6 = vadd.f32 %v8237_v16, %v2620_v5 }
0x2385   :  { %v7111_v39 = vpop.f32.mrf.mxu1 }
0x2386   :  { %7552 = vtanh.f32 %v2621_v6  ;;  %v6502_v42 = vmul.f32 -1.442695, %v2621_v6 }
0x2387   :  { %v2783_v40 = vpop.f32.mrf.mxu1 }
0x2388   :  { %7554 = vpow2.f32 %v6502_v42 }
0x2389   :  { %v7129_v41 = vpop.f32.mrf.mxu1 }
0x238b   :  { %v2961_v30 = vpop.f32.mrf.mxu1 }
0x238d   :  { %v7141_v31 = vpop.f32.mrf.mxu1 }
0x238e   :  { %v8382_v31 = vld [vmem:[%s8884_s4 + $0x9] ss:$0 sm:$0xff] }
0x2393   :  { %v7553_v55 = vpop.eup %7552 }
0x2394   :  { %2632 = vrot.lane.b32.xlu1 %v7553_v55, %s7739_s1 }
0x2395   :  { %v7555_v43 = vpop.eup %7554 }
0x2396   :  { %v2627_v44 = vadd.f32 1.0, %v7555_v43 }
0x2398   :  { %7556 = vrcp.f32 %v2627_v44 }
0x23a5   :  { %v7557_v45 = vpop.eup %7556 }
0x2406   :  { %v2633_v46 = vpop.permute.xlu1 %2632 }
0x2407   :  { %v2635_v51 = vmul.f32 %v7557_v45, %v2633_v46 }
0x2409   :  { %7558 = vtanh.f32 %v2635_v51 }
0x2416   :  { %v7559_v52 = vpop.eup %7558 }
0x2417   :  { %2638 = vrot.lane.b32.xlu0 %v7559_v52, %s7740_s14  ;;  %v8321_v52 = vld [vmem:[#allocation2 + $0x88] sm:$0x1] }
0x2489   :  { %v2639_v53 = vpop.permute.xlu0 %2638 }
0x248a   :  { %v2641_v54 = vmul.f32 %v7557_v45, %v2639_v53  ;;  %v8328_v53 = vld [vmem:[#allocation2 + $0x80] sm:$0xff] }
0x248c   :  { %2643 = vrot.lane.b32.xlu1 %v2641_v54, %s7740_s14 }
0x24fe   :  { %v2644_v56 = vpop.permute.xlu1 %2643 }
0x24ff   :  { %7121 = vmatmul.mubr.msk.f32.vlgmr.msra.gmra.mxu0 %vm152_vm2, %v2644_v56 }
0x2500   :  { %7131 = vmatpush3.msra.mxu0 %v7913_v15  ;;  %7134 = vmatprep.mubr.msk.f32.mxu0 %vm7738_vm0, %v7737_v0  ;;  %v8259_v15 = vld [vmem:[#allocation2 + $0x48] sm:$0xff] }
0x2501   :  { %7132 = vmatprep.subr.mxu0 %v7737_v0 }
0x2502   :  { %7133 = vmatpush3.msra.mxu0 %v7917_v17 }
0x2503   :  { %7142 = vmatprep.subr.mxu0 %v7737_v0 }
0x25bf   :  { %v2713_v57 = vpop.f32.mrf.mxu0 }
0x25c0   :  { %v2784_v58 = vadd.f32 %v2783_v40, %v2713_v57 }
0x25c1   :  { %v7122_v59 = vpop.f32.mrf.mxu0 }
0x25c2   :  { %v2787_v27 = vadd.f32 %v7924_v18, %v2784_v58 }
0x25c4   :  { %v2788_v28 = vmax.f32 %v2787_v27, 0.0 }
0x25c6   :  { %7135 = vmatmul.mubr.msk.f32.vlgmr.msra.gmra.mxu0 %vm73_vm1, %v2788_v28 }
0x25c7   :  { %7143 = vmatpush3.msk.msra.mxu0 %vm399_vm6, %v8252_v60  ;;  %7146 = vmatprep.mubr.msk.f32.mxu0 %vm7738_vm0, %v7737_v0 }
0x25c8   :  { %7144 = vmatprep.subr.mxu0 %v7737_v0 }
0x25c9   :  { %7145 = vmatpush3.msra.mxu0 %v8259_v15 }
0x25ca   :  { %7160 = vmatprep.subr.mxu0 %v7737_v0 }
0x2686   :  { %v2858_v17 = vpop.f32.mrf.mxu0 }
0x2687   :  { %v2859_v18 = vadd.f32 %v7938_v24, %v2858_v17 }
0x2688   :  { %v7136_v61 = vpop.f32.mrf.mxu0 }
0x2689   :  { %v2862_v62 = vmax.f32 %v2859_v18, 0.0 }
0x268b   :  { %v2863_v63 = vmul.f32 %v7944_v29, %v2862_v62 }
0x268d   :  { %v2864_v1 = vadd.f32 %v7949_v32, %v2863_v63 }
0x268f   :  { %v2867_v2 = vsel %vm831_vm8, %v2864_v1, -inf  ;;  %6507 = vst.msk [vmem:[%s8885_s5 + $0x10] sm:$0xf] %vm831_vm8, %v2864_v1 }
0x2690   :  { %2868 = vmax.xlane.f32.xlu0 %v2867_v2 }
0x2719   :  { %v2869_v9 = vpop.xlane.xlu0 %2868 }
0x271a   :  { %vm2870_vm13 = vcmp.eq.f32.partialorder %v2864_v1, %v2869_v9 }
0x271b   :  { %v2871_v10 = vsel %vm2870_vm13, %v7958_v38, 9 }
0x271c   :  { %v2872_v24 = vsel %vm831_vm8, %v2871_v10, 2147483647 }
0x271d   :  { %v2874_v11 = vshra.s32 %v2872_v24, 16  ;;  %v2873_v29 = vand.u32 65535, %v2872_v24  ;;  %v8343_v24 = vld [vmem:[#allocation2 + $0xb8] sm:$0xff] }
0x271f   :  { %v2876_v12 = vcvt.s32.f32 %v2874_v11  ;;  %v2875_v32 = vcvt.s32.f32 %v2873_v29  ;;  %v8349_v11 = vld [vmem:[#allocation2 + $0xb0] sm:$0xff] }
0x2721   :  { %2877 = vmin.xlane.f32.xlu1 %v2876_v12 }
0x27aa   :  { %v2878_v13 = vpop.xlane.xlu1 %2877 }
0x27ab   :  { %vm2879_vm14 = vcmp.eq.f32.partialorder %v2876_v12, %v2878_v13  ;;  %v2884_v50 = vcvt.f32.s32 %v2878_v13 }
0x27ac   :  { %v2880_v47 = vsel %vm2879_vm14, %v2875_v32, inf  ;;  %v8356_v32 = vld [vmem:[%s8884_s4 + $0x6] ss:$0 sm:$0xff] }
0x27ad   :  { %2881 = vmin.xlane.f32.xlu0 %v2880_v47  ;;  %v2885_v21 = vshll.u32 %v2884_v50, 16 }
0x2836   :  { %v2882_v3 = vpop.xlane.xlu0 %2881 }
0x2837   :  { %v2883_v22 = vcvt.f32.s32 %v2882_v3  ;;  %v8370_v3 = vld [vmem:[%s8884_s4 + $0x7] ss:$0 sm:$0xff] }
0x2839   :  { %v2886_v23 = vadd.s32 %v2885_v21, %v2883_v22 }
0x283b   :  { %vm2887_vm15 = vcmp.eq.s32.totalorder %v7958_v38, %v2886_v23 }
0x283c   :  { %v6508_v4 = vsel %vm2887_vm15, 1.0, %v7737_v0 }
0x283d   :  { %7147 = vmatmul.mubr.msk.f32.vlgmr.msra.gmra.mxu0 %vm395_vm7, %v6508_v4 }
0x283e   :  { %7161 = vmatpush3.msra.mxu0 %v8298_v7  ;;  %7168 = vmatprep.mubr.msk.f32.mxu0 %vm7738_vm0, %v7737_v0 }
0x283f   :  { %7162 = vmatprep.subr.mxu0 %v7737_v0 }
0x2840   :  { %7163 = vmatpush3.msra.mxu0 %v8304_v25 }
0x2841   :  { %7164 = vmatprep.subr.mxu0 %v7737_v0 }
0x2842   :  { %7165 = vmatpush3.msra.mxu0 %v8308_v26 }
0x2843   :  { %7166 = vmatprep.subr.mxu0 %v7737_v0 }
0x2844   :  { %7167 = vmatpush3.msra.mxu0 %v8312_v8 }
0x2845   :  { %7178 = vmatprep.subr.mxu0 %v7737_v0 }
0x28fd   :  { %v3034_v33 = vpop.f32.mrf.mxu0 }
0x28fe   :  { %v3035_v34 = vadd.f32 %v3034_v33, %v2961_v30 }
0x28ff   :  { %v7148_v35 = vpop.f32.mrf.mxu0 }
0x2900   :  { %v3038_v5 = vadd.f32 %v3035_v34, %v7844_v36 }
0x2902   :  { %7560 = vtanh.f32 %v3038_v5  ;;  %v6514_v39 = vmul.f32 -1.442695, %v3038_v5 }
0x2904   :  { %7562 = vpow2.f32 %v6514_v39 }
0x290f   :  { %v7561_v6 = vpop.eup %7560 }
0x2910   :  { %3047 = vrot.lane.b32.xlu0 %v7561_v6, %s7739_s1 }
0x2911   :  { %v7563_v40 = vpop.eup %7562 }
0x2912   :  { %v3042_v41 = vadd.f32 1.0, %v7563_v40 }
0x2914   :  { %7564 = vrcp.f32 %v3042_v41 }
0x2921   :  { %v7565_v55 = vpop.eup %7564 }
0x2982   :  { %v3048_v42 = vpop.permute.xlu0 %3047 }
0x2983   :  { %v3050_v43 = vmul.f32 %v7565_v55, %v3048_v42 }
0x2985   :  { %7566 = vtanh.f32 %v3050_v43 }
0x2992   :  { %v7567_v44 = vpop.eup %7566 }
0x2993   :  { %3053 = vrot.lane.b32.xlu1 %v7567_v44, %s7740_s14  ;;  %v6523_v44 = vld [vmem:[%s8882_s2 + $0x18] sm:$0xf] }
0x2a05   :  { %v3054_v45 = vpop.permute.xlu1 %3053 }
0x2a06   :  { %v3056_v46 = vmul.f32 %v7565_v55, %v3054_v45 }
0x2a08   :  { %3058 = vrot.lane.b32.xlu1 %v3056_v46, %s7740_s14 }
0x2a7a   :  { %v3059_v51 = vpop.permute.xlu1 %3058 }
0x2a7b   :  { %7158 = vmatmul.mubr.msk.f32.vlgmr.msra.gmra.mxu1 %vm152_vm2, %v3059_v51 }
0x2a7c   :  { %7172 = vmatpush3.msk.msra.mxu1 %vm399_vm6, %v8321_v52  ;;  %7175 = vmatprep.mubr.msk.f32.mxu1 %vm7738_vm0, %v7737_v0 }
0x2a7d   :  { %7173 = vmatprep.subr.mxu1 %v7737_v0 }
0x2a7e   :  { %7174 = vmatpush3.msra.mxu1 %v8328_v53 }
0x2a7f   :  { %7176 = vmatmul.mubr.msk.f32.vlgmr.msra.gmra.mxu1 %vm395_vm7, %v6508_v4  ;;  %7185 = vmatprep.subr.mxu1 %v7737_v0  ;;  %v8376_v4 = vld [vmem:[%s8884_s4 + $0x8] ss:$0 sm:$0xff] }
0x2a80   :  { %7186 = vmatpush3.msk.msra.mxu1 %vm321_vm3, %v8227_v37  ;;  %7187 = vmatprep.mubr.msk.f32.mxu1 %vm7738_vm0, %v7737_v0 }
0x2a81   :  { %7197 = vmatprep.subr.mxu1 %v7737_v0 }
0x2a83   :  { %7188 = vmatmul.mubr.msk.f32.vlgmr.msra.gmra.mxu1 %vm317_vm4, %v6523_v44 }
0x2a84   :  { %7198 = vmatpush3.msra.mxu1 %v8277_v19  ;;  %7205 = vmatprep.mubr.msk.f32.mxu1 %vm7738_vm0, %v7737_v0 }
0x2a85   :  { %7199 = vmatprep.subr.mxu1 %v7737_v0 }
0x2a86   :  { %7200 = vmatpush3.msra.mxu1 %v8283_v20 }
0x2a87   :  { %7201 = vmatprep.subr.mxu1 %v7737_v0 }
0x2a88   :  { %7202 = vmatpush3.msra.mxu1 %v8287_v48 }
0x2a89   :  { %7203 = vmatprep.subr.mxu1 %v7737_v0 }
0x2a8a   :  { %7204 = vmatpush3.msra.mxu1 %v8291_v49 }
0x2a8b   :  { %7219 = vmatprep.subr.mxu1 %v7737_v0 }
0x2b3b   :  { %v3128_v54 = vpop.f32.mrf.mxu1 }
0x2b3c   :  { %v3129_v56 = vadd.f32 %v8237_v16, %v3128_v54 }
0x2b3d   :  { %v7159_v57 = vpop.f32.mrf.mxu1 }
0x2b3e   :  { %7568 = vtanh.f32 %v3129_v56  ;;  %v6516_v28 = vmul.f32 -1.442695, %v3129_v56 }
0x2b3f   :  { %v3291_v58 = vpop.f32.mrf.mxu1 }
0x2b40   :  { %7570 = vpow2.f32 %v6516_v28 }
0x2b41   :  { %v7177_v59 = vpop.f32.mrf.mxu1 }
0x2b4b   :  { %v7569_v27 = vpop.eup %7568 }
0x2b4c   :  { %3140 = vrot.lane.b32.xlu0 %v7569_v27, %s7739_s1 }
0x2b4d   :  { %v7571_v17 = vpop.eup %7570 }
0x2b4e   :  { %v3135_v18 = vadd.f32 1.0, %v7571_v17 }
0x2b50   :  { %7572 = vrcp.f32 %v3135_v18 }
0x2b5d   :  { %v7573_v61 = vpop.eup %7572 }
0x2bbe   :  { %v3141_v62 = vpop.permute.xlu0 %3140 }
0x2bbf   :  { %v3143_v63 = vmul.f32 %v7573_v61, %v3141_v62 }
0x2bc1   :  { %7574 = vtanh.f32 %v3143_v63 }
0x2bce   :  { %v7575_v1 = vpop.eup %7574 }
0x2bcf   :  { %3146 = vrot.lane.b32.xlu1 %v7575_v1, %s7740_s14 }
0x2c41   :  { %v3147_v2 = vpop.permute.xlu1 %3146 }
0x2c42   :  { %v3149_v9 = vmul.f32 %v7573_v61, %v3147_v2 }
0x2c44   :  { %3151 = vrot.lane.b32.xlu0 %v3149_v9, %s7740_s14 }
0x2cb6   :  { %v3152_v10 = vpop.permute.xlu0 %3151 }
0x2cb7   :  { %7169 = vmatmul.mubr.msk.f32.vlgmr.msra.gmra.mxu0 %vm152_vm2, %v3152_v10 }
0x2cb8   :  { %7179 = vmatpush3.msra.mxu0 %v8343_v24  ;;  %7182 = vmatprep.mubr.msk.f32.mxu0 %vm7738_vm0, %v7737_v0 }
0x2cb9   :  { %7180 = vmatprep.subr.mxu0 %v7737_v0 }
0x2cba   :  { %7181 = vmatpush3.msra.mxu0 %v8349_v11 }
0x2cbb   :  { %7190 = vmatprep.subr.mxu0 %v7737_v0 }
0x2d77   :  { %v3221_v12 = vpop.f32.mrf.mxu0 }
0x2d78   :  { %v3292_v29 = vadd.f32 %v3291_v58, %v3221_v12  ;;  %v3469_v58 = vpop.f32.mrf.mxu1 }
0x2d79   :  { %v7170_v13 = vpop.f32.mrf.mxu0 }
0x2d7a   :  { %v3295_v47 = vadd.f32 %v8356_v32, %v3292_v29  ;;  %v7189_v59 = vpop.f32.mrf.mxu1 }
0x2d7c   :  { %v3296_v14 = vmax.f32 %v3295_v47, 0.0 }
0x2d7e   :  { %7183 = vmatmul.mubr.msk.f32.vlgmr.msra.gmra.mxu0 %vm73_vm1, %v3296_v14 }
0x2d7f   :  { %7191 = vmatpush3.msk.msra.mxu0 %vm399_vm6, %v8252_v60  ;;  %7194 = vmatprep.mubr.msk.f32.mxu0 %vm7738_vm0, %v7737_v0 }
0x2d80   :  { %7192 = vmatprep.subr.mxu0 %v7737_v0 }
0x2d81   :  { %7193 = vmatpush3.msra.mxu0 %v8259_v15 }
0x2d82   :  { %7208 = vmatprep.subr.mxu0 %v7737_v0 }
0x2e3e   :  { %v3366_v50 = vpop.f32.mrf.mxu0 }
0x2e3f   :  { %v3367_v21 = vadd.f32 %v8370_v3, %v3366_v50 }
0x2e40   :  { %v7184_v22 = vpop.f32.mrf.mxu0 }
0x2e41   :  { %v3370_v23 = vmax.f32 %v3367_v21, 0.0 }
0x2e43   :  { %v3371_v30 = vmul.f32 %v8376_v4, %v3370_v23 }
0x2e45   :  { %v3372_v33 = vadd.f32 %v8382_v31, %v3371_v30 }
0x2e47   :  { %v3375_v34 = vsel %vm831_vm8, %v3372_v33, -inf  ;;  %6521 = vst.msk [vmem:[%s8885_s5 + $0x14] sm:$0xf] %vm831_vm8, %v3372_v33 }
0x2e48   :  { %3376 = vmax.xlane.f32.xlu1 %v3375_v34 }
0x2ed1   :  { %v3377_v35 = vpop.xlane.xlu1 %3376 }
0x2ed2   :  { %vm3378_vm5 = vcmp.eq.f32.partialorder %v3372_v33, %v3377_v35 }
0x2ed3   :  { %v3379_v5 = vsel %vm3378_vm5, %v7958_v38, 9 }
0x2ed4   :  { %v3380_v6 = vsel %vm831_vm8, %v3379_v5, 2147483647 }
0x2ed5   :  { %v3382_v39 = vshra.s32 %v3380_v6, 16  ;;  %v3381_v41 = vand.u32 65535, %v3380_v6 }
0x2ed7   :  { %v3384_v40 = vcvt.s32.f32 %v3382_v39  ;;  %v3383_v42 = vcvt.s32.f32 %v3381_v41 }
0x2ed9   :  { %3385 = vmin.xlane.f32.xlu0 %v3384_v40 }
0x2f62   :  { %v3386_v55 = vpop.xlane.xlu0 %3385 }
0x2f63   :  { %vm3387_vm9 = vcmp.eq.f32.partialorder %v3384_v40, %v3386_v55  ;;  %v3392_v45 = vcvt.f32.s32 %v3386_v55 }
0x2f64   :  { %v3388_v43 = vsel %vm3387_vm9, %v3383_v42, inf }
0x2f65   :  { %3389 = vmin.xlane.f32.xlu0 %v3388_v43  ;;  %v3393_v51 = vshll.u32 %v3392_v45, 16 }
0x2fee   :  { %v3390_v46 = vpop.xlane.xlu0 %3389 }
0x2fef   :  { %v3391_v54 = vcvt.f32.s32 %v3390_v46 }
0x2ff1   :  { %v3394_v56 = vadd.s32 %v3393_v51, %v3391_v54 }
0x2ff3   :  { %vm3395_vm10 = vcmp.eq.s32.totalorder %v7958_v38, %v3394_v56 }
0x2ff4   :  { %v6522_v57 = vsel %vm3395_vm10, 1.0, %v7737_v0 }
0x2ff5   :  { %7195 = vmatmul.mubr.msk.f32.vlgmr.msra.gmra.mxu0 %vm395_vm7, %v6522_v57 }
0x2ff6   :  { %7209 = vmatpush3.msra.mxu0 %v8298_v7  ;;  %7216 = vmatprep.mubr.msk.f32.mxu0 %vm7738_vm0, %v7737_v0 }
0x2ff7   :  { %7210 = vmatprep.subr.mxu0 %v7737_v0 }
0x2ff8   :  { %7211 = vmatpush3.msra.mxu0 %v8304_v25 }
0x2ff9   :  { %7212 = vmatprep.subr.mxu0 %v7737_v0 }
0x2ffa   :  { %7213 = vmatpush3.msra.mxu0 %v8308_v26 }
0x2ffb   :  { %7214 = vmatprep.subr.mxu0 %v7737_v0 }
0x2ffc   :  { %7215 = vmatpush3.msra.mxu0 %v8312_v8 }
0x2ffd   :  { %7226 = vmatprep.subr.mxu0 %v7737_v0 }
0x30b5   :  { %v3542_v27 = vpop.f32.mrf.mxu0 }
0x30b6   :  { %v3543_v28 = vadd.f32 %v3542_v27, %v3469_v58 }
0x30b7   :  { %v7196_v17 = vpop.f32.mrf.mxu0 }
0x30b8   :  { %v3546_v18 = vadd.f32 %v3543_v28, %v7844_v36 }
0x30ba   :  { %7576 = vtanh.f32 %v3546_v18  ;;  %v6528_v62 = vmul.f32 -1.442695, %v3546_v18 }
0x30bc   :  { %7578 = vpow2.f32 %v6528_v62 }
0x30c7   :  { %v7577_v61 = vpop.eup %7576 }
0x30c8   :  { %3555 = vrot.lane.b32.xlu1 %v7577_v61, %s7739_s1 }
0x30c9   :  { %v7579_v63 = vpop.eup %7578 }
0x30ca   :  { %v3550_v1 = vadd.f32 1.0, %v7579_v63 }
0x30cc   :  { %7580 = vrcp.f32 %v3550_v1 }
0x30d9   :  { %v7581_v2 = vpop.eup %7580 }
0x313a   :  { %v3556_v9 = vpop.permute.xlu1 %3555 }
0x313b   :  { %v3558_v10 = vmul.f32 %v7581_v2, %v3556_v9 }
0x313d   :  { %7582 = vtanh.f32 %v3558_v10 }
0x314a   :  { %v7583_v12 = vpop.eup %7582 }
0x314b   :  { %3561 = vrot.lane.b32.xlu0 %v7583_v12, %s7740_s14  ;;  %v6537_v12 = vld [vmem:[%s8882_s2 + $0x1c] sm:$0xf] }
0x31bd   :  { %v3562_v29 = vpop.permute.xlu0 %3561 }
0x31be   :  { %v3564_v13 = vmul.f32 %v7581_v2, %v3562_v29 }
0x31c0   :  { %3566 = vrot.lane.b32.xlu1 %v3564_v13, %s7740_s14 }
0x3232   :  { %v3567_v47 = vpop.permute.xlu1 %3566 }
0x3233   :  { %7206 = vmatmul.mubr.msk.f32.vlgmr.msra.gmra.mxu1 %vm152_vm2, %v3567_v47 }
0x3234   :  { %7220 = vmatpush3.msk.msra.mxu1 %vm399_vm6, %v8321_v52  ;;  %7223 = vmatprep.mubr.msk.f32.mxu1 %vm7738_vm0, %v7737_v0 }
0x3235   :  { %7221 = vmatprep.subr.mxu1 %v7737_v0 }
0x3236   :  { %7222 = vmatpush3.msra.mxu1 %v8328_v53 }
0x3237   :  { %7224 = vmatmul.mubr.msk.f32.vlgmr.msra.gmra.mxu1 %vm395_vm7, %v6522_v57  ;;  %7233 = vmatprep.subr.mxu1 %v7737_v0 }
0x3238   :  { %7234 = vmatpush3.msk.msra.mxu1 %vm321_vm3, %v8227_v37  ;;  %7235 = vmatprep.mubr.msk.f32.mxu1 %vm7738_vm0, %v7737_v0 }
0x3239   :  { %7245 = vmatprep.subr.mxu1 %v7737_v0 }
0x323b   :  { %7236 = vmatmul.mubr.msk.f32.vlgmr.msra.gmra.mxu1 %vm317_vm4, %v6537_v12 }
0x323c   :  { %7246 = vmatpush3.msra.mxu1 %v8277_v19  ;;  %7253 = vmatprep.mubr.msk.f32.mxu1 %vm7738_vm0, %v7737_v0 }
0x323d   :  { %7247 = vmatprep.subr.mxu1 %v7737_v0 }
0x323e   :  { %7248 = vmatpush3.msra.mxu1 %v8283_v20 }
0x323f   :  { %7249 = vmatprep.subr.mxu1 %v7737_v0 }
0x3240   :  { %7250 = vmatpush3.msra.mxu1 %v8287_v48 }
0x3241   :  { %7251 = vmatprep.subr.mxu1 %v7737_v0 }
0x3242   :  { %7252 = vmatpush3.msra.mxu1 %v8291_v49 }
0x3243   :  { %7267 = vmatprep.subr.mxu1 %v7737_v0 }
0x32f3   :  { %v3636_v14 = vpop.f32.mrf.mxu1 }
0x32f4   :  { %v3637_v50 = vadd.f32 %v8237_v16, %v3636_v14 }
0x32f5   :  { %v7207_v21 = vpop.f32.mrf.mxu1 }
0x32f6   :  { %7584 = vtanh.f32 %v3637_v50  ;;  %v6530_v33 = vmul.f32 -1.442695, %v3637_v50 }
0x32f7   :  { %v3799_v22 = vpop.f32.mrf.mxu1 }
0x32f8   :  { %7586 = vpow2.f32 %v6530_v33 }
0x32f9   :  { %v7225_v23 = vpop.f32.mrf.mxu1 }
0x3303   :  { %v7585_v30 = vpop.eup %7584 }
0x3304   :  { %3648 = vrot.lane.b32.xlu1 %v7585_v30, %s7739_s1 }
0x3305   :  { %v7587_v34 = vpop.eup %7586 }
0x3306   :  { %v3643_v35 = vadd.f32 1.0, %v7587_v34 }
0x3308   :  { %7588 = vrcp.f32 %v3643_v35 }
0x3315   :  { %v7589_v5 = vpop.eup %7588 }
0x3376   :  { %v3649_v6 = vpop.permute.xlu1 %3648 }
0x3377   :  { %v3651_v39 = vmul.f32 %v7589_v5, %v3649_v6 }
0x3379   :  { %7590 = vtanh.f32 %v3651_v39 }
0x3386   :  { %v7591_v40 = vpop.eup %7590 }
0x3387   :  { %3654 = vrot.lane.b32.xlu0 %v7591_v40, %s7740_s14 }
0x33f9   :  { %v3655_v41 = vpop.permute.xlu0 %3654 }
0x33fa   :  { %v3657_v55 = vmul.f32 %v7589_v5, %v3655_v41 }
0x33fc   :  { %3659 = vrot.lane.b32.xlu1 %v3657_v55, %s7740_s14 }
0x346e   :  { %v3660_v42 = vpop.permute.xlu1 %3659 }
0x346f   :  { %7217 = vmatmul.mubr.msk.f32.vlgmr.msra.gmra.mxu0 %vm152_vm2, %v3660_v42 }
0x3470   :  { %7227 = vmatpush3.msra.mxu0 %v8343_v24  ;;  %7230 = vmatprep.mubr.msk.f32.mxu0 %vm7738_vm0, %v7737_v0 }
0x3471   :  { %7228 = vmatprep.subr.mxu0 %v7737_v0 }
0x3472   :  { %7229 = vmatpush3.msra.mxu0 %v8349_v11 }
0x3473   :  { %7238 = vmatprep.subr.mxu0 %v7737_v0 }
0x352f   :  { %v3729_v43 = vpop.f32.mrf.mxu0 }
0x3530   :  { %v3800_v44 = vadd.f32 %v3799_v22, %v3729_v43  ;;  %v3977_v22 = vpop.f32.mrf.mxu1 }
0x3531   :  { %v7218_v45 = vpop.f32.mrf.mxu0 }
0x3532   :  { %v3803_v46 = vadd.f32 %v8356_v32, %v3800_v44  ;;  %v7237_v23 = vpop.f32.mrf.mxu1 }
0x3534   :  { %v3804_v51 = vmax.f32 %v3803_v46, 0.0 }
0x3536   :  { %7231 = vmatmul.mubr.msk.f32.vlgmr.msra.gmra.mxu0 %vm73_vm1, %v3804_v51 }
0x3537   :  { %7239 = vmatpush3.msk.msra.mxu0 %vm399_vm6, %v8252_v60  ;;  %7242 = vmatprep.mubr.msk.f32.mxu0 %vm7738_vm0, %v7737_v0 }
0x3538   :  { %7240 = vmatprep.subr.mxu0 %v7737_v0 }
0x3539   :  { %7241 = vmatpush3.msra.mxu0 %v8259_v15 }
0x353a   :  { %7256 = vmatprep.subr.mxu0 %v7737_v0 }
0x35f6   :  { %v3874_v54 = vpop.f32.mrf.mxu0 }
0x35f7   :  { %v3875_v56 = vadd.f32 %v8370_v3, %v3874_v54 }
0x35f8   :  { %v7232_v57 = vpop.f32.mrf.mxu0 }
0x35f9   :  { %v3878_v58 = vmax.f32 %v3875_v56, 0.0 }
0x35fb   :  { %v3879_v59 = vmul.f32 %v8376_v4, %v3878_v58 }
0x35fd   :  { %v3880_v27 = vadd.f32 %v8382_v31, %v3879_v59 }
0x35ff   :  { %v3883_v28 = vsel %vm831_vm8, %v3880_v27, -inf  ;;  %6535 = vst.msk [vmem:[%s8885_s5 + $0x18] sm:$0xf] %vm831_vm8, %v3880_v27 }
0x3600   :  { %3884 = vmax.xlane.f32.xlu0 %v3883_v28 }
0x3689   :  { %v3885_v17 = vpop.xlane.xlu0 %3884 }
0x368a   :  { %vm3886_vm11 = vcmp.eq.f32.partialorder %v3880_v27, %v3885_v17 }
0x368b   :  { %v3887_v18 = vsel %vm3886_vm11, %v7958_v38, 9 }
0x368c   :  { %v3888_v61 = vsel %vm831_vm8, %v3887_v18, 2147483647 }
0x368d   :  { %v3890_v62 = vshra.s32 %v3888_v61, 16  ;;  %v3889_v1 = vand.u32 65535, %v3888_v61 }
0x368f   :  { %v3892_v63 = vcvt.s32.f32 %v3890_v62  ;;  %v3891_v9 = vcvt.s32.f32 %v3889_v1 }
0x3691   :  { %3893 = vmin.xlane.f32.xlu1 %v3892_v63 }
0x371a   :  { %v3894_v2 = vpop.xlane.xlu1 %3893 }
0x371b   :  { %vm3895_vm12 = vcmp.eq.f32.partialorder %v3892_v63, %v3894_v2  ;;  %v3900_v29 = vcvt.f32.s32 %v3894_v2 }
0x371c   :  { %v3896_v10 = vsel %vm3895_vm12, %v3891_v9, inf }
0x371d   :  { %3897 = vmin.xlane.f32.xlu0 %v3896_v10  ;;  %v3901_v47 = vshll.u32 %v3900_v29, 16 }
0x37a6   :  { %v3898_v13 = vpop.xlane.xlu0 %3897 }
0x37a7   :  { %v3899_v14 = vcvt.f32.s32 %v3898_v13 }
0x37a9   :  { %v3902_v50 = vadd.s32 %v3901_v47, %v3899_v14 }
0x37ab   :  { %vm3903_vm13 = vcmp.eq.s32.totalorder %v7958_v38, %v3902_v50 }
0x37ac   :  { %v6536_v21 = vsel %vm3903_vm13, 1.0, %v7737_v0 }
0x37ad   :  { %7243 = vmatmul.mubr.msk.f32.vlgmr.msra.gmra.mxu0 %vm395_vm7, %v6536_v21 }
0x37ae   :  { %7257 = vmatpush3.msra.mxu0 %v8298_v7  ;;  %7264 = vmatprep.mubr.msk.f32.mxu0 %vm7738_vm0, %v7737_v0 }
0x37af   :  { %7258 = vmatprep.subr.mxu0 %v7737_v0 }
0x37b0   :  { %7259 = vmatpush3.msra.mxu0 %v8304_v25 }
0x37b1   :  { %7260 = vmatprep.subr.mxu0 %v7737_v0 }
0x37b2   :  { %7261 = vmatpush3.msra.mxu0 %v8308_v26 }
0x37b3   :  { %7262 = vmatprep.subr.mxu0 %v7737_v0 }
0x37b4   :  { %7263 = vmatpush3.msra.mxu0 %v8312_v8 }
0x37b5   :  { %7274 = vmatprep.subr.mxu0 %v7737_v0 }
0x386d   :  { %v4050_v30 = vpop.f32.mrf.mxu0 }
0x386e   :  { %v4051_v33 = vadd.f32 %v4050_v30, %v3977_v22 }
0x386f   :  { %v7244_v34 = vpop.f32.mrf.mxu0 }
0x3870   :  { %v4054_v35 = vadd.f32 %v4051_v33, %v7844_v36 }
0x3872   :  { %7592 = vtanh.f32 %v4054_v35  ;;  %v6542_v6 = vmul.f32 -1.442695, %v4054_v35 }
0x3874   :  { %7594 = vpow2.f32 %v6542_v6 }
0x387f   :  { %v7593_v5 = vpop.eup %7592 }
0x3880   :  { %4063 = vrot.lane.b32.xlu0 %v7593_v5, %s7739_s1 }
0x3881   :  { %v7595_v39 = vpop.eup %7594 }
0x3882   :  { %v4058_v40 = vadd.f32 1.0, %v7595_v39 }
0x3884   :  { %7596 = vrcp.f32 %v4058_v40 }
0x3891   :  { %v7597_v41 = vpop.eup %7596 }
0x38f2   :  { %v4064_v55 = vpop.permute.xlu0 %4063 }
0x38f3   :  { %v4066_v42 = vmul.f32 %v7597_v41, %v4064_v55 }
0x38f5   :  { %7598 = vtanh.f32 %v4066_v42 }
0x3902   :  { %v7599_v43 = vpop.eup %7598 }
0x3903   :  { %4069 = vrot.lane.b32.xlu1 %v7599_v43, %s7740_s14  ;;  %v6551_v43 = vld [vmem:[%s8882_s2 + $0x20] sm:$0xf] }
0x3975   :  { %v4070_v44 = vpop.permute.xlu1 %4069 }
0x3976   :  { %v4072_v45 = vmul.f32 %v7597_v41, %v4070_v44 }
0x3978   :  { %4074 = vrot.lane.b32.xlu1 %v4072_v45, %s7740_s14 }
0x39ea   :  { %v4075_v46 = vpop.permute.xlu1 %4074 }
0x39eb   :  { %7254 = vmatmul.mubr.msk.f32.vlgmr.msra.gmra.mxu1 %vm152_vm2, %v4075_v46 }
0x39ec   :  { %7268 = vmatpush3.msk.msra.mxu1 %vm399_vm6, %v8321_v52  ;;  %7271 = vmatprep.mubr.msk.f32.mxu1 %vm7738_vm0, %v7737_v0 }
0x39ed   :  { %7269 = vmatprep.subr.mxu1 %v7737_v0 }
0x39ee   :  { %7270 = vmatpush3.msra.mxu1 %v8328_v53 }
0x39ef   :  { %7272 = vmatmul.mubr.msk.f32.vlgmr.msra.gmra.mxu1 %vm395_vm7, %v6536_v21  ;;  %7281 = vmatprep.subr.mxu1 %v7737_v0 }
0x39f0   :  { %7282 = vmatpush3.msk.msra.mxu1 %vm321_vm3, %v8227_v37  ;;  %7283 = vmatprep.mubr.msk.f32.mxu1 %vm7738_vm0, %v7737_v0 }
0x39f1   :  { %7293 = vmatprep.subr.mxu1 %v7737_v0 }
0x39f3   :  { %7284 = vmatmul.mubr.msk.f32.vlgmr.msra.gmra.mxu1 %vm317_vm4, %v6551_v43 }
0x39f4   :  { %7294 = vmatpush3.msra.mxu1 %v8277_v19  ;;  %7301 = vmatprep.mubr.msk.f32.mxu1 %vm7738_vm0, %v7737_v0 }
0x39f5   :  { %7295 = vmatprep.subr.mxu1 %v7737_v0 }
0x39f6   :  { %7296 = vmatpush3.msra.mxu1 %v8283_v20 }
0x39f7   :  { %7297 = vmatprep.subr.mxu1 %v7737_v0 }
0x39f8   :  { %7298 = vmatpush3.msra.mxu1 %v8287_v48 }
0x39f9   :  { %7299 = vmatprep.subr.mxu1 %v7737_v0 }
0x39fa   :  { %7300 = vmatpush3.msra.mxu1 %v8291_v49 }
0x39fb   :  { %7315 = vmatprep.subr.mxu1 %v7737_v0 }
0x3aab   :  { %v4144_v51 = vpop.f32.mrf.mxu1 }
0x3aac   :  { %v4145_v54 = vadd.f32 %v8237_v16, %v4144_v51 }
0x3aad   :  { %v7255_v56 = vpop.f32.mrf.mxu1 }
0x3aae   :  { %7600 = vtanh.f32 %v4145_v54  ;;  %v6544_v27 = vmul.f32 -1.442695, %v4145_v54 }
0x3aaf   :  { %v4307_v57 = vpop.f32.mrf.mxu1 }
0x3ab0   :  { %7602 = vpow2.f32 %v6544_v27 }
0x3ab1   :  { %v7273_v58 = vpop.f32.mrf.mxu1 }
0x3abb   :  { %v7601_v59 = vpop.eup %7600 }
0x3abc   :  { %4156 = vrot.lane.b32.xlu0 %v7601_v59, %s7739_s1 }
0x3abd   :  { %v7603_v28 = vpop.eup %7602 }
0x3abe   :  { %v4151_v17 = vadd.f32 1.0, %v7603_v28 }
0x3ac0   :  { %7604 = vrcp.f32 %v4151_v17 }
0x3acd   :  { %v7605_v18 = vpop.eup %7604 }
0x3b2e   :  { %v4157_v61 = vpop.permute.xlu0 %4156 }
0x3b2f   :  { %v4159_v62 = vmul.f32 %v7605_v18, %v4157_v61 }
0x3b31   :  { %7606 = vtanh.f32 %v4159_v62 }
0x3b3e   :  { %v7607_v63 = vpop.eup %7606 }
0x3b3f   :  { %4162 = vrot.lane.b32.xlu1 %v7607_v63, %s7740_s14 }
0x3bb1   :  { %v4163_v1 = vpop.permute.xlu1 %4162 }
0x3bb2   :  { %v4165_v2 = vmul.f32 %v7605_v18, %v4163_v1 }
0x3bb4   :  { %4167 = vrot.lane.b32.xlu0 %v4165_v2, %s7740_s14 }
0x3c26   :  { %v4168_v9 = vpop.permute.xlu0 %4167 }
0x3c27   :  { %7265 = vmatmul.mubr.msk.f32.vlgmr.msra.gmra.mxu0 %vm152_vm2, %v4168_v9 }
0x3c28   :  { %7275 = vmatpush3.msra.mxu0 %v8343_v24  ;;  %7278 = vmatprep.mubr.msk.f32.mxu0 %vm7738_vm0, %v7737_v0 }
0x3c29   :  { %7276 = vmatprep.subr.mxu0 %v7737_v0 }
0x3c2a   :  { %7277 = vmatpush3.msra.mxu0 %v8349_v11 }
0x3c2b   :  { %7286 = vmatprep.subr.mxu0 %v7737_v0 }
0x3ce7   :  { %v4237_v10 = vpop.f32.mrf.mxu0 }
0x3ce8   :  { %v4308_v12 = vadd.f32 %v4307_v57, %v4237_v10  ;;  %v4485_v57 = vpop.f32.mrf.mxu1 }
0x3ce9   :  { %v7266_v29 = vpop.f32.mrf.mxu0 }
0x3cea   :  { %v4311_v13 = vadd.f32 %v8356_v32, %v4308_v12  ;;  %v7285_v58 = vpop.f32.mrf.mxu1 }
0x3cec   :  { %v4312_v47 = vmax.f32 %v4311_v13, 0.0 }
0x3cee   :  { %7279 = vmatmul.mubr.msk.f32.vlgmr.msra.gmra.mxu0 %vm73_vm1, %v4312_v47 }
0x3cef   :  { %7287 = vmatpush3.msk.msra.mxu0 %vm399_vm6, %v8252_v60  ;;  %7290 = vmatprep.mubr.msk.f32.mxu0 %vm7738_vm0, %v7737_v0 }
0x3cf0   :  { %7288 = vmatprep.subr.mxu0 %v7737_v0 }
0x3cf1   :  { %7289 = vmatpush3.msra.mxu0 %v8259_v15 }
0x3cf2   :  { %7304 = vmatprep.subr.mxu0 %v7737_v0 }
0x3dae   :  { %v4382_v14 = vpop.f32.mrf.mxu0 }
0x3daf   :  { %v4383_v50 = vadd.f32 %v8370_v3, %v4382_v14 }
0x3db0   :  { %v7280_v21 = vpop.f32.mrf.mxu0 }
0x3db1   :  { %v4386_v22 = vmax.f32 %v4383_v50, 0.0 }
0x3db3   :  { %v4387_v23 = vmul.f32 %v8376_v4, %v4386_v22 }
0x3db5   :  { %v4388_v30 = vadd.f32 %v8382_v31, %v4387_v23 }
0x3db7   :  { %v4391_v33 = vsel %vm831_vm8, %v4388_v30, -inf  ;;  %6549 = vst.msk [vmem:[%s8885_s5 + $0x1c] sm:$0xf] %vm831_vm8, %v4388_v30 }
0x3db8   :  { %4392 = vmax.xlane.f32.xlu1 %v4391_v33 }
0x3e41   :  { %v4393_v34 = vpop.xlane.xlu1 %4392 }
0x3e42   :  { %vm4394_vm14 = vcmp.eq.f32.partialorder %v4388_v30, %v4393_v34 }
0x3e43   :  { %v4395_v35 = vsel %vm4394_vm14, %v7958_v38, 9 }
0x3e44   :  { %v4396_v5 = vsel %vm831_vm8, %v4395_v35, 2147483647 }
0x3e45   :  { %v4398_v6 = vshra.s32 %v4396_v5, 16  ;;  %v4397_v40 = vand.u32 65535, %v4396_v5 }
0x3e47   :  { %v4400_v39 = vcvt.s32.f32 %v4398_v6  ;;  %v4399_v55 = vcvt.s32.f32 %v4397_v40 }
0x3e49   :  { %4401 = vmin.xlane.f32.xlu0 %v4400_v39 }
0x3ed2   :  { %v4402_v41 = vpop.xlane.xlu0 %4401 }
0x3ed3   :  { %vm4403_vm15 = vcmp.eq.f32.partialorder %v4400_v39, %v4402_v41  ;;  %v4408_v44 = vcvt.f32.s32 %v4402_v41 }
0x3ed4   :  { %v4404_v42 = vsel %vm4403_vm15, %v4399_v55, inf }
0x3ed5   :  { %4405 = vmin.xlane.f32.xlu0 %v4404_v42  ;;  %v4409_v46 = vshll.u32 %v4408_v44, 16 }
0x3f5e   :  { %v4406_v45 = vpop.xlane.xlu0 %4405 }
0x3f5f   :  { %v4407_v51 = vcvt.f32.s32 %v4406_v45 }
0x3f61   :  { %v4410_v54 = vadd.s32 %v4409_v46, %v4407_v51 }
0x3f63   :  { %vm4411_vm5 = vcmp.eq.s32.totalorder %v7958_v38, %v4410_v54 }
0x3f64   :  { %v6550_v56 = vsel %vm4411_vm5, 1.0, %v7737_v0 }
0x3f65   :  { %7291 = vmatmul.mubr.msk.f32.vlgmr.msra.gmra.mxu0 %vm395_vm7, %v6550_v56 }
0x3f66   :  { %7305 = vmatpush3.msra.mxu0 %v8298_v7  ;;  %7312 = vmatprep.mubr.msk.f32.mxu0 %vm7738_vm0, %v7737_v0 }
0x3f67   :  { %7306 = vmatprep.subr.mxu0 %v7737_v0 }
0x3f68   :  { %7307 = vmatpush3.msra.mxu0 %v8304_v25 }
0x3f69   :  { %7308 = vmatprep.subr.mxu0 %v7737_v0 }
0x3f6a   :  { %7309 = vmatpush3.msra.mxu0 %v8308_v26 }
0x3f6b   :  { %7310 = vmatprep.subr.mxu0 %v7737_v0 }
0x3f6c   :  { %7311 = vmatpush3.msra.mxu0 %v8312_v8 }
0x3f6d   :  { %7322 = vmatprep.subr.mxu0 %v7737_v0 }
0x4025   :  { %v4558_v59 = vpop.f32.mrf.mxu0 }
0x4026   :  { %v4559_v27 = vadd.f32 %v4558_v59, %v4485_v57 }
0x4027   :  { %v7292_v28 = vpop.f32.mrf.mxu0 }
0x4028   :  { %v4562_v17 = vadd.f32 %v4559_v27, %v7844_v36 }
0x402a   :  { %7608 = vtanh.f32 %v4562_v17  ;;  %v6556_v61 = vmul.f32 -1.442695, %v4562_v17 }
0x402c   :  { %7610 = vpow2.f32 %v6556_v61 }
0x4037   :  { %v7609_v18 = vpop.eup %7608 }
0x4038   :  { %4571 = vrot.lane.b32.xlu1 %v7609_v18, %s7739_s1 }
0x4039   :  { %v7611_v62 = vpop.eup %7610 }
0x403a   :  { %v4566_v63 = vadd.f32 1.0, %v7611_v62 }
0x403c   :  { %7612 = vrcp.f32 %v4566_v63  ;;  %v6565_v63 = vld [vmem:[%s8882_s2 + $0x24] sm:$0xf] }
0x4049   :  { %v7613_v1 = vpop.eup %7612 }
0x40aa   :  { %v4572_v2 = vpop.permute.xlu1 %4571 }
0x40ab   :  { %v4574_v9 = vmul.f32 %v7613_v1, %v4572_v2 }
0x40ad   :  { %7614 = vtanh.f32 %v4574_v9 }
0x40ba   :  { %v7615_v10 = vpop.eup %7614 }
0x40bb   :  { %4577 = vrot.lane.b32.xlu0 %v7615_v10, %s7740_s14 }
0x412d   :  { %v4578_v12 = vpop.permute.xlu0 %4577 }
0x412e   :  { %v4580_v29 = vmul.f32 %v7613_v1, %v4578_v12 }
0x4130   :  { %4582 = vrot.lane.b32.xlu1 %v4580_v29, %s7740_s14 }
0x41a2   :  { %v4583_v13 = vpop.permute.xlu1 %4582 }
0x41a3   :  { %7302 = vmatmul.mubr.msk.f32.vlgmr.msra.gmra.mxu1 %vm152_vm2, %v4583_v13 }
0x41a4   :  { %7316 = vmatpush3.msk.msra.mxu1 %vm399_vm6, %v8321_v52  ;;  %7319 = vmatprep.mubr.msk.f32.mxu1 %vm7738_vm0, %v7737_v0 }
0x41a5   :  { %7317 = vmatprep.subr.mxu1 %v7737_v0 }
0x41a6   :  { %7318 = vmatpush3.msra.mxu1 %v8328_v53 }
0x41a7   :  { %7320 = vmatmul.mubr.msk.f32.vlgmr.msra.gmra.mxu1 %vm395_vm7, %v6550_v56  ;;  %7329 = vmatprep.subr.mxu1 %v7737_v0 }
0x41a8   :  { %7330 = vmatpush3.msk.msra.mxu1 %vm321_vm3, %v8227_v37  ;;  %7331 = vmatprep.mubr.msk.f32.mxu1 %vm7738_vm0, %v7737_v0 }
0x41a9   :  { %7341 = vmatprep.subr.mxu1 %v7737_v0 }
0x41ab   :  { %7332 = vmatmul.mubr.msk.f32.vlgmr.msra.gmra.mxu1 %vm317_vm4, %v6565_v63 }
0x41ac   :  { %7342 = vmatpush3.msra.mxu1 %v8277_v19  ;;  %7349 = vmatprep.mubr.msk.f32.mxu1 %vm7738_vm0, %v7737_v0 }
0x41ad   :  { %7343 = vmatprep.subr.mxu1 %v7737_v0 }
0x41ae   :  { %7344 = vmatpush3.msra.mxu1 %v8283_v20 }
0x41af   :  { %7345 = vmatprep.subr.mxu1 %v7737_v0 }
0x41b0   :  { %7346 = vmatpush3.msra.mxu1 %v8287_v48 }
0x41b1   :  { %7347 = vmatprep.subr.mxu1 %v7737_v0 }
0x41b2   :  { %7348 = vmatpush3.msra.mxu1 %v8291_v49 }
0x41b3   :  { %7363 = vmatprep.subr.mxu1 %v7737_v0 }
0x4263   :  { %v4652_v47 = vpop.f32.mrf.mxu1 }
0x4264   :  { %v4653_v14 = vadd.f32 %v8237_v16, %v4652_v47 }
0x4265   :  { %v7303_v50 = vpop.f32.mrf.mxu1 }
0x4266   :  { %7616 = vtanh.f32 %v4653_v14  ;;  %v6558_v30 = vmul.f32 -1.442695, %v4653_v14 }
0x4267   :  { %v4815_v21 = vpop.f32.mrf.mxu1 }
0x4268   :  { %7618 = vpow2.f32 %v6558_v30 }
0x4269   :  { %v7321_v22 = vpop.f32.mrf.mxu1 }
0x426b   :  { %v4993_v20 = vpop.f32.mrf.mxu1 }
0x426d   :  { %v7333_v48 = vpop.f32.mrf.mxu1 }
0x426e   :  { %v8721_v48 = vld [vmem:[#allocation2 + $0x60] sm:$0xff] }
0x4273   :  { %v7617_v23 = vpop.eup %7616 }
0x4274   :  { %4664 = vrot.lane.b32.xlu1 %v7617_v23, %s7739_s1 }
0x4275   :  { %v7619_v33 = vpop.eup %7618 }
0x4276   :  { %v4659_v34 = vadd.f32 1.0, %v7619_v33 }
0x4278   :  { %7620 = vrcp.f32 %v4659_v34  ;;  %v8657_v34 = vld [vmem:[#allocation2 + $0x58] sm:$0x7f] }
0x4285   :  { %v7621_v37 = vpop.eup %7620 }
0x42e6   :  { %v4665_v35 = vpop.permute.xlu1 %4664 }
0x42e7   :  { %v4667_v5 = vmul.f32 %v7621_v37, %v4665_v35 }
0x42e9   :  { %7622 = vtanh.f32 %v4667_v5 }
0x42f6   :  { %v7623_v6 = vpop.eup %7622 }
0x42f7   :  { %4670 = vrot.lane.b32.xlu0 %v7623_v6, %s7740_s14 }
0x4369   :  { %v4671_v16 = vpop.permute.xlu0 %4670 }
0x436a   :  { %v4673_v39 = vmul.f32 %v7621_v37, %v4671_v16  ;;  %v8667_v37 = vld [vmem:[%s8884_s4 + $0x5] ss:$0 sm:$0xff] }
0x436c   :  { %4675 = vrot.lane.b32.xlu1 %v4673_v39, %s7740_s14 }
0x43de   :  { %v4676_v40 = vpop.permute.xlu1 %4675 }
0x43df   :  { %7313 = vmatmul.mubr.msk.f32.vlgmr.msra.gmra.mxu0 %vm152_vm2, %v4676_v40 }
0x43e0   :  { %7323 = vmatpush3.msra.mxu0 %v8343_v24  ;;  %7326 = vmatprep.mubr.msk.f32.mxu0 %vm7738_vm0, %v7737_v0 }
0x43e1   :  { %7324 = vmatprep.subr.mxu0 %v7737_v0 }
0x43e2   :  { %7325 = vmatpush3.msra.mxu0 %v8349_v11 }
0x43e3   :  { %7334 = vmatprep.subr.mxu0 %v7737_v0 }
0x449f   :  { %v4745_v41 = vpop.f32.mrf.mxu0 }
0x44a0   :  { %v4816_v55 = vadd.f32 %v4815_v21, %v4745_v41 }
0x44a1   :  { %v7314_v42 = vpop.f32.mrf.mxu0 }
0x44a2   :  { %v4819_v43 = vadd.f32 %v8356_v32, %v4816_v55 }
0x44a4   :  { %v4820_v44 = vmax.f32 %v4819_v43, 0.0 }
0x44a6   :  { %7327 = vmatmul.mubr.msk.f32.vlgmr.msra.gmra.mxu0 %vm73_vm1, %v4820_v44 }
0x44a7   :  { %7335 = vmatpush3.msk.msra.mxu0 %vm399_vm6, %v8252_v60  ;;  %7338 = vmatprep.mubr.msk.f32.mxu0 %vm7738_vm0, %v7737_v0 }
0x44a8   :  { %7336 = vmatprep.subr.mxu0 %v7737_v0 }
0x44a9   :  { %7337 = vmatpush3.msra.mxu0 %v8259_v15 }
0x44aa   :  { %7352 = vmatprep.subr.mxu0 %v7737_v0 }
0x4566   :  { %v4890_v45 = vpop.f32.mrf.mxu0 }
0x4567   :  { %v4891_v46 = vadd.f32 %v8370_v3, %v4890_v45 }
0x4568   :  { %v7328_v51 = vpop.f32.mrf.mxu0 }
0x4569   :  { %v4894_v54 = vmax.f32 %v4891_v46, 0.0 }
0x456b   :  { %v4895_v56 = vmul.f32 %v8376_v4, %v4894_v54 }
0x456d   :  { %v4896_v57 = vadd.f32 %v8382_v31, %v4895_v56 }
0x456f   :  { %v4899_v60 = vsel %vm831_vm8, %v4896_v57, -inf  ;;  %6563 = vst.msk [vmem:[%s8885_s5 + $0x20] sm:$0xf] %vm831_vm8, %v4896_v57 }
0x4570   :  { %4900 = vmax.xlane.f32.xlu0 %v4899_v60 }
0x45f9   :  { %v4901_v15 = vpop.xlane.xlu0 %4900 }
0x45fa   :  { %vm4902_vm9 = vcmp.eq.f32.partialorder %v4896_v57, %v4901_v15 }
0x45fb   :  { %v4903_v58 = vsel %vm4902_vm9, %v7958_v38, 9 }
0x45fc   :  { %v4904_v59 = vsel %vm831_vm8, %v4903_v58, 2147483647  ;;  %v8682_v58 = vld [vmem:[#allocation2 + $0x50] sm:$0x1] }
0x45fd   :  { %v4906_v27 = vshra.s32 %v4904_v59, 16  ;;  %v4905_v17 = vand.u32 65535, %v4904_v59 }
0x45ff   :  { %v4908_v28 = vcvt.s32.f32 %v4906_v27  ;;  %v4907_v61 = vcvt.s32.f32 %v4905_v17 }
0x4601   :  { %4909 = vmin.xlane.f32.xlu1 %v4908_v28 }
0x468a   :  { %v4910_v18 = vpop.xlane.xlu1 %4909 }
0x468b   :  { %vm4911_vm10 = vcmp.eq.f32.partialorder %v4908_v28, %v4910_v18  ;;  %v4916_v1 = vcvt.f32.s32 %v4910_v18 }
0x468c   :  { %v4912_v62 = vsel %vm4911_vm10, %v4907_v61, inf }
0x468d   :  { %4913 = vmin.xlane.f32.xlu0 %v4912_v62  ;;  %v4917_v19 = vshll.u32 %v4916_v1, 16 }
0x4716   :  { %v4914_v2 = vpop.xlane.xlu0 %4913 }
0x4717   :  { %v4915_v9 = vcvt.f32.s32 %v4914_v2 }
0x4719   :  { %v4918_v10 = vadd.s32 %v4917_v19, %v4915_v9  ;;  %v6579_v9 = vld [vmem:[%s8882_s2 + $0x28] sm:$0xf] }
0x471b   :  { %vm4919_vm11 = vcmp.eq.s32.totalorder %v7958_v38, %v4918_v10  ;;  %v8707_v10 = vld [vmem:[#allocation2 + $0x78] sm:$0xff] }
0x471c   :  { %v6564_v12 = vsel %vm4919_vm11, 1.0, %v7737_v0 }
0x471d   :  { %7339 = vmatmul.mubr.msk.f32.vlgmr.msra.gmra.mxu0 %vm395_vm7, %v6564_v12 }
0x471e   :  { %7353 = vmatpush3.msra.mxu0 %v8298_v7  ;;  %7360 = vmatprep.mubr.msk.f32.mxu0 %vm7738_vm0, %v7737_v0 }
0x471f   :  { %7354 = vmatprep.subr.mxu0 %v7737_v0 }
0x4720   :  { %7355 = vmatpush3.msra.mxu0 %v8304_v25 }
0x4721   :  { %7356 = vmatprep.subr.mxu0 %v7737_v0 }
0x4722   :  { %7357 = vmatpush3.msra.mxu0 %v8308_v26 }
0x4723   :  { %7358 = vmatprep.subr.mxu0 %v7737_v0 }
0x4724   :  { %7359 = vmatpush3.msra.mxu0 %v8312_v8 }
0x4725   :  { %7370 = vmatprep.subr.mxu0 %v7737_v0 }
0x47dd   :  { %v5066_v49 = vpop.f32.mrf.mxu0 }
0x47de   :  { %v5067_v7 = vadd.f32 %v5066_v49, %v4993_v20  ;;  %v8717_v20 = vld [vmem:[#allocation2 + $0x68] sm:$0xff] }
0x47df   :  { %v7340_v29 = vpop.f32.mrf.mxu0 }
0x47e0   :  { %v5070_v13 = vadd.f32 %v5067_v7, %v7844_v36 }
0x47e2   :  { %7624 = vtanh.f32 %v5070_v13  ;;  %v6570_v25 = vmul.f32 -1.442695, %v5070_v13 }
0x47e4   :  { %7626 = vpow2.f32 %v6570_v25 }
0x47ef   :  { %v7625_v47 = vpop.eup %7624 }
0x47f0   :  { %5079 = vrot.lane.b32.xlu0 %v7625_v47, %s7739_s1 }
0x47f1   :  { %v7627_v26 = vpop.eup %7626 }
0x47f2   :  { %v5074_v14 = vadd.f32 1.0, %v7627_v26  ;;  %v8728_v26 = vld [vmem:[#allocation2 + $0xa8] sm:$0xff] }
0x47f4   :  { %7628 = vrcp.f32 %v5074_v14  ;;  %v8734_v14 = vld [vmem:[#allocation2 + $0xa0] sm:$0xff] }
0x4801   :  { %v7629_v50 = vpop.eup %7628 }
0x4862   :  { %v5080_v8 = vpop.permute.xlu0 %5079 }
0x4863   :  { %v5082_v21 = vmul.f32 %v7629_v50, %v5080_v8  ;;  %v8742_v8 = vld [vmem:[#allocation2 + $0x90] sm:$0xff] }
0x4865   :  { %7630 = vtanh.f32 %v5082_v21 }
0x4872   :  { %v7631_v22 = vpop.eup %7630 }
0x4873   :  { %5085 = vrot.lane.b32.xlu1 %v7631_v22, %s7740_s14 }
0x48e5   :  { %v5086_v23 = vpop.permute.xlu1 %5085 }
0x48e6   :  { %v5088_v30 = vmul.f32 %v7629_v50, %v5086_v23  ;;  %v8738_v50 = vld [vmem:[#allocation2 + $0x98] sm:$0xff] }
0x48e8   :  { %5090 = vrot.lane.b32.xlu1 %v5088_v30, %s7740_s14 }
0x495a   :  { %v5091_v33 = vpop.permute.xlu1 %5090 }
0x495b   :  { %7350 = vmatmul.mubr.msk.f32.vlgmr.msra.gmra.mxu1 %vm152_vm2, %v5091_v33 }
0x495c   :  { %7364 = vmatpush3.msk.msra.mxu1 %vm399_vm6, %v8321_v52  ;;  %7367 = vmatprep.mubr.msk.f32.mxu1 %vm7738_vm0, %v7737_v0 }
0x495d   :  { %7365 = vmatprep.subr.mxu1 %v7737_v0 }
0x495e   :  { %7366 = vmatpush3.msra.mxu1 %v8328_v53 }
0x495f   :  { %7368 = vmatmul.mubr.msk.f32.vlgmr.msra.gmra.mxu1 %vm395_vm7, %v6564_v12  ;;  %7377 = vmatprep.subr.mxu1 %v7737_v0  ;;  %v8713_v12 = vld [vmem:[#allocation2 + $0x70] sm:$0xff] }
0x4960   :  { %7378 = vmatpush3.msk.msra.mxu1 %vm321_vm3, %v8657_v34  ;;  %7379 = vmatprep.mubr.msk.f32.mxu1 %vm7738_vm0, %v7737_v0 }
0x4961   :  { %7389 = vmatprep.subr.mxu1 %v7737_v0 }
0x4963   :  { %7380 = vmatmul.mubr.msk.f32.vlgmr.msra.gmra.mxu1 %vm317_vm4, %v6579_v9 }
0x4964   :  { %7390 = vmatpush3.msra.mxu1 %v8707_v10  ;;  %7397 = vmatprep.mubr.msk.f32.mxu1 %vm7738_vm0, %v7737_v0 }
0x4965   :  { %7391 = vmatprep.subr.mxu1 %v7737_v0 }
0x4966   :  { %7392 = vmatpush3.msra.mxu1 %v8713_v12 }
0x4967   :  { %7393 = vmatprep.subr.mxu1 %v7737_v0 }
0x4968   :  { %7394 = vmatpush3.msra.mxu1 %v8717_v20 }
0x4969   :  { %7395 = vmatprep.subr.mxu1 %v7737_v0 }
0x496a   :  { %7396 = vmatpush3.msra.mxu1 %v8721_v48 }
0x496b   :  { %7411 = vmatprep.subr.mxu1 %v7737_v0 }
0x4a1b   :  { %v5160_v52 = vpop.f32.mrf.mxu1 }
0x4a1c   :  { %v5161_v53 = vadd.f32 %v8667_v37, %v5160_v52 }
0x4a1d   :  { %v7351_v35 = vpop.f32.mrf.mxu1 }
0x4a1e   :  { %7632 = vtanh.f32 %v5161_v53  ;;  %v6572_v39 = vmul.f32 -1.442695, %v5161_v53 }
0x4a1f   :  { %v5323_v5 = vpop.f32.mrf.mxu1 }
0x4a20   :  { %7634 = vpow2.f32 %v6572_v39 }
0x4a21   :  { %v7369_v6 = vpop.f32.mrf.mxu1 }
0x4a23   :  { %v5501_v21 = vpop.f32.mrf.mxu1 }
0x4a25   :  { %v7381_v22 = vpop.f32.mrf.mxu1 }
0x4a2b   :  { %v7633_v16 = vpop.eup %7632 }
0x4a2c   :  { %5172 = vrot.lane.b32.xlu0 %v7633_v16, %s7739_s1 }
0x4a2d   :  { %v7635_v40 = vpop.eup %7634 }
0x4a2e   :  { %v5167_v41 = vadd.f32 1.0, %v7635_v40 }
0x4a30   :  { %7636 = vrcp.f32 %v5167_v41 }
0x4a3d   :  { %v7637_v55 = vpop.eup %7636 }
0x4a9e   :  { %v5173_v42 = vpop.permute.xlu0 %5172 }
0x4a9f   :  { %v5175_v43 = vmul.f32 %v7637_v55, %v5173_v42 }
0x4aa1   :  { %7638 = vtanh.f32 %v5175_v43 }
0x4aae   :  { %v7639_v44 = vpop.eup %7638 }
0x4aaf   :  { %5178 = vrot.lane.b32.xlu1 %v7639_v44, %s7740_s14  ;;  %v8751_v44 = vld [vmem:[#allocation2 + $0x88] sm:$0x1] }
0x4b21   :  { %v5179_v45 = vpop.permute.xlu1 %5178 }
0x4b22   :  { %v5181_v46 = vmul.f32 %v7637_v55, %v5179_v45  ;;  %v8758_v45 = vld [vmem:[#allocation2 + $0x80] sm:$0xff] }
0x4b24   :  { %5183 = vrot.lane.b32.xlu0 %v5181_v46, %s7740_s14 }
0x4b96   :  { %v5184_v51 = vpop.permute.xlu0 %5183 }
0x4b97   :  { %7361 = vmatmul.mubr.msk.f32.vlgmr.msra.gmra.mxu0 %vm152_vm2, %v5184_v51 }
0x4b98   :  { %7371 = vmatpush3.msra.mxu0 %v8343_v24  ;;  %7374 = vmatprep.mubr.msk.f32.mxu0 %vm7738_vm0, %v7737_v0  ;;  %v8689_v24 = vld [vmem:[#allocation2 + $0x48] sm:$0xff] }
0x4b99   :  { %7372 = vmatprep.subr.mxu0 %v7737_v0 }
0x4b9a   :  { %7373 = vmatpush3.msra.mxu0 %v8349_v11 }
0x4b9b   :  { %7382 = vmatprep.subr.mxu0 %v7737_v0 }
0x4c57   :  { %v5253_v54 = vpop.f32.mrf.mxu0 }
0x4c58   :  { %v5324_v56 = vadd.f32 %v5323_v5, %v5253_v54 }
0x4c59   :  { %v7362_v57 = vpop.f32.mrf.mxu0 }
0x4c5a   :  { %v5327_v60 = vadd.f32 %v8356_v32, %v5324_v56 }
0x4c5c   :  { %v5328_v15 = vmax.f32 %v5327_v60, 0.0 }
0x4c5e   :  { %7375 = vmatmul.mubr.msk.f32.vlgmr.msra.gmra.mxu0 %vm73_vm1, %v5328_v15 }
0x4c5f   :  { %7383 = vmatpush3.msk.msra.mxu0 %vm399_vm6, %v8682_v58  ;;  %7386 = vmatprep.mubr.msk.f32.mxu0 %vm7738_vm0, %v7737_v0 }
0x4c60   :  { %7384 = vmatprep.subr.mxu0 %v7737_v0 }
0x4c61   :  { %7385 = vmatpush3.msra.mxu0 %v8689_v24 }
0x4c62   :  { %7400 = vmatprep.subr.mxu0 %v7737_v0 }
0x4d1e   :  { %v5398_v11 = vpop.f32.mrf.mxu0 }
0x4d1f   :  { %v5399_v32 = vadd.f32 %v8370_v3, %v5398_v11 }
0x4d20   :  { %v7376_v59 = vpop.f32.mrf.mxu0 }
0x4d21   :  { %v5402_v27 = vmax.f32 %v5399_v32, 0.0 }
0x4d23   :  { %v5403_v28 = vmul.f32 %v8376_v4, %v5402_v27 }
0x4d25   :  { %v5404_v17 = vadd.f32 %v8382_v31, %v5403_v28 }
0x4d27   :  { %v5407_v18 = vsel %vm831_vm8, %v5404_v17, -inf  ;;  %6577 = vst.msk [vmem:[%s8885_s5 + $0x24] sm:$0xf] %vm831_vm8, %v5404_v17 }
0x4d28   :  { %5408 = vmax.xlane.f32.xlu1 %v5407_v18 }
0x4db1   :  { %v5409_v61 = vpop.xlane.xlu1 %5408 }
0x4db2   :  { %vm5410_vm12 = vcmp.eq.f32.partialorder %v5404_v17, %v5409_v61 }
0x4db3   :  { %v5411_v62 = vsel %vm5410_vm12, %v7958_v38, 9 }
0x4db4   :  { %v5412_v3 = vsel %vm831_vm8, %v5411_v62, 2147483647  ;;  %v8773_v62 = vld [vmem:[#allocation2 + $0xb8] sm:$0xff] }
0x4db5   :  { %v5414_v63 = vshra.s32 %v5412_v3, 16  ;;  %v5413_v4 = vand.u32 65535, %v5412_v3  ;;  %v8779_v3 = vld [vmem:[#allocation2 + $0xb0] sm:$0xff] }
0x4db7   :  { %v5416_v1 = vcvt.s32.f32 %v5414_v63  ;;  %v5415_v31 = vcvt.s32.f32 %v5413_v4 }
0x4db9   :  { %5417 = vmin.xlane.f32.xlu0 %v5416_v1 }
0x4e42   :  { %v5418_v2 = vpop.xlane.xlu0 %5417 }
0x4e43   :  { %vm5419_vm13 = vcmp.eq.f32.partialorder %v5416_v1, %v5418_v2  ;;  %v5424_v49 = vcvt.f32.s32 %v5418_v2  ;;  %v8786_v2 = vld [vmem:[%s8884_s4 + $0x6] ss:$0 sm:$0xff] }
0x4e44   :  { %v5420_v19 = vsel %vm5419_vm13, %v5415_v31, inf }
0x4e45   :  { %5421 = vmin.xlane.f32.xlu0 %v5420_v19  ;;  %v5425_v29 = vshll.u32 %v5424_v49, 16  ;;  %v8800_v49 = vld [vmem:[%s8884_s4 + $0x7] ss:$0 sm:$0xff] }
0x4ece   :  { %v5422_v7 = vpop.xlane.xlu0 %5421 }
0x4ecf   :  { %v5423_v13 = vcvt.f32.s32 %v5422_v7 }
0x4ed1   :  { %v5426_v47 = vadd.s32 %v5425_v29, %v5423_v13 }
0x4ed3   :  { %vm5427_vm14 = vcmp.eq.s32.totalorder %v7958_v38, %v5426_v47 }
0x4ed4   :  { %v6578_v25 = vsel %vm5427_vm14, 1.0, %v7737_v0 }
0x4ed5   :  { %7387 = vmatmul.mubr.msk.f32.vlgmr.msra.gmra.mxu0 %vm395_vm7, %v6578_v25 }
0x4ed6   :  { %7401 = vmatpush3.msra.mxu0 %v8728_v26  ;;  %7408 = vmatprep.mubr.msk.f32.mxu0 %vm7738_vm0, %v7737_v0 }
0x4ed7   :  { %7402 = vmatprep.subr.mxu0 %v7737_v0 }
0x4ed8   :  { %7403 = vmatpush3.msra.mxu0 %v8734_v14 }
0x4ed9   :  { %7404 = vmatprep.subr.mxu0 %v7737_v0 }
0x4eda   :  { %7405 = vmatpush3.msra.mxu0 %v8738_v50 }
0x4edb   :  { %7406 = vmatprep.subr.mxu0 %v7737_v0 }
0x4edc   :  { %7407 = vmatpush3.msra.mxu0 %v8742_v8 }
0x4edd   :  { %7418 = vmatprep.subr.mxu0 %v7737_v0 }
0x4f95   :  { %v5574_v23 = vpop.f32.mrf.mxu0 }
0x4f96   :  { %v5575_v30 = vadd.f32 %v5574_v23, %v5501_v21 }
0x4f97   :  { %v7388_v33 = vpop.f32.mrf.mxu0 }
0x4f98   :  { %v5578_v52 = vadd.f32 %v5575_v30, %v7844_v36 }
0x4f9a   :  { %7640 = vtanh.f32 %v5578_v52  ;;  %v6584_v35 = vmul.f32 -1.442695, %v5578_v52 }
0x4f9c   :  { %7642 = vpow2.f32 %v6584_v35 }
0x4fa7   :  { %v7641_v53 = vpop.eup %7640 }
0x4fa8   :  { %5587 = vrot.lane.b32.xlu1 %v7641_v53, %s7739_s1 }
0x4fa9   :  { %v7643_v5 = vpop.eup %7642 }
0x4faa   :  { %v5582_v6 = vadd.f32 1.0, %v7643_v5 }
0x4fac   :  { %7644 = vrcp.f32 %v5582_v6 }
0x4fb9   :  { %v7645_v16 = vpop.eup %7644 }
0x501a   :  { %v5588_v39 = vpop.permute.xlu1 %5587 }
0x501b   :  { %v5590_v40 = vmul.f32 %v7645_v16, %v5588_v39 }
0x501d   :  { %7646 = vtanh.f32 %v5590_v40 }
0x502a   :  { %v7647_v41 = vpop.eup %7646 }
0x502b   :  { %5593 = vrot.lane.b32.xlu0 %v7647_v41, %s7740_s14 }
0x509d   :  { %v5594_v55 = vpop.permute.xlu0 %5593 }
0x509e   :  { %v5596_v42 = vmul.f32 %v7645_v16, %v5594_v55  ;;  %v6593_v16 = vld [vmem:[%s8882_s2 + $0x2c] sm:$0xf] }
0x50a0   :  { %5598 = vrot.lane.b32.xlu1 %v5596_v42, %s7740_s14 }
0x5112   :  { %v5599_v43 = vpop.permute.xlu1 %5598 }
0x5113   :  { %7398 = vmatmul.mubr.msk.f32.vlgmr.msra.gmra.mxu1 %vm152_vm2, %v5599_v43 }
0x5114   :  { %7412 = vmatpush3.msk.msra.mxu1 %vm399_vm6, %v8751_v44  ;;  %7415 = vmatprep.mubr.msk.f32.mxu1 %vm7738_vm0, %v7737_v0 }
0x5115   :  { %7413 = vmatprep.subr.mxu1 %v7737_v0 }
0x5116   :  { %7414 = vmatpush3.msra.mxu1 %v8758_v45 }
0x5117   :  { %7416 = vmatmul.mubr.msk.f32.vlgmr.msra.gmra.mxu1 %vm395_vm7, %v6578_v25  ;;  %7425 = vmatprep.subr.mxu1 %v7737_v0 }
0x5118   :  { %7426 = vmatpush3.msk.msra.mxu1 %vm321_vm3, %v8657_v34  ;;  %7427 = vmatprep.mubr.msk.f32.mxu1 %vm7738_vm0, %v7737_v0 }
0x5119   :  { %7437 = vmatprep.subr.mxu1 %v7737_v0 }
0x511b   :  { %7428 = vmatmul.mubr.msk.f32.vlgmr.msra.gmra.mxu1 %vm317_vm4, %v6593_v16 }
0x511c   :  { %7438 = vmatpush3.msra.mxu1 %v8707_v10  ;;  %7445 = vmatprep.mubr.msk.f32.mxu1 %vm7738_vm0, %v7737_v0 }
0x511d   :  { %7439 = vmatprep.subr.mxu1 %v7737_v0 }
0x511e   :  { %7440 = vmatpush3.msra.mxu1 %v8713_v12 }
0x511f   :  { %7441 = vmatprep.subr.mxu1 %v7737_v0 }
0x5120   :  { %7442 = vmatpush3.msra.mxu1 %v8717_v20 }
0x5121   :  { %7443 = vmatprep.subr.mxu1 %v7737_v0 }
0x5122   :  { %7444 = vmatpush3.msra.mxu1 %v8721_v48 }
0x5123   :  { %7459 = vmatprep.subr.mxu1 %v7737_v0 }
0x51d3   :  { %v5668_v46 = vpop.f32.mrf.mxu1 }
0x51d4   :  { %v5669_v51 = vadd.f32 %v8667_v37, %v5668_v46 }
0x51d5   :  { %v7399_v54 = vpop.f32.mrf.mxu1 }
0x51d6   :  { %7648 = vtanh.f32 %v5669_v51  ;;  %v6586_v15 = vmul.f32 -1.442695, %v5669_v51 }
0x51d7   :  { %v5831_v56 = vpop.f32.mrf.mxu1 }
0x51d8   :  { %7650 = vpow2.f32 %v6586_v15 }
0x51d9   :  { %v7417_v57 = vpop.f32.mrf.mxu1 }
0x51e3   :  { %v7649_v60 = vpop.eup %7648 }
0x51e4   :  { %5680 = vrot.lane.b32.xlu1 %v7649_v60, %s7739_s1 }
0x51e5   :  { %v7651_v11 = vpop.eup %7650 }
0x51e6   :  { %v5675_v32 = vadd.f32 1.0, %v7651_v11 }
0x51e8   :  { %7652 = vrcp.f32 %v5675_v32 }
0x51f5   :  { %v7653_v34 = vpop.eup %7652 }
0x5256   :  { %v5681_v59 = vpop.permute.xlu1 %5680 }
0x5257   :  { %v5683_v27 = vmul.f32 %v7653_v34, %v5681_v59 }
0x5259   :  { %7654 = vtanh.f32 %v5683_v27 }
0x5266   :  { %v7655_v28 = vpop.eup %7654 }
0x5267   :  { %5686 = vrot.lane.b32.xlu0 %v7655_v28, %s7740_s14 }
0x52d9   :  { %v5687_v17 = vpop.permute.xlu0 %5686 }
0x52da   :  { %v5689_v18 = vmul.f32 %v7653_v34, %v5687_v17 }
0x52dc   :  { %5691 = vrot.lane.b32.xlu1 %v5689_v18, %s7740_s14 }
0x534e   :  { %v5692_v61 = vpop.permute.xlu1 %5691 }
0x534f   :  { %7409 = vmatmul.mubr.msk.f32.vlgmr.msra.gmra.mxu0 %vm152_vm2, %v5692_v61 }
0x5350   :  { %7419 = vmatpush3.msra.mxu0 %v8773_v62  ;;  %7422 = vmatprep.mubr.msk.f32.mxu0 %vm7738_vm0, %v7737_v0 }
0x5351   :  { %7420 = vmatprep.subr.mxu0 %v7737_v0 }
0x5352   :  { %7421 = vmatpush3.msra.mxu0 %v8779_v3 }
0x5353   :  { %7430 = vmatprep.subr.mxu0 %v7737_v0 }
0x540f   :  { %v5761_v63 = vpop.f32.mrf.mxu0 }
0x5410   :  { %v5832_v1 = vadd.f32 %v5831_v56, %v5761_v63 }
0x5411   :  { %v7410_v4 = vpop.f32.mrf.mxu0 }
0x5412   :  { %v5835_v31 = vadd.f32 %v8786_v2, %v5832_v1 }
0x5414   :  { %v5836_v19 = vmax.f32 %v5835_v31, 0.0 }
0x5416   :  { %7423 = vmatmul.mubr.msk.f32.vlgmr.msra.gmra.mxu0 %vm73_vm1, %v5836_v19 }
0x5417   :  { %7431 = vmatpush3.msk.msra.mxu0 %vm399_vm6, %v8682_v58  ;;  %7434 = vmatprep.mubr.msk.f32.mxu0 %vm7738_vm0, %v7737_v0  ;;  %v8806_v58 = vld [vmem:[%s8884_s4 + $0x8] ss:$0 sm:$0xff] }
0x5418   :  { %7432 = vmatprep.subr.mxu0 %v7737_v0 }
0x5419   :  { %7433 = vmatpush3.msra.mxu0 %v8689_v24  ;;  %v8812_v24 = vld [vmem:[%s8884_s4 + $0x9] ss:$0 sm:$0xff] }
0x541a   :  { %7448 = vmatprep.subr.mxu0 %v7737_v0 }
0x54d6   :  { %v5906_v9 = vpop.f32.mrf.mxu0 }
0x54d7   :  { %v5907_v7 = vadd.f32 %v8800_v49, %v5906_v9 }
0x54d8   :  { %v7424_v29 = vpop.f32.mrf.mxu0 }
0x54d9   :  { %v5910_v13 = vmax.f32 %v5907_v7, 0.0 }
0x54db   :  { %v5911_v47 = vmul.f32 %v8806_v58, %v5910_v13 }
0x54dd   :  { %v5912_v25 = vadd.f32 %v8812_v24, %v5911_v47 }
0x54df   :  { %v5915_v21 = vsel %vm831_vm8, %v5912_v25, -inf  ;;  %6591 = vst.msk [vmem:[%s8885_s5 + $0x28] sm:$0xf] %vm831_vm8, %v5912_v25 }
0x54e0   :  { %5916 = vmax.xlane.f32.xlu0 %v5915_v21 }
0x5569   :  { %v5917_v22 = vpop.xlane.xlu0 %5916 }
0x556a   :  { %vm5918_vm3 = vcmp.eq.f32.partialorder %v5912_v25, %v5917_v22 }
0x556b   :  { %v5919_v23 = vsel %vm5918_vm3, %v7958_v38, 9 }
0x556c   :  { %v5920_v30 = vsel %vm831_vm8, %v5919_v23, 2147483647 }
0x556d   :  { %v5922_v33 = vshra.s32 %v5920_v30, 16  ;;  %v5921_v53 = vand.u32 65535, %v5920_v30 }
0x556f   :  { %v5924_v52 = vcvt.s32.f32 %v5922_v33  ;;  %v5923_v5 = vcvt.s32.f32 %v5921_v53 }
0x5571   :  { %5925 = vmin.xlane.f32.xlu1 %v5924_v52 }
0x55fa   :  { %v5926_v35 = vpop.xlane.xlu1 %5925 }
0x55fb   :  { %vm5927_vm15 = vcmp.eq.f32.partialorder %v5924_v52, %v5926_v35  ;;  %v5932_v39 = vcvt.f32.s32 %v5926_v35 }
0x55fc   :  { %v5928_v6 = vsel %vm5927_vm15, %v5923_v5, inf }
0x55fd   :  { %5929 = vmin.xlane.f32.xlu0 %v5928_v6  ;;  %v5933_v10 = vshll.u32 %v5932_v39, 16 }
0x5686   :  { %v5930_v40 = vpop.xlane.xlu0 %5929 }
0x5687   :  { %v5931_v41 = vcvt.f32.s32 %v5930_v40 }
0x5689   :  { %v5934_v55 = vadd.s32 %v5933_v10, %v5931_v41 }
0x568b   :  { %vm5935_vm4 = vcmp.eq.s32.totalorder %v7958_v38, %v5934_v55  ;;  %v6009_v38 = vpop.f32.mrf.mxu1 }
0x568c   :  { %v6592_v42 = vsel %vm5935_vm4, 1.0, %v7737_v0 }
0x568d   :  { %7435 = vmatmul.mubr.msk.f32.vlgmr.msra.gmra.mxu0 %vm395_vm7, %v6592_v42  ;;  %v7429_v12 = vpop.f32.mrf.mxu1 }
0x568e   :  { %7449 = vmatpush3.msra.mxu0 %v8728_v26  ;;  %7456 = vmatprep.mubr.msk.f32.mxu0 %vm7738_vm0, %v7737_v0 }
0x568f   :  { %7450 = vmatprep.subr.mxu0 %v7737_v0 }
0x5690   :  { %7451 = vmatpush3.msra.mxu0 %v8734_v14 }
0x5691   :  { %7452 = vmatprep.subr.mxu0 %v7737_v0 }
0x5692   :  { %7453 = vmatpush3.msra.mxu0 %v8738_v50 }
0x5693   :  { %7454 = vmatprep.subr.mxu0 %v7737_v0 }
0x5694   :  { %7455 = vmatpush3.msra.mxu0 %v8742_v8 }
0x5695   :  { %7466 = vmatprep.subr.mxu0 %v7737_v0 }
0x574d   :  { %v6082_v20 = vpop.f32.mrf.mxu0 }
0x574e   :  { %v6083_v48 = vadd.f32 %v6082_v20, %v6009_v38 }
0x574f   :  { %v7436_v26 = vpop.f32.mrf.mxu0 }
0x5750   :  { %v6086_v43 = vadd.f32 %v6083_v48, %v7844_v36 }
0x5752   :  { %7656 = vtanh.f32 %v6086_v43  ;;  %v6598_v14 = vmul.f32 -1.442695, %v6086_v43 }
0x5754   :  { %7658 = vpow2.f32 %v6598_v14 }
0x575f   :  { %v7657_v46 = vpop.eup %7656 }
0x5760   :  { %6095 = vrot.lane.b32.xlu0 %v7657_v46, %s7739_s1 }
0x5761   :  { %v7659_v50 = vpop.eup %7658 }
0x5762   :  { %v6090_v51 = vadd.f32 1.0, %v7659_v50 }
0x5764   :  { %7660 = vrcp.f32 %v6090_v51 }
0x5771   :  { %v7661_v54 = vpop.eup %7660 }
0x57d2   :  { %v6096_v8 = vpop.permute.xlu0 %6095 }
0x57d3   :  { %v6098_v56 = vmul.f32 %v7661_v54, %v6096_v8 }
0x57d5   :  { %7662 = vtanh.f32 %v6098_v56 }
0x57e2   :  { %v7663_v57 = vpop.eup %7662 }
0x57e3   :  { %6101 = vrot.lane.b32.xlu1 %v7663_v57, %s7740_s14 }
0x5855   :  { %v6102_v60 = vpop.permute.xlu1 %6101 }
0x5856   :  { %v6104_v15 = vmul.f32 %v7661_v54, %v6102_v60 }
0x5858   :  { %6106 = vrot.lane.b32.xlu1 %v6104_v15, %s7740_s14 }
0x58ca   :  { %v6107_v36 = vpop.permute.xlu1 %6106 }
0x58cb   :  { %7446 = vmatmul.mubr.msk.f32.vlgmr.msra.gmra.mxu1 %vm152_vm2, %v6107_v36 }
0x58cc   :  { %7460 = vmatpush3.msk.msra.mxu1 %vm399_vm6, %v8751_v44  ;;  %7463 = vmatprep.mubr.msk.f32.mxu1 %vm7738_vm0, %v7737_v0 }
0x58cd   :  { %7461 = vmatprep.subr.mxu1 %v7737_v0 }
0x58ce   :  { %7462 = vmatpush3.msra.mxu1 %v8758_v45 }
0x58cf   :  { %7464 = vmatmul.mubr.msk.f32.vlgmr.msra.gmra.mxu1 %vm395_vm7, %v6592_v42 }
0x598b   :  { %v6176_v11 = vpop.f32.mrf.mxu1 }
0x598c   :  { %v6177_v32 = vadd.f32 %v8667_v37, %v6176_v11 }
0x598d   :  { %v7447_v34 = vpop.f32.mrf.mxu1 }
0x598e   :  { %7664 = vtanh.f32 %v6177_v32  ;;  %v6600_v44 = vmul.f32 -1.442695, %v6177_v32 }
0x598f   :  { %v6339_v59 = vpop.f32.mrf.mxu1 }
0x5990   :  { %7666 = vpow2.f32 %v6600_v44 }
0x5991   :  { %v7465_v27 = vpop.f32.mrf.mxu1 }
0x599b   :  { %v7665_v28 = vpop.eup %7664 }
0x599c   :  { %6188 = vrot.lane.b32.xlu0 %v7665_v28, %s7739_s1 }
0x599d   :  { %v7667_v17 = vpop.eup %7666 }
0x599e   :  { %v6183_v18 = vadd.f32 1.0, %v7667_v17 }
0x59a0   :  { %7668 = vrcp.f32 %v6183_v18 }
0x59ad   :  { %v7669_v61 = vpop.eup %7668 }
0x5a0e   :  { %v6189_v63 = vpop.permute.xlu0 %6188 }
0x5a0f   :  { %v6191_v45 = vmul.f32 %v7669_v61, %v6189_v63 }
0x5a11   :  { %7670 = vtanh.f32 %v6191_v45 }
0x5a1e   :  { %v7671_v1 = vpop.eup %7670 }
0x5a1f   :  { %6194 = vrot.lane.b32.xlu1 %v7671_v1, %s7740_s14 }
0x5a91   :  { %v6195_v37 = vpop.permute.xlu1 %6194 }
0x5a92   :  { %v6197_v4 = vmul.f32 %v7669_v61, %v6195_v37 }
0x5a94   :  { %6199 = vrot.lane.b32.xlu0 %v6197_v4, %s7740_s14 }
0x5b06   :  { %v6200_v31 = vpop.permute.xlu0 %6199 }
0x5b07   :  { %7457 = vmatmul.mubr.msk.f32.vlgmr.msra.gmra.mxu0 %vm152_vm2, %v6200_v31 }
0x5b08   :  { %7467 = vmatpush3.msra.mxu0 %v8773_v62  ;;  %7470 = vmatprep.mubr.msk.f32.mxu0 %vm7738_vm0, %v7737_v0 }
0x5b09   :  { %7468 = vmatprep.subr.mxu0 %v7737_v0 }
0x5b0a   :  { %7469 = vmatpush3.msra.mxu0 %v8779_v3 }
0x5bc7   :  { %v6269_v19 = vpop.f32.mrf.mxu0 }
0x5bc8   :  { %v6340_v9 = vadd.f32 %v6339_v59, %v6269_v19 }
0x5bc9   :  { %v7458_v7 = vpop.f32.mrf.mxu0 }
0x5bca   :  { %v6343_v29 = vadd.f32 %v8786_v2, %v6340_v9 }
0x5bcc   :  { %v6344_v13 = vmax.f32 %v6343_v29, 0.0 }
0x5bce   :  { %7471 = vmatmul.mubr.msk.f32.vlgmr.msra.gmra.mxu0 %vm73_vm1, %v6344_v13 }
0x5c8e   :  { %v6414_v47 = vpop.f32.mrf.mxu0 }
0x5c8f   :  { %v6415_v25 = vadd.f32 %v8800_v49, %v6414_v47 }
0x5c90   :  { %v7472_v21 = vpop.f32.mrf.mxu0 }
0x5c91   :  { %v6418_v62 = vmax.f32 %v6415_v25, 0.0 }
0x5c93   :  { %v6419_v22 = vmul.f32 %v8806_v58, %v6418_v62 }
0x5c95   :  { %v6420_v23 = vadd.f32 %v8812_v24, %v6419_v22 }
0x5c97   :  { %6605 = vst.msk [vmem:[%s8885_s5 + $0x2c] sm:$0xf] %vm831_vm8, %v6420_v23 }
0x5c98   :  { %6427 = vsyncpa [#allocation3], 1 }

</bundles_post_ra>
